<compile_context>
chip_gen: v7x
topology: tpu7x:2x2x1
jax: 0.10.0
libtpu: 0.0.40
codegen_flags: <defaults>
</compile_context>

<pallas_src>
import functools
import math

import jax
import jax.numpy as jnp
from jax.experimental import pallas as pl
from jax.experimental.pallas import tpu as pltpu

_NEG = -1e9  # large finite negative for additive masking (avoids inf/NaN)


# ------------------------------ fused kernel --------------------------------

def _decoder_block_kernel(
    tgt_ref, mem_ref, tmask_ref, mmask_ref,
    sa_in_w_ref, sa_in_b_ref, sa_out_w_ref, sa_out_b_ref,
    ca_in_w_ref, ca_in_b_ref, ca_out_w_ref, ca_out_b_ref,
    lin1_w_ref, lin1_b_ref, lin2_w_ref, lin2_b_ref,
    n1_w_ref, n1_b_ref, n2_w_ref, n2_b_ref,
    n3_w_ref, n3_b_ref, fn_w_ref, fn_b_ref,
    out_ref,
    *, num_layers, nhead, eps):
  T, D = tgt_ref.shape[1], tgt_ref.shape[2]
  S = mem_ref.shape[1]
  dh = D // nhead
  scale = 1.0 / math.sqrt(dh)
  cdt = sa_in_w_ref.dtype                    # MXU operand dtype (bf16)

  x = tgt_ref[0].astype(jnp.float32)         # (T, D)
  mem = mem_ref[0].astype(jnp.float32)       # (S, D)
  tmask = tmask_ref[0]                       # (T, T) additive, f32
  mmask = mmask_ref[0]                       # (T, S) additive, f32

  # Shared weights: loaded once, reused by every (unrolled) layer iteration.
  sa_in_w, sa_in_b = sa_in_w_ref[...], sa_in_b_ref[...]
  sa_out_w, sa_out_b = sa_out_w_ref[...], sa_out_b_ref[...]
  ca_in_w, ca_in_b = ca_in_w_ref[...], ca_in_b_ref[...]
  ca_out_w, ca_out_b = ca_out_w_ref[...], ca_out_b_ref[...]
  lin1_w, lin1_b = lin1_w_ref[...], lin1_b_ref[...]
  lin2_w, lin2_b = lin2_w_ref[...], lin2_b_ref[...]
  n1_w, n1_b = n1_w_ref[...], n1_b_ref[...]
  n2_w, n2_b = n2_w_ref[...], n2_b_ref[...]
  n3_w, n3_b = n3_w_ref[...], n3_b_ref[...]
  fn_w, fn_b = fn_w_ref[...], fn_b_ref[...]

  def mm(a, w, b):
    y = jnp.dot(a.astype(cdt), w.astype(cdt),
                preferred_element_type=jnp.float32)
    return y + b                              # b: (1, Dout) f32

  def layernorm(z, g, b):                     # z: (L, D) f32
    mu = jnp.mean(z, axis=-1, keepdims=True)
    var = jnp.mean((z - mu) ** 2, axis=-1, keepdims=True)
    zn = (z - mu) * jax.lax.rsqrt(var + eps)
    return zn * g + b

  def attention(q2d, k2d, v2d, mask):
    # per-head static lane slices; softmax in f32, matmul operands in bf16
    outs = []
    for h in range(nhead):
      sl = slice(h * dh, (h + 1) * dh)
      qh = q2d[:, sl].astype(cdt)             # (Lq, dh)
      kh = k2d[:, sl].astype(cdt)             # (Lk, dh)
      vh = v2d[:, sl].astype(cdt)             # (Lk, dh)
      # q @ k^T without an explicit transpose (contract dim 1 with dim 1)
      s = jax.lax.dot_general(qh, kh, (((1,), (1,)), ((), ())),
                              preferred_element_type=jnp.float32)
      s = s * scale + mask
      s = s - jnp.max(s, axis=-1, keepdims=True)
      p = jnp.exp(s)
      inv = pl.reciprocal(jnp.sum(p, axis=-1, keepdims=True), approx=True)
      p = (p * inv).astype(cdt)
      outs.append(jnp.dot(p, vh, preferred_element_type=jnp.float32))
    return jnp.concatenate(outs, axis=-1)     # (Lq, D) f32

  # Cross-attention K/V depend only on `memory` and the (shared) weights:
  # hoisted out of the layer loop.
  ca_kv = mm(mem, ca_in_w[:, D:], ca_in_b[:, D:])       # (S, 2D)
  ca_k, ca_v = ca_kv[:, :D], ca_kv[:, D:]

  for _ in range(num_layers):                 # unrolled, weights stay resident
    # ---- self attention (fused QKV matmul) + residual + norm1 ----
    qkv = mm(x, sa_in_w, sa_in_b)             # (T, 3D)
    sa = attention(qkv[:, :D], qkv[:, D:2 * D], qkv[:, 2 * D:], tmask)
    sa = mm(sa, sa_out_w, sa_out_b)
    x = layernorm(x + sa, n1_w, n1_b)
    # ---- cross attention + residual + norm2 ----
    q = mm(x, ca_in_w[:, :D], ca_in_b[:, :D])
    ca = attention(q, ca_k, ca_v, mmask)
    ca = mm(ca, ca_out_w, ca_out_b)
    x = layernorm(x + ca, n2_w, n2_b)
    # ---- feed-forward (linear -> relu -> linear) + residual + norm3 ----
    hdn = jnp.maximum(mm(x, lin1_w, lin1_b), 0.0)
    ffn = mm(hdn, lin2_w, lin2_b)
    x = layernorm(x + ffn, n3_w, n3_b)

  # final DecoderBlock norm
  x = layernorm(x, fn_w, fn_b)
  out_ref[0] = x.astype(out_ref.dtype)


# ------------------------------ glue (plain JAX) ----------------------------

def build_additive_mask(B, Lq, Lk, attn_mask, key_padding_mask):
  m = jnp.zeros((B, Lq, Lk), jnp.float32)
  if attn_mask is not None:
    am = attn_mask.astype(jnp.float32)
    if am.ndim == 2:
      am = am[None]
    m = m + am
  if key_padding_mask is not None:
    m = m + jnp.where(key_padding_mask[:, None, :], _NEG, 0.0).astype(jnp.float32)
  return m


def decoder_block_fwd(tgt, memory, params, num_layers, nhead,
                      tgt_mask=None, memory_mask=None,
                      tgt_key_padding_mask=None, memory_key_padding_mask=None,
                      compute_dtype=jnp.bfloat16):
  """tgt: (T, B, D), memory: (S, B, D) -> (T, B, D)."""
  T, B, D = tgt.shape
  S = memory.shape[0]

  tmask = build_additive_mask(B, T, T, tgt_mask, tgt_key_padding_mask)
  mmask = build_additive_mask(B, T, S, memory_mask, memory_key_padding_mask)

  # single boundary transpose to batch-major; everything else is in-kernel
  tgt_b = jnp.transpose(tgt, (1, 0, 2))       # (B, T, D)
  mem_b = jnp.transpose(memory, (1, 0, 2))    # (B, S, D)

  def wT(w):                                  # (out,in) -> (in,out), bf16 for MXU
    return jnp.asarray(w, jnp.float32).T.astype(compute_dtype)

  def row(v):                                 # (N,) -> (1, N) f32
    return jnp.asarray(v, jnp.float32).reshape(1, -1)

  weights = [
      wT(params["sa_in_w"]), row(params["sa_in_b"]),
      wT(params["sa_out_w"]), row(params["sa_out_b"]),
      wT(params["ca_in_w"]), row(params["ca_in_b"]),
      wT(params["ca_out_w"]), row(params["ca_out_b"]),
      wT(params["lin1_w"]), row(params["lin1_b"]),
      wT(params["lin2_w"]), row(params["lin2_b"]),
      row(params["norm1_w"]), row(params["norm1_b"]),
      row(params["norm2_w"]), row(params["norm2_b"]),
      row(params["norm3_w"]), row(params["norm3_b"]),
      row(params["fnorm_w"]), row(params["fnorm_b"]),
  ]

  in_specs = [
      pl.BlockSpec((1, T, D), lambda b: (b, 0, 0)),   # tgt (batch-major)
      pl.BlockSpec((1, S, D), lambda b: (b, 0, 0)),   # memory
      pl.BlockSpec((1, T, T), lambda b: (b, 0, 0)),   # self-attn mask
      pl.BlockSpec((1, T, S), lambda b: (b, 0, 0)),   # cross-attn mask
  ] + [pl.BlockSpec(w.shape, lambda b: (0, 0)) for w in weights]

  out = pl.pallas_call(
      functools.partial(_decoder_block_kernel, num_layers=num_layers,
                        nhead=nhead, eps=1e-5),
      out_shape=jax.ShapeDtypeStruct((B, T, D), tgt.dtype),
      grid=(B,),
      in_specs=in_specs,
      out_specs=pl.BlockSpec((1, T, D), lambda b: (b, 0, 0)),
      compiler_params=pltpu.CompilerParams(
          dimension_semantics=("parallel",)),   # shard batch over TensorCores
  )(tgt_b, mem_b, tmask, mmask, *weights)

  return jnp.transpose(out, (1, 0, 2))          # back to (T, B, D)


# ---------------------------- parameter construction ------------------------

def make_params(key, D, FF):
  ks = jax.random.split(key, 10)
  s = 0.05
  return {
      "sa_in_w": s * jax.random.normal(ks[0], (3 * D, D), jnp.float32),
      "sa_in_b": s * jax.random.normal(ks[1], (3 * D,), jnp.float32),
      "sa_out_w": s * jax.random.normal(ks[2], (D, D), jnp.float32),
      "sa_out_b": jnp.zeros((D,), jnp.float32),
      "ca_in_w": s * jax.random.normal(ks[3], (3 * D, D), jnp.float32),
      "ca_in_b": s * jax.random.normal(ks[4], (3 * D,), jnp.float32),
      "ca_out_w": s * jax.random.normal(ks[5], (D, D), jnp.float32),
      "ca_out_b": jnp.zeros((D,), jnp.float32),
      "lin1_w": s * jax.random.normal(ks[6], (FF, D), jnp.float32),
      "lin1_b": s * jax.random.normal(ks[7], (FF,), jnp.float32),
      "lin2_w": s * jax.random.normal(ks[8], (D, FF), jnp.float32),
      "lin2_b": s * jax.random.normal(ks[9], (D,), jnp.float32),
      "norm1_w": jnp.ones((D,), jnp.float32), "norm1_b": jnp.zeros((D,), jnp.float32),
      "norm2_w": jnp.ones((D,), jnp.float32), "norm2_b": jnp.zeros((D,), jnp.float32),
      "norm3_w": jnp.ones((D,), jnp.float32), "norm3_b": jnp.zeros((D,), jnp.float32),
      "fnorm_w": jnp.ones((D,), jnp.float32), "fnorm_b": jnp.zeros((D,), jnp.float32),
  }


# ----------------------------------- main -----------------------------------

if __name__ == "__main__":
  T, S, B, D, H, FF = 8, 8, 2, 32, 4, 64
  NUM_LAYERS = 2

  key = jax.random.PRNGKey(0)
  k_tgt, k_mem, k_par = jax.random.split(key, 3)
  tgt = jax.random.normal(k_tgt, (T, B, D), jnp.float32)
  memory = jax.random.normal(k_mem, (S, B, D), jnp.float32)
  params = make_params(k_par, D, FF)

  # causal tgt_mask with a large finite negative (no -inf / NaN hazard)
  causal = jnp.where(jnp.triu(jnp.ones((T, T), jnp.bool_), k=1), _NEG, 0.0)

  fwd = jax.jit(lambda t, m, p, cm: decoder_block_fwd(
      t, m, p, NUM_LAYERS, H, tgt_mask=cm))
  out = fwd(tgt, memory, params, causal)
  out = jax.block_until_ready(out)

  assert out.shape == (T, B, D)
  assert bool(jnp.all(jnp.isfinite(out)))
  # TODO(synk): dropout inside nn.TransformerDecoderLayer is eval-mode identity here.
  print("KERNEL_OK")
</pallas_src>

<mosaic_0001>
module attributes {stable_mosaic.version = 11 : i64} {
  func.func @_decoder_block_kernel(%arg0: i32, %arg1: memref<1x8x32xf32, #tpu.memory_space<vmem>>, %arg2: memref<1x8x32xf32, #tpu.memory_space<vmem>>, %arg3: memref<1x8x8xf32, #tpu.memory_space<vmem>>, %arg4: memref<1x8x8xf32, #tpu.memory_space<vmem>>, %arg5: memref<32x96xbf16, #tpu.memory_space<vmem>>, %arg6: memref<1x96xf32, #tpu.memory_space<vmem>>, %arg7: memref<32x32xbf16, #tpu.memory_space<vmem>>, %arg8: memref<1x32xf32, #tpu.memory_space<vmem>>, %arg9: memref<32x96xbf16, #tpu.memory_space<vmem>>, %arg10: memref<1x96xf32, #tpu.memory_space<vmem>>, %arg11: memref<32x32xbf16, #tpu.memory_space<vmem>>, %arg12: memref<1x32xf32, #tpu.memory_space<vmem>>, %arg13: memref<32x64xbf16, #tpu.memory_space<vmem>>, %arg14: memref<1x64xf32, #tpu.memory_space<vmem>>, %arg15: memref<64x32xbf16, #tpu.memory_space<vmem>>, %arg16: memref<1x32xf32, #tpu.memory_space<vmem>>, %arg17: memref<1x32xf32, #tpu.memory_space<vmem>>, %arg18: memref<1x32xf32, #tpu.memory_space<vmem>>, %arg19: memref<1x32xf32, #tpu.memory_space<vmem>>, %arg20: memref<1x32xf32, #tpu.memory_space<vmem>>, %arg21: memref<1x32xf32, #tpu.memory_space<vmem>>, %arg22: memref<1x32xf32, #tpu.memory_space<vmem>>, %arg23: memref<1x32xf32, #tpu.memory_space<vmem>>, %arg24: memref<1x32xf32, #tpu.memory_space<vmem>>, %arg25: memref<1x8x32xf32, #tpu.memory_space<vmem>>) attributes {dimension_semantics = [#tpu.dimension_semantics<parallel>], iteration_bounds = array<i64: 2>, scalar_prefetch = 0 : i64, scratch_operands = 0 : i64, tpu.core_type = #tpu.core_type<tc>, window_params = [{transform_indices = @transform_0, window_bounds = array<i64: 1, 8, 32>}, {transform_indices = @transform_1, window_bounds = array<i64: 1, 8, 32>}, {transform_indices = @transform_2, window_bounds = array<i64: 1, 8, 8>}, {transform_indices = @transform_3, window_bounds = array<i64: 1, 8, 8>}, {pipeline_mode = #tpu.pipeline_mode<synchronous>, transform_indices = @transform_4, window_bounds = array<i64: 32, 96>}, {pipeline_mode = #tpu.pipeline_mode<synchronous>, transform_indices = @transform_5, window_bounds = array<i64: 1, 96>}, {pipeline_mode = #tpu.pipeline_mode<synchronous>, transform_indices = @transform_6, window_bounds = array<i64: 32, 32>}, {pipeline_mode = #tpu.pipeline_mode<synchronous>, transform_indices = @transform_7, window_bounds = array<i64: 1, 32>}, {pipeline_mode = #tpu.pipeline_mode<synchronous>, transform_indices = @transform_8, window_bounds = array<i64: 32, 96>}, {pipeline_mode = #tpu.pipeline_mode<synchronous>, transform_indices = @transform_9, window_bounds = array<i64: 1, 96>}, {pipeline_mode = #tpu.pipeline_mode<synchronous>, transform_indices = @transform_10, window_bounds = array<i64: 32, 32>}, {pipeline_mode = #tpu.pipeline_mode<synchronous>, transform_indices = @transform_11, window_bounds = array<i64: 1, 32>}, {pipeline_mode = #tpu.pipeline_mode<synchronous>, transform_indices = @transform_12, window_bounds = array<i64: 32, 64>}, {pipeline_mode = #tpu.pipeline_mode<synchronous>, transform_indices = @transform_13, window_bounds = array<i64: 1, 64>}, {pipeline_mode = #tpu.pipeline_mode<synchronous>, transform_indices = @transform_14, window_bounds = array<i64: 64, 32>}, {pipeline_mode = #tpu.pipeline_mode<synchronous>, transform_indices = @transform_15, window_bounds = array<i64: 1, 32>}, {pipeline_mode = #tpu.pipeline_mode<synchronous>, transform_indices = @transform_16, window_bounds = array<i64: 1, 32>}, {pipeline_mode = #tpu.pipeline_mode<synchronous>, transform_indices = @transform_17, window_bounds = array<i64: 1, 32>}, {pipeline_mode = #tpu.pipeline_mode<synchronous>, transform_indices = @transform_18, window_bounds = array<i64: 1, 32>}, {pipeline_mode = #tpu.pipeline_mode<synchronous>, transform_indices = @transform_19, window_bounds = array<i64: 1, 32>}, {pipeline_mode = #tpu.pipeline_mode<synchronous>, transform_indices = @transform_20, window_bounds = array<i64: 1, 32>}, {pipeline_mode = #tpu.pipeline_mode<synchronous>, transform_indices = @transform_21, window_bounds = array<i64: 1, 32>}, {pipeline_mode = #tpu.pipeline_mode<synchronous>, transform_indices = @transform_22, window_bounds = array<i64: 1, 32>}, {pipeline_mode = #tpu.pipeline_mode<synchronous>, transform_indices = @transform_23, window_bounds = array<i64: 1, 32>}, {transform_indices = @transform_24, window_bounds = array<i64: 1, 8, 32>}]} {
    %c0 = arith.constant 0 : index
    %c0_0 = arith.constant 0 : index
    %c0_1 = arith.constant 0 : index
    %0 = vector.load %arg1[%c0, %c0_0, %c0_1] : memref<1x8x32xf32, #tpu.memory_space<vmem>>, vector<1x8x32xf32>
    %1 = vector.shape_cast %0 : vector<1x8x32xf32> to vector<8x32xf32>
    %c0_2 = arith.constant 0 : index
    %c0_3 = arith.constant 0 : index
    %c0_4 = arith.constant 0 : index
    %2 = vector.load %arg2[%c0_2, %c0_3, %c0_4] : memref<1x8x32xf32, #tpu.memory_space<vmem>>, vector<1x8x32xf32>
    %3 = vector.shape_cast %2 : vector<1x8x32xf32> to vector<8x32xf32>
    %c0_5 = arith.constant 0 : index
    %c0_6 = arith.constant 0 : index
    %c0_7 = arith.constant 0 : index
    %4 = vector.load %arg3[%c0_5, %c0_6, %c0_7] : memref<1x8x8xf32, #tpu.memory_space<vmem>>, vector<1x8x8xf32>
    %5 = vector.shape_cast %4 : vector<1x8x8xf32> to vector<8x8xf32>
    %c0_8 = arith.constant 0 : index
    %c0_9 = arith.constant 0 : index
    %c0_10 = arith.constant 0 : index
    %6 = vector.load %arg4[%c0_8, %c0_9, %c0_10] : memref<1x8x8xf32, #tpu.memory_space<vmem>>, vector<1x8x8xf32>
    %7 = vector.shape_cast %6 : vector<1x8x8xf32> to vector<8x8xf32>
    %c0_11 = arith.constant 0 : index
    %c0_12 = arith.constant 0 : index
    %8 = vector.load %arg5[%c0_11, %c0_12] : memref<32x96xbf16, #tpu.memory_space<vmem>>, vector<32x96xbf16>
    %c0_13 = arith.constant 0 : index
    %c0_14 = arith.constant 0 : index
    %9 = vector.load %arg6[%c0_13, %c0_14] : memref<1x96xf32, #tpu.memory_space<vmem>>, vector<1x96xf32>
    %c0_15 = arith.constant 0 : index
    %c0_16 = arith.constant 0 : index
    %10 = vector.load %arg7[%c0_15, %c0_16] : memref<32x32xbf16, #tpu.memory_space<vmem>>, vector<32x32xbf16>
    %c0_17 = arith.constant 0 : index
    %c0_18 = arith.constant 0 : index
    %11 = vector.load %arg8[%c0_17, %c0_18] : memref<1x32xf32, #tpu.memory_space<vmem>>, vector<1x32xf32>
    %c0_19 = arith.constant 0 : index
    %c0_20 = arith.constant 0 : index
    %12 = vector.load %arg9[%c0_19, %c0_20] : memref<32x96xbf16, #tpu.memory_space<vmem>>, vector<32x96xbf16>
    %c0_21 = arith.constant 0 : index
    %c0_22 = arith.constant 0 : index
    %13 = vector.load %arg10[%c0_21, %c0_22] : memref<1x96xf32, #tpu.memory_space<vmem>>, vector<1x96xf32>
    %c0_23 = arith.constant 0 : index
    %c0_24 = arith.constant 0 : index
    %14 = vector.load %arg11[%c0_23, %c0_24] : memref<32x32xbf16, #tpu.memory_space<vmem>>, vector<32x32xbf16>
    %c0_25 = arith.constant 0 : index
    %c0_26 = arith.constant 0 : index
    %15 = vector.load %arg12[%c0_25, %c0_26] : memref<1x32xf32, #tpu.memory_space<vmem>>, vector<1x32xf32>
    %c0_27 = arith.constant 0 : index
    %c0_28 = arith.constant 0 : index
    %16 = vector.load %arg13[%c0_27, %c0_28] : memref<32x64xbf16, #tpu.memory_space<vmem>>, vector<32x64xbf16>
    %c0_29 = arith.constant 0 : index
    %c0_30 = arith.constant 0 : index
    %17 = vector.load %arg14[%c0_29, %c0_30] : memref<1x64xf32, #tpu.memory_space<vmem>>, vector<1x64xf32>
    %c0_31 = arith.constant 0 : index
    %c0_32 = arith.constant 0 : index
    %18 = vector.load %arg15[%c0_31, %c0_32] : memref<64x32xbf16, #tpu.memory_space<vmem>>, vector<64x32xbf16>
    %c0_33 = arith.constant 0 : index
    %c0_34 = arith.constant 0 : index
    %19 = vector.load %arg16[%c0_33, %c0_34] : memref<1x32xf32, #tpu.memory_space<vmem>>, vector<1x32xf32>
    %c0_35 = arith.constant 0 : index
    %c0_36 = arith.constant 0 : index
    %20 = vector.load %arg17[%c0_35, %c0_36] : memref<1x32xf32, #tpu.memory_space<vmem>>, vector<1x32xf32>
    %c0_37 = arith.constant 0 : index
    %c0_38 = arith.constant 0 : index
    %21 = vector.load %arg18[%c0_37, %c0_38] : memref<1x32xf32, #tpu.memory_space<vmem>>, vector<1x32xf32>
    %c0_39 = arith.constant 0 : index
    %c0_40 = arith.constant 0 : index
    %22 = vector.load %arg19[%c0_39, %c0_40] : memref<1x32xf32, #tpu.memory_space<vmem>>, vector<1x32xf32>
    %c0_41 = arith.constant 0 : index
    %c0_42 = arith.constant 0 : index
    %23 = vector.load %arg20[%c0_41, %c0_42] : memref<1x32xf32, #tpu.memory_space<vmem>>, vector<1x32xf32>
    %c0_43 = arith.constant 0 : index
    %c0_44 = arith.constant 0 : index
    %24 = vector.load %arg21[%c0_43, %c0_44] : memref<1x32xf32, #tpu.memory_space<vmem>>, vector<1x32xf32>
    %c0_45 = arith.constant 0 : index
    %c0_46 = arith.constant 0 : index
    %25 = vector.load %arg22[%c0_45, %c0_46] : memref<1x32xf32, #tpu.memory_space<vmem>>, vector<1x32xf32>
    %c0_47 = arith.constant 0 : index
    %c0_48 = arith.constant 0 : index
    %26 = vector.load %arg23[%c0_47, %c0_48] : memref<1x32xf32, #tpu.memory_space<vmem>>, vector<1x32xf32>
    %c0_49 = arith.constant 0 : index
    %c0_50 = arith.constant 0 : index
    %27 = vector.load %arg24[%c0_49, %c0_50] : memref<1x32xf32, #tpu.memory_space<vmem>>, vector<1x32xf32>
    %28 = vector.extract_strided_slice %12 {offsets = [0, 32], sizes = [32, 64], strides = [1, 1]} : vector<32x96xbf16> to vector<32x64xbf16>
    %29 = vector.extract_strided_slice %13 {offsets = [0, 32], sizes = [1, 64], strides = [1, 1]} : vector<1x96xf32> to vector<1x64xf32>
    %30 = arith.truncf %3 : vector<8x32xf32> to vector<8x32xbf16>
    %cst = arith.constant dense<0.000000e+00> : vector<8x64xf32>
    %31 = tpu.matmul %30, %28, %cst {dimension_numbers = #tpu.dot_dimension_numbers<[1], [0], [0], [1], [0, 0, 1, 1], [], []>} : vector<8x32xbf16>, vector<32x64xbf16>, vector<8x64xf32> -> vector<8x64xf32>
    %32 = vector.broadcast %29 : vector<1x64xf32> to vector<8x64xf32>
    %33 = arith.addf %31, %32 : vector<8x64xf32>
    %34 = vector.extract_strided_slice %33 {offsets = [0, 0], sizes = [8, 32], strides = [1, 1]} : vector<8x64xf32> to vector<8x32xf32>
    %35 = vector.extract_strided_slice %33 {offsets = [0, 32], sizes = [8, 32], strides = [1, 1]} : vector<8x64xf32> to vector<8x32xf32>
    %36 = arith.truncf %1 : vector<8x32xf32> to vector<8x32xbf16>
    %cst_51 = arith.constant dense<0.000000e+00> : vector<8x96xf32>
    %37 = tpu.matmul %36, %8, %cst_51 {dimension_numbers = #tpu.dot_dimension_numbers<[1], [0], [0], [1], [0, 0, 1, 1], [], []>} : vector<8x32xbf16>, vector<32x96xbf16>, vector<8x96xf32> -> vector<8x96xf32>
    %38 = vector.broadcast %9 : vector<1x96xf32> to vector<8x96xf32>
    %39 = arith.addf %37, %38 : vector<8x96xf32>
    %40 = vector.extract_strided_slice %39 {offsets = [0, 0], sizes = [8, 32], strides = [1, 1]} : vector<8x96xf32> to vector<8x32xf32>
    %41 = vector.extract_strided_slice %39 {offsets = [0, 32], sizes = [8, 32], strides = [1, 1]} : vector<8x96xf32> to vector<8x32xf32>
    %42 = vector.extract_strided_slice %39 {offsets = [0, 64], sizes = [8, 32], strides = [1, 1]} : vector<8x96xf32> to vector<8x32xf32>
    %43 = vector.extract_strided_slice %40 {offsets = [0, 0], sizes = [8, 8], strides = [1, 1]} : vector<8x32xf32> to vector<8x8xf32>
    %44 = arith.truncf %43 : vector<8x8xf32> to vector<8x8xbf16>
    %45 = vector.extract_strided_slice %41 {offsets = [0, 0], sizes = [8, 8], strides = [1, 1]} : vector<8x32xf32> to vector<8x8xf32>
    %46 = arith.truncf %45 : vector<8x8xf32> to vector<8x8xbf16>
    %47 = vector.extract_strided_slice %42 {offsets = [0, 0], sizes = [8, 8], strides = [1, 1]} : vector<8x32xf32> to vector<8x8xf32>
    %48 = arith.truncf %47 : vector<8x8xf32> to vector<8x8xbf16>
    %cst_52 = arith.constant dense<0.000000e+00> : vector<8x8xf32>
    %49 = tpu.matmul %44, %46, %cst_52 {dimension_numbers = #tpu.dot_dimension_numbers<[1], [1], [0], [0], [0, 0, 1, 0], [], []>} : vector<8x8xbf16>, vector<8x8xbf16>, vector<8x8xf32> -> vector<8x8xf32>
    %cst_53 = arith.constant 0.353553385 : f32
    %50 = vector.broadcast %cst_53 : f32 to vector<8x8xf32>
    %51 = arith.mulf %49, %50 : vector<8x8xf32>
    %52 = arith.addf %51, %5 : vector<8x8xf32>
    %cst_54 = arith.constant dense<0xFF800000> : vector<8xf32>
    %53 = vector.multi_reduction <maximumf>, %52, %cst_54 [1] : vector<8x8xf32> to vector<8xf32>
    %54 = vector.shape_cast %53 : vector<8xf32> to vector<8x1xf32>
    %55 = vector.broadcast %54 : vector<8x1xf32> to vector<8x8xf32>
    %56 = arith.subf %52, %55 : vector<8x8xf32>
    %57 = math.exp %56 : vector<8x8xf32>
    %cst_55 = arith.constant dense<0.000000e+00> : vector<8xf32>
    %58 = vector.multi_reduction <add>, %57, %cst_55 [1] : vector<8x8xf32> to vector<8xf32>
    %59 = vector.shape_cast %58 : vector<8xf32> to vector<8x1xf32>
    %60 = tpu.reciprocal %59 {approx = true} : vector<8x1xf32> -> vector<8x1xf32>
    %61 = vector.broadcast %60 : vector<8x1xf32> to vector<8x8xf32>
    %62 = arith.mulf %57, %61 : vector<8x8xf32>
    %63 = arith.truncf %62 : vector<8x8xf32> to vector<8x8xbf16>
    %cst_56 = arith.constant dense<0.000000e+00> : vector<8x8xf32>
    %64 = tpu.matmul %63, %48, %cst_56 {dimension_numbers = #tpu.dot_dimension_numbers<[1], [0], [0], [1], [0, 0, 1, 1], [], []>} : vector<8x8xbf16>, vector<8x8xbf16>, vector<8x8xf32> -> vector<8x8xf32>
    %65 = vector.extract_strided_slice %40 {offsets = [0, 8], sizes = [8, 8], strides = [1, 1]} : vector<8x32xf32> to vector<8x8xf32>
    %66 = arith.truncf %65 : vector<8x8xf32> to vector<8x8xbf16>
    %67 = vector.extract_strided_slice %41 {offsets = [0, 8], sizes = [8, 8], strides = [1, 1]} : vector<8x32xf32> to vector<8x8xf32>
    %68 = arith.truncf %67 : vector<8x8xf32> to vector<8x8xbf16>
    %69 = vector.extract_strided_slice %42 {offsets = [0, 8], sizes = [8, 8], strides = [1, 1]} : vector<8x32xf32> to vector<8x8xf32>
    %70 = arith.truncf %69 : vector<8x8xf32> to vector<8x8xbf16>
    %cst_57 = arith.constant dense<0.000000e+00> : vector<8x8xf32>
    %71 = tpu.matmul %66, %68, %cst_57 {dimension_numbers = #tpu.dot_dimension_numbers<[1], [1], [0], [0], [0, 0, 1, 0], [], []>} : vector<8x8xbf16>, vector<8x8xbf16>, vector<8x8xf32> -> vector<8x8xf32>
    %cst_58 = arith.constant 0.353553385 : f32
    %72 = vector.broadcast %cst_58 : f32 to vector<8x8xf32>
    %73 = arith.mulf %71, %72 : vector<8x8xf32>
    %74 = arith.addf %73, %5 : vector<8x8xf32>
    %cst_59 = arith.constant dense<0xFF800000> : vector<8xf32>
    %75 = vector.multi_reduction <maximumf>, %74, %cst_59 [1] : vector<8x8xf32> to vector<8xf32>
    %76 = vector.shape_cast %75 : vector<8xf32> to vector<8x1xf32>
    %77 = vector.broadcast %76 : vector<8x1xf32> to vector<8x8xf32>
    %78 = arith.subf %74, %77 : vector<8x8xf32>
    %79 = math.exp %78 : vector<8x8xf32>
    %cst_60 = arith.constant dense<0.000000e+00> : vector<8xf32>
    %80 = vector.multi_reduction <add>, %79, %cst_60 [1] : vector<8x8xf32> to vector<8xf32>
    %81 = vector.shape_cast %80 : vector<8xf32> to vector<8x1xf32>
    %82 = tpu.reciprocal %81 {approx = true} : vector<8x1xf32> -> vector<8x1xf32>
    %83 = vector.broadcast %82 : vector<8x1xf32> to vector<8x8xf32>
    %84 = arith.mulf %79, %83 : vector<8x8xf32>
    %85 = arith.truncf %84 : vector<8x8xf32> to vector<8x8xbf16>
    %cst_61 = arith.constant dense<0.000000e+00> : vector<8x8xf32>
    %86 = tpu.matmul %85, %70, %cst_61 {dimension_numbers = #tpu.dot_dimension_numbers<[1], [0], [0], [1], [0, 0, 1, 1], [], []>} : vector<8x8xbf16>, vector<8x8xbf16>, vector<8x8xf32> -> vector<8x8xf32>
    %87 = vector.extract_strided_slice %40 {offsets = [0, 16], sizes = [8, 8], strides = [1, 1]} : vector<8x32xf32> to vector<8x8xf32>
    %88 = arith.truncf %87 : vector<8x8xf32> to vector<8x8xbf16>
    %89 = vector.extract_strided_slice %41 {offsets = [0, 16], sizes = [8, 8], strides = [1, 1]} : vector<8x32xf32> to vector<8x8xf32>
    %90 = arith.truncf %89 : vector<8x8xf32> to vector<8x8xbf16>
    %91 = vector.extract_strided_slice %42 {offsets = [0, 16], sizes = [8, 8], strides = [1, 1]} : vector<8x32xf32> to vector<8x8xf32>
    %92 = arith.truncf %91 : vector<8x8xf32> to vector<8x8xbf16>
    %cst_62 = arith.constant dense<0.000000e+00> : vector<8x8xf32>
    %93 = tpu.matmul %88, %90, %cst_62 {dimension_numbers = #tpu.dot_dimension_numbers<[1], [1], [0], [0], [0, 0, 1, 0], [], []>} : vector<8x8xbf16>, vector<8x8xbf16>, vector<8x8xf32> -> vector<8x8xf32>
    %cst_63 = arith.constant 0.353553385 : f32
    %94 = vector.broadcast %cst_63 : f32 to vector<8x8xf32>
    %95 = arith.mulf %93, %94 : vector<8x8xf32>
    %96 = arith.addf %95, %5 : vector<8x8xf32>
    %cst_64 = arith.constant dense<0xFF800000> : vector<8xf32>
    %97 = vector.multi_reduction <maximumf>, %96, %cst_64 [1] : vector<8x8xf32> to vector<8xf32>
    %98 = vector.shape_cast %97 : vector<8xf32> to vector<8x1xf32>
    %99 = vector.broadcast %98 : vector<8x1xf32> to vector<8x8xf32>
    %100 = arith.subf %96, %99 : vector<8x8xf32>
    %101 = math.exp %100 : vector<8x8xf32>
    %cst_65 = arith.constant dense<0.000000e+00> : vector<8xf32>
    %102 = vector.multi_reduction <add>, %101, %cst_65 [1] : vector<8x8xf32> to vector<8xf32>
    %103 = vector.shape_cast %102 : vector<8xf32> to vector<8x1xf32>
    %104 = tpu.reciprocal %103 {approx = true} : vector<8x1xf32> -> vector<8x1xf32>
    %105 = vector.broadcast %104 : vector<8x1xf32> to vector<8x8xf32>
    %106 = arith.mulf %101, %105 : vector<8x8xf32>
    %107 = arith.truncf %106 : vector<8x8xf32> to vector<8x8xbf16>
    %cst_66 = arith.constant dense<0.000000e+00> : vector<8x8xf32>
    %108 = tpu.matmul %107, %92, %cst_66 {dimension_numbers = #tpu.dot_dimension_numbers<[1], [0], [0], [1], [0, 0, 1, 1], [], []>} : vector<8x8xbf16>, vector<8x8xbf16>, vector<8x8xf32> -> vector<8x8xf32>
    %109 = vector.extract_strided_slice %40 {offsets = [0, 24], sizes = [8, 8], strides = [1, 1]} : vector<8x32xf32> to vector<8x8xf32>
    %110 = arith.truncf %109 : vector<8x8xf32> to vector<8x8xbf16>
    %111 = vector.extract_strided_slice %41 {offsets = [0, 24], sizes = [8, 8], strides = [1, 1]} : vector<8x32xf32> to vector<8x8xf32>
    %112 = arith.truncf %111 : vector<8x8xf32> to vector<8x8xbf16>
    %113 = vector.extract_strided_slice %42 {offsets = [0, 24], sizes = [8, 8], strides = [1, 1]} : vector<8x32xf32> to vector<8x8xf32>
    %114 = arith.truncf %113 : vector<8x8xf32> to vector<8x8xbf16>
    %cst_67 = arith.constant dense<0.000000e+00> : vector<8x8xf32>
    %115 = tpu.matmul %110, %112, %cst_67 {dimension_numbers = #tpu.dot_dimension_numbers<[1], [1], [0], [0], [0, 0, 1, 0], [], []>} : vector<8x8xbf16>, vector<8x8xbf16>, vector<8x8xf32> -> vector<8x8xf32>
    %cst_68 = arith.constant 0.353553385 : f32
    %116 = vector.broadcast %cst_68 : f32 to vector<8x8xf32>
    %117 = arith.mulf %115, %116 : vector<8x8xf32>
    %118 = arith.addf %117, %5 : vector<8x8xf32>
    %cst_69 = arith.constant dense<0xFF800000> : vector<8xf32>
    %119 = vector.multi_reduction <maximumf>, %118, %cst_69 [1] : vector<8x8xf32> to vector<8xf32>
    %120 = vector.shape_cast %119 : vector<8xf32> to vector<8x1xf32>
    %121 = vector.broadcast %120 : vector<8x1xf32> to vector<8x8xf32>
    %122 = arith.subf %118, %121 : vector<8x8xf32>
    %123 = math.exp %122 : vector<8x8xf32>
    %cst_70 = arith.constant dense<0.000000e+00> : vector<8xf32>
    %124 = vector.multi_reduction <add>, %123, %cst_70 [1] : vector<8x8xf32> to vector<8xf32>
    %125 = vector.shape_cast %124 : vector<8xf32> to vector<8x1xf32>
    %126 = tpu.reciprocal %125 {approx = true} : vector<8x1xf32> -> vector<8x1xf32>
    %127 = vector.broadcast %126 : vector<8x1xf32> to vector<8x8xf32>
    %128 = arith.mulf %123, %127 : vector<8x8xf32>
    %129 = arith.truncf %128 : vector<8x8xf32> to vector<8x8xbf16>
    %cst_71 = arith.constant dense<0.000000e+00> : vector<8x8xf32>
    %130 = tpu.matmul %129, %114, %cst_71 {dimension_numbers = #tpu.dot_dimension_numbers<[1], [0], [0], [1], [0, 0, 1, 1], [], []>} : vector<8x8xbf16>, vector<8x8xbf16>, vector<8x8xf32> -> vector<8x8xf32>
    %131 = tpu.concatenate %64, %86, %108, %130 in 1 : vector<8x8xf32>, vector<8x8xf32>, vector<8x8xf32>, vector<8x8xf32> -> vector<8x32xf32>
    %132 = arith.truncf %131 : vector<8x32xf32> to vector<8x32xbf16>
    %cst_72 = arith.constant dense<0.000000e+00> : vector<8x32xf32>
    %133 = tpu.matmul %132, %10, %cst_72 {dimension_numbers = #tpu.dot_dimension_numbers<[1], [0], [0], [1], [0, 0, 1, 1], [], []>} : vector<8x32xbf16>, vector<32x32xbf16>, vector<8x32xf32> -> vector<8x32xf32>
    %134 = vector.broadcast %11 : vector<1x32xf32> to vector<8x32xf32>
    %135 = arith.addf %133, %134 : vector<8x32xf32>
    %136 = arith.addf %1, %135 : vector<8x32xf32>
    %cst_73 = arith.constant dense<0.000000e+00> : vector<8xf32>
    %137 = vector.multi_reduction <add>, %136, %cst_73 [1] : vector<8x32xf32> to vector<8xf32>
    %138 = vector.shape_cast %137 : vector<8xf32> to vector<8x1xf32>
    %cst_74 = arith.constant 3.200000e+01 : f32
    %139 = vector.broadcast %cst_74 : f32 to vector<8x1xf32>
    %140 = arith.divf %138, %139 : vector<8x1xf32>
    %141 = vector.broadcast %140 : vector<8x1xf32> to vector<8x32xf32>
    %142 = arith.subf %136, %141 : vector<8x32xf32>
    %143 = arith.mulf %142, %142 : vector<8x32xf32>
    %cst_75 = arith.constant dense<0.000000e+00> : vector<8xf32>
    %144 = vector.multi_reduction <add>, %143, %cst_75 [1] : vector<8x32xf32> to vector<8xf32>
    %145 = vector.shape_cast %144 : vector<8xf32> to vector<8x1xf32>
    %cst_76 = arith.constant 3.200000e+01 : f32
    %146 = vector.broadcast %cst_76 : f32 to vector<8x1xf32>
    %147 = arith.divf %145, %146 : vector<8x1xf32>
    %148 = vector.broadcast %140 : vector<8x1xf32> to vector<8x32xf32>
    %149 = arith.subf %136, %148 : vector<8x32xf32>
    %cst_77 = arith.constant 9.99999974E-6 : f32
    %150 = vector.broadcast %cst_77 : f32 to vector<8x1xf32>
    %151 = arith.addf %147, %150 : vector<8x1xf32>
    %152 = math.rsqrt %151 : vector<8x1xf32>
    %153 = vector.broadcast %152 : vector<8x1xf32> to vector<8x32xf32>
    %154 = arith.mulf %149, %153 : vector<8x32xf32>
    %155 = vector.broadcast %20 : vector<1x32xf32> to vector<8x32xf32>
    %156 = arith.mulf %154, %155 : vector<8x32xf32>
    %157 = vector.broadcast %21 : vector<1x32xf32> to vector<8x32xf32>
    %158 = arith.addf %156, %157 : vector<8x32xf32>
    %159 = vector.extract_strided_slice %12 {offsets = [0, 0], sizes = [32, 32], strides = [1, 1]} : vector<32x96xbf16> to vector<32x32xbf16>
    %160 = vector.extract_strided_slice %13 {offsets = [0, 0], sizes = [1, 32], strides = [1, 1]} : vector<1x96xf32> to vector<1x32xf32>
    %161 = arith.truncf %158 : vector<8x32xf32> to vector<8x32xbf16>
    %cst_78 = arith.constant dense<0.000000e+00> : vector<8x32xf32>
    %162 = tpu.matmul %161, %159, %cst_78 {dimension_numbers = #tpu.dot_dimension_numbers<[1], [0], [0], [1], [0, 0, 1, 1], [], []>} : vector<8x32xbf16>, vector<32x32xbf16>, vector<8x32xf32> -> vector<8x32xf32>
    %163 = vector.broadcast %160 : vector<1x32xf32> to vector<8x32xf32>
    %164 = arith.addf %162, %163 : vector<8x32xf32>
    %165 = vector.extract_strided_slice %164 {offsets = [0, 0], sizes = [8, 8], strides = [1, 1]} : vector<8x32xf32> to vector<8x8xf32>
    %166 = arith.truncf %165 : vector<8x8xf32> to vector<8x8xbf16>
    %167 = vector.extract_strided_slice %34 {offsets = [0, 0], sizes = [8, 8], strides = [1, 1]} : vector<8x32xf32> to vector<8x8xf32>
    %168 = arith.truncf %167 : vector<8x8xf32> to vector<8x8xbf16>
    %169 = vector.extract_strided_slice %35 {offsets = [0, 0], sizes = [8, 8], strides = [1, 1]} : vector<8x32xf32> to vector<8x8xf32>
    %170 = arith.truncf %169 : vector<8x8xf32> to vector<8x8xbf16>
    %cst_79 = arith.constant dense<0.000000e+00> : vector<8x8xf32>
    %171 = tpu.matmul %166, %168, %cst_79 {dimension_numbers = #tpu.dot_dimension_numbers<[1], [1], [0], [0], [0, 0, 1, 0], [], []>} : vector<8x8xbf16>, vector<8x8xbf16>, vector<8x8xf32> -> vector<8x8xf32>
    %cst_80 = arith.constant 0.353553385 : f32
    %172 = vector.broadcast %cst_80 : f32 to vector<8x8xf32>
    %173 = arith.mulf %171, %172 : vector<8x8xf32>
    %174 = arith.addf %173, %7 : vector<8x8xf32>
    %cst_81 = arith.constant dense<0xFF800000> : vector<8xf32>
    %175 = vector.multi_reduction <maximumf>, %174, %cst_81 [1] : vector<8x8xf32> to vector<8xf32>
    %176 = vector.shape_cast %175 : vector<8xf32> to vector<8x1xf32>
    %177 = vector.broadcast %176 : vector<8x1xf32> to vector<8x8xf32>
    %178 = arith.subf %174, %177 : vector<8x8xf32>
    %179 = math.exp %178 : vector<8x8xf32>
    %cst_82 = arith.constant dense<0.000000e+00> : vector<8xf32>
    %180 = vector.multi_reduction <add>, %179, %cst_82 [1] : vector<8x8xf32> to vector<8xf32>
    %181 = vector.shape_cast %180 : vector<8xf32> to vector<8x1xf32>
    %182 = tpu.reciprocal %181 {approx = true} : vector<8x1xf32> -> vector<8x1xf32>
    %183 = vector.broadcast %182 : vector<8x1xf32> to vector<8x8xf32>
    %184 = arith.mulf %179, %183 : vector<8x8xf32>
    %185 = arith.truncf %184 : vector<8x8xf32> to vector<8x8xbf16>
    %cst_83 = arith.constant dense<0.000000e+00> : vector<8x8xf32>
    %186 = tpu.matmul %185, %170, %cst_83 {dimension_numbers = #tpu.dot_dimension_numbers<[1], [0], [0], [1], [0, 0, 1, 1], [], []>} : vector<8x8xbf16>, vector<8x8xbf16>, vector<8x8xf32> -> vector<8x8xf32>
    %187 = vector.extract_strided_slice %164 {offsets = [0, 8], sizes = [8, 8], strides = [1, 1]} : vector<8x32xf32> to vector<8x8xf32>
    %188 = arith.truncf %187 : vector<8x8xf32> to vector<8x8xbf16>
    %189 = vector.extract_strided_slice %34 {offsets = [0, 8], sizes = [8, 8], strides = [1, 1]} : vector<8x32xf32> to vector<8x8xf32>
    %190 = arith.truncf %189 : vector<8x8xf32> to vector<8x8xbf16>
    %191 = vector.extract_strided_slice %35 {offsets = [0, 8], sizes = [8, 8], strides = [1, 1]} : vector<8x32xf32> to vector<8x8xf32>
    %192 = arith.truncf %191 : vector<8x8xf32> to vector<8x8xbf16>
    %cst_84 = arith.constant dense<0.000000e+00> : vector<8x8xf32>
    %193 = tpu.matmul %188, %190, %cst_84 {dimension_numbers = #tpu.dot_dimension_numbers<[1], [1], [0], [0], [0, 0, 1, 0], [], []>} : vector<8x8xbf16>, vector<8x8xbf16>, vector<8x8xf32> -> vector<8x8xf32>
    %cst_85 = arith.constant 0.353553385 : f32
    %194 = vector.broadcast %cst_85 : f32 to vector<8x8xf32>
    %195 = arith.mulf %193, %194 : vector<8x8xf32>
    %196 = arith.addf %195, %7 : vector<8x8xf32>
    %cst_86 = arith.constant dense<0xFF800000> : vector<8xf32>
    %197 = vector.multi_reduction <maximumf>, %196, %cst_86 [1] : vector<8x8xf32> to vector<8xf32>
    %198 = vector.shape_cast %197 : vector<8xf32> to vector<8x1xf32>
    %199 = vector.broadcast %198 : vector<8x1xf32> to vector<8x8xf32>
    %200 = arith.subf %196, %199 : vector<8x8xf32>
    %201 = math.exp %200 : vector<8x8xf32>
    %cst_87 = arith.constant dense<0.000000e+00> : vector<8xf32>
    %202 = vector.multi_reduction <add>, %201, %cst_87 [1] : vector<8x8xf32> to vector<8xf32>
    %203 = vector.shape_cast %202 : vector<8xf32> to vector<8x1xf32>
    %204 = tpu.reciprocal %203 {approx = true} : vector<8x1xf32> -> vector<8x1xf32>
    %205 = vector.broadcast %204 : vector<8x1xf32> to vector<8x8xf32>
    %206 = arith.mulf %201, %205 : vector<8x8xf32>
    %207 = arith.truncf %206 : vector<8x8xf32> to vector<8x8xbf16>
    %cst_88 = arith.constant dense<0.000000e+00> : vector<8x8xf32>
    %208 = tpu.matmul %207, %192, %cst_88 {dimension_numbers = #tpu.dot_dimension_numbers<[1], [0], [0], [1], [0, 0, 1, 1], [], []>} : vector<8x8xbf16>, vector<8x8xbf16>, vector<8x8xf32> -> vector<8x8xf32>
    %209 = vector.extract_strided_slice %164 {offsets = [0, 16], sizes = [8, 8], strides = [1, 1]} : vector<8x32xf32> to vector<8x8xf32>
    %210 = arith.truncf %209 : vector<8x8xf32> to vector<8x8xbf16>
    %211 = vector.extract_strided_slice %34 {offsets = [0, 16], sizes = [8, 8], strides = [1, 1]} : vector<8x32xf32> to vector<8x8xf32>
    %212 = arith.truncf %211 : vector<8x8xf32> to vector<8x8xbf16>
    %213 = vector.extract_strided_slice %35 {offsets = [0, 16], sizes = [8, 8], strides = [1, 1]} : vector<8x32xf32> to vector<8x8xf32>
    %214 = arith.truncf %213 : vector<8x8xf32> to vector<8x8xbf16>
    %cst_89 = arith.constant dense<0.000000e+00> : vector<8x8xf32>
    %215 = tpu.matmul %210, %212, %cst_89 {dimension_numbers = #tpu.dot_dimension_numbers<[1], [1], [0], [0], [0, 0, 1, 0], [], []>} : vector<8x8xbf16>, vector<8x8xbf16>, vector<8x8xf32> -> vector<8x8xf32>
    %cst_90 = arith.constant 0.353553385 : f32
    %216 = vector.broadcast %cst_90 : f32 to vector<8x8xf32>
    %217 = arith.mulf %215, %216 : vector<8x8xf32>
    %218 = arith.addf %217, %7 : vector<8x8xf32>
    %cst_91 = arith.constant dense<0xFF800000> : vector<8xf32>
    %219 = vector.multi_reduction <maximumf>, %218, %cst_91 [1] : vector<8x8xf32> to vector<8xf32>
    %220 = vector.shape_cast %219 : vector<8xf32> to vector<8x1xf32>
    %221 = vector.broadcast %220 : vector<8x1xf32> to vector<8x8xf32>
    %222 = arith.subf %218, %221 : vector<8x8xf32>
    %223 = math.exp %222 : vector<8x8xf32>
    %cst_92 = arith.constant dense<0.000000e+00> : vector<8xf32>
    %224 = vector.multi_reduction <add>, %223, %cst_92 [1] : vector<8x8xf32> to vector<8xf32>
    %225 = vector.shape_cast %224 : vector<8xf32> to vector<8x1xf32>
    %226 = tpu.reciprocal %225 {approx = true} : vector<8x1xf32> -> vector<8x1xf32>
    %227 = vector.broadcast %226 : vector<8x1xf32> to vector<8x8xf32>
    %228 = arith.mulf %223, %227 : vector<8x8xf32>
    %229 = arith.truncf %228 : vector<8x8xf32> to vector<8x8xbf16>
    %cst_93 = arith.constant dense<0.000000e+00> : vector<8x8xf32>
    %230 = tpu.matmul %229, %214, %cst_93 {dimension_numbers = #tpu.dot_dimension_numbers<[1], [0], [0], [1], [0, 0, 1, 1], [], []>} : vector<8x8xbf16>, vector<8x8xbf16>, vector<8x8xf32> -> vector<8x8xf32>
    %231 = vector.extract_strided_slice %164 {offsets = [0, 24], sizes = [8, 8], strides = [1, 1]} : vector<8x32xf32> to vector<8x8xf32>
    %232 = arith.truncf %231 : vector<8x8xf32> to vector<8x8xbf16>
    %233 = vector.extract_strided_slice %34 {offsets = [0, 24], sizes = [8, 8], strides = [1, 1]} : vector<8x32xf32> to vector<8x8xf32>
    %234 = arith.truncf %233 : vector<8x8xf32> to vector<8x8xbf16>
    %235 = vector.extract_strided_slice %35 {offsets = [0, 24], sizes = [8, 8], strides = [1, 1]} : vector<8x32xf32> to vector<8x8xf32>
    %236 = arith.truncf %235 : vector<8x8xf32> to vector<8x8xbf16>
    %cst_94 = arith.constant dense<0.000000e+00> : vector<8x8xf32>
    %237 = tpu.matmul %232, %234, %cst_94 {dimension_numbers = #tpu.dot_dimension_numbers<[1], [1], [0], [0], [0, 0, 1, 0], [], []>} : vector<8x8xbf16>, vector<8x8xbf16>, vector<8x8xf32> -> vector<8x8xf32>
    %cst_95 = arith.constant 0.353553385 : f32
    %238 = vector.broadcast %cst_95 : f32 to vector<8x8xf32>
    %239 = arith.mulf %237, %238 : vector<8x8xf32>
    %240 = arith.addf %239, %7 : vector<8x8xf32>
    %cst_96 = arith.constant dense<0xFF800000> : vector<8xf32>
    %241 = vector.multi_reduction <maximumf>, %240, %cst_96 [1] : vector<8x8xf32> to vector<8xf32>
    %242 = vector.shape_cast %241 : vector<8xf32> to vector<8x1xf32>
    %243 = vector.broadcast %242 : vector<8x1xf32> to vector<8x8xf32>
    %244 = arith.subf %240, %243 : vector<8x8xf32>
    %245 = math.exp %244 : vector<8x8xf32>
    %cst_97 = arith.constant dense<0.000000e+00> : vector<8xf32>
    %246 = vector.multi_reduction <add>, %245, %cst_97 [1] : vector<8x8xf32> to vector<8xf32>
    %247 = vector.shape_cast %246 : vector<8xf32> to vector<8x1xf32>
    %248 = tpu.reciprocal %247 {approx = true} : vector<8x1xf32> -> vector<8x1xf32>
    %249 = vector.broadcast %248 : vector<8x1xf32> to vector<8x8xf32>
    %250 = arith.mulf %245, %249 : vector<8x8xf32>
    %251 = arith.truncf %250 : vector<8x8xf32> to vector<8x8xbf16>
    %cst_98 = arith.constant dense<0.000000e+00> : vector<8x8xf32>
    %252 = tpu.matmul %251, %236, %cst_98 {dimension_numbers = #tpu.dot_dimension_numbers<[1], [0], [0], [1], [0, 0, 1, 1], [], []>} : vector<8x8xbf16>, vector<8x8xbf16>, vector<8x8xf32> -> vector<8x8xf32>
    %253 = tpu.concatenate %186, %208, %230, %252 in 1 : vector<8x8xf32>, vector<8x8xf32>, vector<8x8xf32>, vector<8x8xf32> -> vector<8x32xf32>
    %254 = arith.truncf %253 : vector<8x32xf32> to vector<8x32xbf16>
    %cst_99 = arith.constant dense<0.000000e+00> : vector<8x32xf32>
    %255 = tpu.matmul %254, %14, %cst_99 {dimension_numbers = #tpu.dot_dimension_numbers<[1], [0], [0], [1], [0, 0, 1, 1], [], []>} : vector<8x32xbf16>, vector<32x32xbf16>, vector<8x32xf32> -> vector<8x32xf32>
    %256 = vector.broadcast %15 : vector<1x32xf32> to vector<8x32xf32>
    %257 = arith.addf %255, %256 : vector<8x32xf32>
    %258 = arith.addf %158, %257 : vector<8x32xf32>
    %cst_100 = arith.constant dense<0.000000e+00> : vector<8xf32>
    %259 = vector.multi_reduction <add>, %258, %cst_100 [1] : vector<8x32xf32> to vector<8xf32>
    %260 = vector.shape_cast %259 : vector<8xf32> to vector<8x1xf32>
    %cst_101 = arith.constant 3.200000e+01 : f32
    %261 = vector.broadcast %cst_101 : f32 to vector<8x1xf32>
    %262 = arith.divf %260, %261 : vector<8x1xf32>
    %263 = vector.broadcast %262 : vector<8x1xf32> to vector<8x32xf32>
    %264 = arith.subf %258, %263 : vector<8x32xf32>
    %265 = arith.mulf %264, %264 : vector<8x32xf32>
    %cst_102 = arith.constant dense<0.000000e+00> : vector<8xf32>
    %266 = vector.multi_reduction <add>, %265, %cst_102 [1] : vector<8x32xf32> to vector<8xf32>
    %267 = vector.shape_cast %266 : vector<8xf32> to vector<8x1xf32>
    %cst_103 = arith.constant 3.200000e+01 : f32
    %268 = vector.broadcast %cst_103 : f32 to vector<8x1xf32>
    %269 = arith.divf %267, %268 : vector<8x1xf32>
    %270 = vector.broadcast %262 : vector<8x1xf32> to vector<8x32xf32>
    %271 = arith.subf %258, %270 : vector<8x32xf32>
    %cst_104 = arith.constant 9.99999974E-6 : f32
    %272 = vector.broadcast %cst_104 : f32 to vector<8x1xf32>
    %273 = arith.addf %269, %272 : vector<8x1xf32>
    %274 = math.rsqrt %273 : vector<8x1xf32>
    %275 = vector.broadcast %274 : vector<8x1xf32> to vector<8x32xf32>
    %276 = arith.mulf %271, %275 : vector<8x32xf32>
    %277 = vector.broadcast %22 : vector<1x32xf32> to vector<8x32xf32>
    %278 = arith.mulf %276, %277 : vector<8x32xf32>
    %279 = vector.broadcast %23 : vector<1x32xf32> to vector<8x32xf32>
    %280 = arith.addf %278, %279 : vector<8x32xf32>
    %281 = arith.truncf %280 : vector<8x32xf32> to vector<8x32xbf16>
    %cst_105 = arith.constant dense<0.000000e+00> : vector<8x64xf32>
    %282 = tpu.matmul %281, %16, %cst_105 {dimension_numbers = #tpu.dot_dimension_numbers<[1], [0], [0], [1], [0, 0, 1, 1], [], []>} : vector<8x32xbf16>, vector<32x64xbf16>, vector<8x64xf32> -> vector<8x64xf32>
    %283 = vector.broadcast %17 : vector<1x64xf32> to vector<8x64xf32>
    %284 = arith.addf %282, %283 : vector<8x64xf32>
    %cst_106 = arith.constant 0.000000e+00 : f32
    %285 = vector.broadcast %cst_106 : f32 to vector<8x64xf32>
    %286 = arith.maximumf %284, %285 : vector<8x64xf32>
    %287 = arith.truncf %286 : vector<8x64xf32> to vector<8x64xbf16>
    %cst_107 = arith.constant dense<0.000000e+00> : vector<8x32xf32>
    %288 = tpu.matmul %287, %18, %cst_107 {dimension_numbers = #tpu.dot_dimension_numbers<[1], [0], [0], [1], [0, 0, 1, 1], [], []>} : vector<8x64xbf16>, vector<64x32xbf16>, vector<8x32xf32> -> vector<8x32xf32>
    %289 = vector.broadcast %19 : vector<1x32xf32> to vector<8x32xf32>
    %290 = arith.addf %288, %289 : vector<8x32xf32>
    %291 = arith.addf %280, %290 : vector<8x32xf32>
    %cst_108 = arith.constant dense<0.000000e+00> : vector<8xf32>
    %292 = vector.multi_reduction <add>, %291, %cst_108 [1] : vector<8x32xf32> to vector<8xf32>
    %293 = vector.shape_cast %292 : vector<8xf32> to vector<8x1xf32>
    %cst_109 = arith.constant 3.200000e+01 : f32
    %294 = vector.broadcast %cst_109 : f32 to vector<8x1xf32>
    %295 = arith.divf %293, %294 : vector<8x1xf32>
    %296 = vector.broadcast %295 : vector<8x1xf32> to vector<8x32xf32>
    %297 = arith.subf %291, %296 : vector<8x32xf32>
    %298 = arith.mulf %297, %297 : vector<8x32xf32>
    %cst_110 = arith.constant dense<0.000000e+00> : vector<8xf32>
    %299 = vector.multi_reduction <add>, %298, %cst_110 [1] : vector<8x32xf32> to vector<8xf32>
    %300 = vector.shape_cast %299 : vector<8xf32> to vector<8x1xf32>
    %cst_111 = arith.constant 3.200000e+01 : f32
    %301 = vector.broadcast %cst_111 : f32 to vector<8x1xf32>
    %302 = arith.divf %300, %301 : vector<8x1xf32>
    %303 = vector.broadcast %295 : vector<8x1xf32> to vector<8x32xf32>
    %304 = arith.subf %291, %303 : vector<8x32xf32>
    %cst_112 = arith.constant 9.99999974E-6 : f32
    %305 = vector.broadcast %cst_112 : f32 to vector<8x1xf32>
    %306 = arith.addf %302, %305 : vector<8x1xf32>
    %307 = math.rsqrt %306 : vector<8x1xf32>
    %308 = vector.broadcast %307 : vector<8x1xf32> to vector<8x32xf32>
    %309 = arith.mulf %304, %308 : vector<8x32xf32>
    %310 = vector.broadcast %24 : vector<1x32xf32> to vector<8x32xf32>
    %311 = arith.mulf %309, %310 : vector<8x32xf32>
    %312 = vector.broadcast %25 : vector<1x32xf32> to vector<8x32xf32>
    %313 = arith.addf %311, %312 : vector<8x32xf32>
    %314 = arith.truncf %313 : vector<8x32xf32> to vector<8x32xbf16>
    %cst_113 = arith.constant dense<0.000000e+00> : vector<8x96xf32>
    %315 = tpu.matmul %314, %8, %cst_113 {dimension_numbers = #tpu.dot_dimension_numbers<[1], [0], [0], [1], [0, 0, 1, 1], [], []>} : vector<8x32xbf16>, vector<32x96xbf16>, vector<8x96xf32> -> vector<8x96xf32>
    %316 = vector.broadcast %9 : vector<1x96xf32> to vector<8x96xf32>
    %317 = arith.addf %315, %316 : vector<8x96xf32>
    %318 = vector.extract_strided_slice %317 {offsets = [0, 0], sizes = [8, 32], strides = [1, 1]} : vector<8x96xf32> to vector<8x32xf32>
    %319 = vector.extract_strided_slice %317 {offsets = [0, 32], sizes = [8, 32], strides = [1, 1]} : vector<8x96xf32> to vector<8x32xf32>
    %320 = vector.extract_strided_slice %317 {offsets = [0, 64], sizes = [8, 32], strides = [1, 1]} : vector<8x96xf32> to vector<8x32xf32>
    %321 = vector.extract_strided_slice %318 {offsets = [0, 0], sizes = [8, 8], strides = [1, 1]} : vector<8x32xf32> to vector<8x8xf32>
    %322 = arith.truncf %321 : vector<8x8xf32> to vector<8x8xbf16>
    %323 = vector.extract_strided_slice %319 {offsets = [0, 0], sizes = [8, 8], strides = [1, 1]} : vector<8x32xf32> to vector<8x8xf32>
    %324 = arith.truncf %323 : vector<8x8xf32> to vector<8x8xbf16>
    %325 = vector.extract_strided_slice %320 {offsets = [0, 0], sizes = [8, 8], strides = [1, 1]} : vector<8x32xf32> to vector<8x8xf32>
    %326 = arith.truncf %325 : vector<8x8xf32> to vector<8x8xbf16>
    %cst_114 = arith.constant dense<0.000000e+00> : vector<8x8xf32>
    %327 = tpu.matmul %322, %324, %cst_114 {dimension_numbers = #tpu.dot_dimension_numbers<[1], [1], [0], [0], [0, 0, 1, 0], [], []>} : vector<8x8xbf16>, vector<8x8xbf16>, vector<8x8xf32> -> vector<8x8xf32>
    %cst_115 = arith.constant 0.353553385 : f32
    %328 = vector.broadcast %cst_115 : f32 to vector<8x8xf32>
    %329 = arith.mulf %327, %328 : vector<8x8xf32>
    %330 = arith.addf %329, %5 : vector<8x8xf32>
    %cst_116 = arith.constant dense<0xFF800000> : vector<8xf32>
    %331 = vector.multi_reduction <maximumf>, %330, %cst_116 [1] : vector<8x8xf32> to vector<8xf32>
    %332 = vector.shape_cast %331 : vector<8xf32> to vector<8x1xf32>
    %333 = vector.broadcast %332 : vector<8x1xf32> to vector<8x8xf32>
    %334 = arith.subf %330, %333 : vector<8x8xf32>
    %335 = math.exp %334 : vector<8x8xf32>
    %cst_117 = arith.constant dense<0.000000e+00> : vector<8xf32>
    %336 = vector.multi_reduction <add>, %335, %cst_117 [1] : vector<8x8xf32> to vector<8xf32>
    %337 = vector.shape_cast %336 : vector<8xf32> to vector<8x1xf32>
    %338 = tpu.reciprocal %337 {approx = true} : vector<8x1xf32> -> vector<8x1xf32>
    %339 = vector.broadcast %338 : vector<8x1xf32> to vector<8x8xf32>
    %340 = arith.mulf %335, %339 : vector<8x8xf32>
    %341 = arith.truncf %340 : vector<8x8xf32> to vector<8x8xbf16>
    %cst_118 = arith.constant dense<0.000000e+00> : vector<8x8xf32>
    %342 = tpu.matmul %341, %326, %cst_118 {dimension_numbers = #tpu.dot_dimension_numbers<[1], [0], [0], [1], [0, 0, 1, 1], [], []>} : vector<8x8xbf16>, vector<8x8xbf16>, vector<8x8xf32> -> vector<8x8xf32>
    %343 = vector.extract_strided_slice %318 {offsets = [0, 8], sizes = [8, 8], strides = [1, 1]} : vector<8x32xf32> to vector<8x8xf32>
    %344 = arith.truncf %343 : vector<8x8xf32> to vector<8x8xbf16>
    %345 = vector.extract_strided_slice %319 {offsets = [0, 8], sizes = [8, 8], strides = [1, 1]} : vector<8x32xf32> to vector<8x8xf32>
    %346 = arith.truncf %345 : vector<8x8xf32> to vector<8x8xbf16>
    %347 = vector.extract_strided_slice %320 {offsets = [0, 8], sizes = [8, 8], strides = [1, 1]} : vector<8x32xf32> to vector<8x8xf32>
    %348 = arith.truncf %347 : vector<8x8xf32> to vector<8x8xbf16>
    %cst_119 = arith.constant dense<0.000000e+00> : vector<8x8xf32>
    %349 = tpu.matmul %344, %346, %cst_119 {dimension_numbers = #tpu.dot_dimension_numbers<[1], [1], [0], [0], [0, 0, 1, 0], [], []>} : vector<8x8xbf16>, vector<8x8xbf16>, vector<8x8xf32> -> vector<8x8xf32>
    %cst_120 = arith.constant 0.353553385 : f32
    %350 = vector.broadcast %cst_120 : f32 to vector<8x8xf32>
    %351 = arith.mulf %349, %350 : vector<8x8xf32>
    %352 = arith.addf %351, %5 : vector<8x8xf32>
    %cst_121 = arith.constant dense<0xFF800000> : vector<8xf32>
    %353 = vector.multi_reduction <maximumf>, %352, %cst_121 [1] : vector<8x8xf32> to vector<8xf32>
    %354 = vector.shape_cast %353 : vector<8xf32> to vector<8x1xf32>
    %355 = vector.broadcast %354 : vector<8x1xf32> to vector<8x8xf32>
    %356 = arith.subf %352, %355 : vector<8x8xf32>
    %357 = math.exp %356 : vector<8x8xf32>
    %cst_122 = arith.constant dense<0.000000e+00> : vector<8xf32>
    %358 = vector.multi_reduction <add>, %357, %cst_122 [1] : vector<8x8xf32> to vector<8xf32>
    %359 = vector.shape_cast %358 : vector<8xf32> to vector<8x1xf32>
    %360 = tpu.reciprocal %359 {approx = true} : vector<8x1xf32> -> vector<8x1xf32>
    %361 = vector.broadcast %360 : vector<8x1xf32> to vector<8x8xf32>
    %362 = arith.mulf %357, %361 : vector<8x8xf32>
    %363 = arith.truncf %362 : vector<8x8xf32> to vector<8x8xbf16>
    %cst_123 = arith.constant dense<0.000000e+00> : vector<8x8xf32>
    %364 = tpu.matmul %363, %348, %cst_123 {dimension_numbers = #tpu.dot_dimension_numbers<[1], [0], [0], [1], [0, 0, 1, 1], [], []>} : vector<8x8xbf16>, vector<8x8xbf16>, vector<8x8xf32> -> vector<8x8xf32>
    %365 = vector.extract_strided_slice %318 {offsets = [0, 16], sizes = [8, 8], strides = [1, 1]} : vector<8x32xf32> to vector<8x8xf32>
    %366 = arith.truncf %365 : vector<8x8xf32> to vector<8x8xbf16>
    %367 = vector.extract_strided_slice %319 {offsets = [0, 16], sizes = [8, 8], strides = [1, 1]} : vector<8x32xf32> to vector<8x8xf32>
    %368 = arith.truncf %367 : vector<8x8xf32> to vector<8x8xbf16>
    %369 = vector.extract_strided_slice %320 {offsets = [0, 16], sizes = [8, 8], strides = [1, 1]} : vector<8x32xf32> to vector<8x8xf32>
    %370 = arith.truncf %369 : vector<8x8xf32> to vector<8x8xbf16>
    %cst_124 = arith.constant dense<0.000000e+00> : vector<8x8xf32>
    %371 = tpu.matmul %366, %368, %cst_124 {dimension_numbers = #tpu.dot_dimension_numbers<[1], [1], [0], [0], [0, 0, 1, 0], [], []>} : vector<8x8xbf16>, vector<8x8xbf16>, vector<8x8xf32> -> vector<8x8xf32>
    %cst_125 = arith.constant 0.353553385 : f32
    %372 = vector.broadcast %cst_125 : f32 to vector<8x8xf32>
    %373 = arith.mulf %371, %372 : vector<8x8xf32>
    %374 = arith.addf %373, %5 : vector<8x8xf32>
    %cst_126 = arith.constant dense<0xFF800000> : vector<8xf32>
    %375 = vector.multi_reduction <maximumf>, %374, %cst_126 [1] : vector<8x8xf32> to vector<8xf32>
    %376 = vector.shape_cast %375 : vector<8xf32> to vector<8x1xf32>
    %377 = vector.broadcast %376 : vector<8x1xf32> to vector<8x8xf32>
    %378 = arith.subf %374, %377 : vector<8x8xf32>
    %379 = math.exp %378 : vector<8x8xf32>
    %cst_127 = arith.constant dense<0.000000e+00> : vector<8xf32>
    %380 = vector.multi_reduction <add>, %379, %cst_127 [1] : vector<8x8xf32> to vector<8xf32>
    %381 = vector.shape_cast %380 : vector<8xf32> to vector<8x1xf32>
    %382 = tpu.reciprocal %381 {approx = true} : vector<8x1xf32> -> vector<8x1xf32>
    %383 = vector.broadcast %382 : vector<8x1xf32> to vector<8x8xf32>
    %384 = arith.mulf %379, %383 : vector<8x8xf32>
    %385 = arith.truncf %384 : vector<8x8xf32> to vector<8x8xbf16>
    %cst_128 = arith.constant dense<0.000000e+00> : vector<8x8xf32>
    %386 = tpu.matmul %385, %370, %cst_128 {dimension_numbers = #tpu.dot_dimension_numbers<[1], [0], [0], [1], [0, 0, 1, 1], [], []>} : vector<8x8xbf16>, vector<8x8xbf16>, vector<8x8xf32> -> vector<8x8xf32>
    %387 = vector.extract_strided_slice %318 {offsets = [0, 24], sizes = [8, 8], strides = [1, 1]} : vector<8x32xf32> to vector<8x8xf32>
    %388 = arith.truncf %387 : vector<8x8xf32> to vector<8x8xbf16>
    %389 = vector.extract_strided_slice %319 {offsets = [0, 24], sizes = [8, 8], strides = [1, 1]} : vector<8x32xf32> to vector<8x8xf32>
    %390 = arith.truncf %389 : vector<8x8xf32> to vector<8x8xbf16>
    %391 = vector.extract_strided_slice %320 {offsets = [0, 24], sizes = [8, 8], strides = [1, 1]} : vector<8x32xf32> to vector<8x8xf32>
    %392 = arith.truncf %391 : vector<8x8xf32> to vector<8x8xbf16>
    %cst_129 = arith.constant dense<0.000000e+00> : vector<8x8xf32>
    %393 = tpu.matmul %388, %390, %cst_129 {dimension_numbers = #tpu.dot_dimension_numbers<[1], [1], [0], [0], [0, 0, 1, 0], [], []>} : vector<8x8xbf16>, vector<8x8xbf16>, vector<8x8xf32> -> vector<8x8xf32>
    %cst_130 = arith.constant 0.353553385 : f32
    %394 = vector.broadcast %cst_130 : f32 to vector<8x8xf32>
    %395 = arith.mulf %393, %394 : vector<8x8xf32>
    %396 = arith.addf %395, %5 : vector<8x8xf32>
    %cst_131 = arith.constant dense<0xFF800000> : vector<8xf32>
    %397 = vector.multi_reduction <maximumf>, %396, %cst_131 [1] : vector<8x8xf32> to vector<8xf32>
    %398 = vector.shape_cast %397 : vector<8xf32> to vector<8x1xf32>
    %399 = vector.broadcast %398 : vector<8x1xf32> to vector<8x8xf32>
    %400 = arith.subf %396, %399 : vector<8x8xf32>
    %401 = math.exp %400 : vector<8x8xf32>
    %cst_132 = arith.constant dense<0.000000e+00> : vector<8xf32>
    %402 = vector.multi_reduction <add>, %401, %cst_132 [1] : vector<8x8xf32> to vector<8xf32>
    %403 = vector.shape_cast %402 : vector<8xf32> to vector<8x1xf32>
    %404 = tpu.reciprocal %403 {approx = true} : vector<8x1xf32> -> vector<8x1xf32>
    %405 = vector.broadcast %404 : vector<8x1xf32> to vector<8x8xf32>
    %406 = arith.mulf %401, %405 : vector<8x8xf32>
    %407 = arith.truncf %406 : vector<8x8xf32> to vector<8x8xbf16>
    %cst_133 = arith.constant dense<0.000000e+00> : vector<8x8xf32>
    %408 = tpu.matmul %407, %392, %cst_133 {dimension_numbers = #tpu.dot_dimension_numbers<[1], [0], [0], [1], [0, 0, 1, 1], [], []>} : vector<8x8xbf16>, vector<8x8xbf16>, vector<8x8xf32> -> vector<8x8xf32>
    %409 = tpu.concatenate %342, %364, %386, %408 in 1 : vector<8x8xf32>, vector<8x8xf32>, vector<8x8xf32>, vector<8x8xf32> -> vector<8x32xf32>
    %410 = arith.truncf %409 : vector<8x32xf32> to vector<8x32xbf16>
    %cst_134 = arith.constant dense<0.000000e+00> : vector<8x32xf32>
    %411 = tpu.matmul %410, %10, %cst_134 {dimension_numbers = #tpu.dot_dimension_numbers<[1], [0], [0], [1], [0, 0, 1, 1], [], []>} : vector<8x32xbf16>, vector<32x32xbf16>, vector<8x32xf32> -> vector<8x32xf32>
    %412 = vector.broadcast %11 : vector<1x32xf32> to vector<8x32xf32>
    %413 = arith.addf %411, %412 : vector<8x32xf32>
    %414 = arith.addf %313, %413 : vector<8x32xf32>
    %cst_135 = arith.constant dense<0.000000e+00> : vector<8xf32>
    %415 = vector.multi_reduction <add>, %414, %cst_135 [1] : vector<8x32xf32> to vector<8xf32>
    %416 = vector.shape_cast %415 : vector<8xf32> to vector<8x1xf32>
    %cst_136 = arith.constant 3.200000e+01 : f32
    %417 = vector.broadcast %cst_136 : f32 to vector<8x1xf32>
    %418 = arith.divf %416, %417 : vector<8x1xf32>
    %419 = vector.broadcast %418 : vector<8x1xf32> to vector<8x32xf32>
    %420 = arith.subf %414, %419 : vector<8x32xf32>
    %421 = arith.mulf %420, %420 : vector<8x32xf32>
    %cst_137 = arith.constant dense<0.000000e+00> : vector<8xf32>
    %422 = vector.multi_reduction <add>, %421, %cst_137 [1] : vector<8x32xf32> to vector<8xf32>
    %423 = vector.shape_cast %422 : vector<8xf32> to vector<8x1xf32>
    %cst_138 = arith.constant 3.200000e+01 : f32
    %424 = vector.broadcast %cst_138 : f32 to vector<8x1xf32>
    %425 = arith.divf %423, %424 : vector<8x1xf32>
    %426 = vector.broadcast %418 : vector<8x1xf32> to vector<8x32xf32>
    %427 = arith.subf %414, %426 : vector<8x32xf32>
    %cst_139 = arith.constant 9.99999974E-6 : f32
    %428 = vector.broadcast %cst_139 : f32 to vector<8x1xf32>
    %429 = arith.addf %425, %428 : vector<8x1xf32>
    %430 = math.rsqrt %429 : vector<8x1xf32>
    %431 = vector.broadcast %430 : vector<8x1xf32> to vector<8x32xf32>
    %432 = arith.mulf %427, %431 : vector<8x32xf32>
    %433 = vector.broadcast %20 : vector<1x32xf32> to vector<8x32xf32>
    %434 = arith.mulf %432, %433 : vector<8x32xf32>
    %435 = vector.broadcast %21 : vector<1x32xf32> to vector<8x32xf32>
    %436 = arith.addf %434, %435 : vector<8x32xf32>
    %437 = vector.extract_strided_slice %12 {offsets = [0, 0], sizes = [32, 32], strides = [1, 1]} : vector<32x96xbf16> to vector<32x32xbf16>
    %438 = vector.extract_strided_slice %13 {offsets = [0, 0], sizes = [1, 32], strides = [1, 1]} : vector<1x96xf32> to vector<1x32xf32>
    %439 = arith.truncf %436 : vector<8x32xf32> to vector<8x32xbf16>
    %cst_140 = arith.constant dense<0.000000e+00> : vector<8x32xf32>
    %440 = tpu.matmul %439, %437, %cst_140 {dimension_numbers = #tpu.dot_dimension_numbers<[1], [0], [0], [1], [0, 0, 1, 1], [], []>} : vector<8x32xbf16>, vector<32x32xbf16>, vector<8x32xf32> -> vector<8x32xf32>
    %441 = vector.broadcast %438 : vector<1x32xf32> to vector<8x32xf32>
    %442 = arith.addf %440, %441 : vector<8x32xf32>
    %443 = vector.extract_strided_slice %442 {offsets = [0, 0], sizes = [8, 8], strides = [1, 1]} : vector<8x32xf32> to vector<8x8xf32>
    %444 = arith.truncf %443 : vector<8x8xf32> to vector<8x8xbf16>
    %445 = vector.extract_strided_slice %34 {offsets = [0, 0], sizes = [8, 8], strides = [1, 1]} : vector<8x32xf32> to vector<8x8xf32>
    %446 = arith.truncf %445 : vector<8x8xf32> to vector<8x8xbf16>
    %447 = vector.extract_strided_slice %35 {offsets = [0, 0], sizes = [8, 8], strides = [1, 1]} : vector<8x32xf32> to vector<8x8xf32>
    %448 = arith.truncf %447 : vector<8x8xf32> to vector<8x8xbf16>
    %cst_141 = arith.constant dense<0.000000e+00> : vector<8x8xf32>
    %449 = tpu.matmul %444, %446, %cst_141 {dimension_numbers = #tpu.dot_dimension_numbers<[1], [1], [0], [0], [0, 0, 1, 0], [], []>} : vector<8x8xbf16>, vector<8x8xbf16>, vector<8x8xf32> -> vector<8x8xf32>
    %cst_142 = arith.constant 0.353553385 : f32
    %450 = vector.broadcast %cst_142 : f32 to vector<8x8xf32>
    %451 = arith.mulf %449, %450 : vector<8x8xf32>
    %452 = arith.addf %451, %7 : vector<8x8xf32>
    %cst_143 = arith.constant dense<0xFF800000> : vector<8xf32>
    %453 = vector.multi_reduction <maximumf>, %452, %cst_143 [1] : vector<8x8xf32> to vector<8xf32>
    %454 = vector.shape_cast %453 : vector<8xf32> to vector<8x1xf32>
    %455 = vector.broadcast %454 : vector<8x1xf32> to vector<8x8xf32>
    %456 = arith.subf %452, %455 : vector<8x8xf32>
    %457 = math.exp %456 : vector<8x8xf32>
    %cst_144 = arith.constant dense<0.000000e+00> : vector<8xf32>
    %458 = vector.multi_reduction <add>, %457, %cst_144 [1] : vector<8x8xf32> to vector<8xf32>
    %459 = vector.shape_cast %458 : vector<8xf32> to vector<8x1xf32>
    %460 = tpu.reciprocal %459 {approx = true} : vector<8x1xf32> -> vector<8x1xf32>
    %461 = vector.broadcast %460 : vector<8x1xf32> to vector<8x8xf32>
    %462 = arith.mulf %457, %461 : vector<8x8xf32>
    %463 = arith.truncf %462 : vector<8x8xf32> to vector<8x8xbf16>
    %cst_145 = arith.constant dense<0.000000e+00> : vector<8x8xf32>
    %464 = tpu.matmul %463, %448, %cst_145 {dimension_numbers = #tpu.dot_dimension_numbers<[1], [0], [0], [1], [0, 0, 1, 1], [], []>} : vector<8x8xbf16>, vector<8x8xbf16>, vector<8x8xf32> -> vector<8x8xf32>
    %465 = vector.extract_strided_slice %442 {offsets = [0, 8], sizes = [8, 8], strides = [1, 1]} : vector<8x32xf32> to vector<8x8xf32>
    %466 = arith.truncf %465 : vector<8x8xf32> to vector<8x8xbf16>
    %467 = vector.extract_strided_slice %34 {offsets = [0, 8], sizes = [8, 8], strides = [1, 1]} : vector<8x32xf32> to vector<8x8xf32>
    %468 = arith.truncf %467 : vector<8x8xf32> to vector<8x8xbf16>
    %469 = vector.extract_strided_slice %35 {offsets = [0, 8], sizes = [8, 8], strides = [1, 1]} : vector<8x32xf32> to vector<8x8xf32>
    %470 = arith.truncf %469 : vector<8x8xf32> to vector<8x8xbf16>
    %cst_146 = arith.constant dense<0.000000e+00> : vector<8x8xf32>
    %471 = tpu.matmul %466, %468, %cst_146 {dimension_numbers = #tpu.dot_dimension_numbers<[1], [1], [0], [0], [0, 0, 1, 0], [], []>} : vector<8x8xbf16>, vector<8x8xbf16>, vector<8x8xf32> -> vector<8x8xf32>
    %cst_147 = arith.constant 0.353553385 : f32
    %472 = vector.broadcast %cst_147 : f32 to vector<8x8xf32>
    %473 = arith.mulf %471, %472 : vector<8x8xf32>
    %474 = arith.addf %473, %7 : vector<8x8xf32>
    %cst_148 = arith.constant dense<0xFF800000> : vector<8xf32>
    %475 = vector.multi_reduction <maximumf>, %474, %cst_148 [1] : vector<8x8xf32> to vector<8xf32>
    %476 = vector.shape_cast %475 : vector<8xf32> to vector<8x1xf32>
    %477 = vector.broadcast %476 : vector<8x1xf32> to vector<8x8xf32>
    %478 = arith.subf %474, %477 : vector<8x8xf32>
    %479 = math.exp %478 : vector<8x8xf32>
    %cst_149 = arith.constant dense<0.000000e+00> : vector<8xf32>
    %480 = vector.multi_reduction <add>, %479, %cst_149 [1] : vector<8x8xf32> to vector<8xf32>
    %481 = vector.shape_cast %480 : vector<8xf32> to vector<8x1xf32>
    %482 = tpu.reciprocal %481 {approx = true} : vector<8x1xf32> -> vector<8x1xf32>
    %483 = vector.broadcast %482 : vector<8x1xf32> to vector<8x8xf32>
    %484 = arith.mulf %479, %483 : vector<8x8xf32>
    %485 = arith.truncf %484 : vector<8x8xf32> to vector<8x8xbf16>
    %cst_150 = arith.constant dense<0.000000e+00> : vector<8x8xf32>
    %486 = tpu.matmul %485, %470, %cst_150 {dimension_numbers = #tpu.dot_dimension_numbers<[1], [0], [0], [1], [0, 0, 1, 1], [], []>} : vector<8x8xbf16>, vector<8x8xbf16>, vector<8x8xf32> -> vector<8x8xf32>
    %487 = vector.extract_strided_slice %442 {offsets = [0, 16], sizes = [8, 8], strides = [1, 1]} : vector<8x32xf32> to vector<8x8xf32>
    %488 = arith.truncf %487 : vector<8x8xf32> to vector<8x8xbf16>
    %489 = vector.extract_strided_slice %34 {offsets = [0, 16], sizes = [8, 8], strides = [1, 1]} : vector<8x32xf32> to vector<8x8xf32>
    %490 = arith.truncf %489 : vector<8x8xf32> to vector<8x8xbf16>
    %491 = vector.extract_strided_slice %35 {offsets = [0, 16], sizes = [8, 8], strides = [1, 1]} : vector<8x32xf32> to vector<8x8xf32>
    %492 = arith.truncf %491 : vector<8x8xf32> to vector<8x8xbf16>
    %cst_151 = arith.constant dense<0.000000e+00> : vector<8x8xf32>
    %493 = tpu.matmul %488, %490, %cst_151 {dimension_numbers = #tpu.dot_dimension_numbers<[1], [1], [0], [0], [0, 0, 1, 0], [], []>} : vector<8x8xbf16>, vector<8x8xbf16>, vector<8x8xf32> -> vector<8x8xf32>
    %cst_152 = arith.constant 0.353553385 : f32
    %494 = vector.broadcast %cst_152 : f32 to vector<8x8xf32>
    %495 = arith.mulf %493, %494 : vector<8x8xf32>
    %496 = arith.addf %495, %7 : vector<8x8xf32>
    %cst_153 = arith.constant dense<0xFF800000> : vector<8xf32>
    %497 = vector.multi_reduction <maximumf>, %496, %cst_153 [1] : vector<8x8xf32> to vector<8xf32>
    %498 = vector.shape_cast %497 : vector<8xf32> to vector<8x1xf32>
    %499 = vector.broadcast %498 : vector<8x1xf32> to vector<8x8xf32>
    %500 = arith.subf %496, %499 : vector<8x8xf32>
    %501 = math.exp %500 : vector<8x8xf32>
    %cst_154 = arith.constant dense<0.000000e+00> : vector<8xf32>
    %502 = vector.multi_reduction <add>, %501, %cst_154 [1] : vector<8x8xf32> to vector<8xf32>
    %503 = vector.shape_cast %502 : vector<8xf32> to vector<8x1xf32>
    %504 = tpu.reciprocal %503 {approx = true} : vector<8x1xf32> -> vector<8x1xf32>
    %505 = vector.broadcast %504 : vector<8x1xf32> to vector<8x8xf32>
    %506 = arith.mulf %501, %505 : vector<8x8xf32>
    %507 = arith.truncf %506 : vector<8x8xf32> to vector<8x8xbf16>
    %cst_155 = arith.constant dense<0.000000e+00> : vector<8x8xf32>
    %508 = tpu.matmul %507, %492, %cst_155 {dimension_numbers = #tpu.dot_dimension_numbers<[1], [0], [0], [1], [0, 0, 1, 1], [], []>} : vector<8x8xbf16>, vector<8x8xbf16>, vector<8x8xf32> -> vector<8x8xf32>
    %509 = vector.extract_strided_slice %442 {offsets = [0, 24], sizes = [8, 8], strides = [1, 1]} : vector<8x32xf32> to vector<8x8xf32>
    %510 = arith.truncf %509 : vector<8x8xf32> to vector<8x8xbf16>
    %511 = vector.extract_strided_slice %34 {offsets = [0, 24], sizes = [8, 8], strides = [1, 1]} : vector<8x32xf32> to vector<8x8xf32>
    %512 = arith.truncf %511 : vector<8x8xf32> to vector<8x8xbf16>
    %513 = vector.extract_strided_slice %35 {offsets = [0, 24], sizes = [8, 8], strides = [1, 1]} : vector<8x32xf32> to vector<8x8xf32>
    %514 = arith.truncf %513 : vector<8x8xf32> to vector<8x8xbf16>
    %cst_156 = arith.constant dense<0.000000e+00> : vector<8x8xf32>
    %515 = tpu.matmul %510, %512, %cst_156 {dimension_numbers = #tpu.dot_dimension_numbers<[1], [1], [0], [0], [0, 0, 1, 0], [], []>} : vector<8x8xbf16>, vector<8x8xbf16>, vector<8x8xf32> -> vector<8x8xf32>
    %cst_157 = arith.constant 0.353553385 : f32
    %516 = vector.broadcast %cst_157 : f32 to vector<8x8xf32>
    %517 = arith.mulf %515, %516 : vector<8x8xf32>
    %518 = arith.addf %517, %7 : vector<8x8xf32>
    %cst_158 = arith.constant dense<0xFF800000> : vector<8xf32>
    %519 = vector.multi_reduction <maximumf>, %518, %cst_158 [1] : vector<8x8xf32> to vector<8xf32>
    %520 = vector.shape_cast %519 : vector<8xf32> to vector<8x1xf32>
    %521 = vector.broadcast %520 : vector<8x1xf32> to vector<8x8xf32>
    %522 = arith.subf %518, %521 : vector<8x8xf32>
    %523 = math.exp %522 : vector<8x8xf32>
    %cst_159 = arith.constant dense<0.000000e+00> : vector<8xf32>
    %524 = vector.multi_reduction <add>, %523, %cst_159 [1] : vector<8x8xf32> to vector<8xf32>
    %525 = vector.shape_cast %524 : vector<8xf32> to vector<8x1xf32>
    %526 = tpu.reciprocal %525 {approx = true} : vector<8x1xf32> -> vector<8x1xf32>
    %527 = vector.broadcast %526 : vector<8x1xf32> to vector<8x8xf32>
    %528 = arith.mulf %523, %527 : vector<8x8xf32>
    %529 = arith.truncf %528 : vector<8x8xf32> to vector<8x8xbf16>
    %cst_160 = arith.constant dense<0.000000e+00> : vector<8x8xf32>
    %530 = tpu.matmul %529, %514, %cst_160 {dimension_numbers = #tpu.dot_dimension_numbers<[1], [0], [0], [1], [0, 0, 1, 1], [], []>} : vector<8x8xbf16>, vector<8x8xbf16>, vector<8x8xf32> -> vector<8x8xf32>
    %531 = tpu.concatenate %464, %486, %508, %530 in 1 : vector<8x8xf32>, vector<8x8xf32>, vector<8x8xf32>, vector<8x8xf32> -> vector<8x32xf32>
    %532 = arith.truncf %531 : vector<8x32xf32> to vector<8x32xbf16>
    %cst_161 = arith.constant dense<0.000000e+00> : vector<8x32xf32>
    %533 = tpu.matmul %532, %14, %cst_161 {dimension_numbers = #tpu.dot_dimension_numbers<[1], [0], [0], [1], [0, 0, 1, 1], [], []>} : vector<8x32xbf16>, vector<32x32xbf16>, vector<8x32xf32> -> vector<8x32xf32>
    %534 = vector.broadcast %15 : vector<1x32xf32> to vector<8x32xf32>
    %535 = arith.addf %533, %534 : vector<8x32xf32>
    %536 = arith.addf %436, %535 : vector<8x32xf32>
    %cst_162 = arith.constant dense<0.000000e+00> : vector<8xf32>
    %537 = vector.multi_reduction <add>, %536, %cst_162 [1] : vector<8x32xf32> to vector<8xf32>
    %538 = vector.shape_cast %537 : vector<8xf32> to vector<8x1xf32>
    %cst_163 = arith.constant 3.200000e+01 : f32
    %539 = vector.broadcast %cst_163 : f32 to vector<8x1xf32>
    %540 = arith.divf %538, %539 : vector<8x1xf32>
    %541 = vector.broadcast %540 : vector<8x1xf32> to vector<8x32xf32>
    %542 = arith.subf %536, %541 : vector<8x32xf32>
    %543 = arith.mulf %542, %542 : vector<8x32xf32>
    %cst_164 = arith.constant dense<0.000000e+00> : vector<8xf32>
    %544 = vector.multi_reduction <add>, %543, %cst_164 [1] : vector<8x32xf32> to vector<8xf32>
    %545 = vector.shape_cast %544 : vector<8xf32> to vector<8x1xf32>
    %cst_165 = arith.constant 3.200000e+01 : f32
    %546 = vector.broadcast %cst_165 : f32 to vector<8x1xf32>
    %547 = arith.divf %545, %546 : vector<8x1xf32>
    %548 = vector.broadcast %540 : vector<8x1xf32> to vector<8x32xf32>
    %549 = arith.subf %536, %548 : vector<8x32xf32>
    %cst_166 = arith.constant 9.99999974E-6 : f32
    %550 = vector.broadcast %cst_166 : f32 to vector<8x1xf32>
    %551 = arith.addf %547, %550 : vector<8x1xf32>
    %552 = math.rsqrt %551 : vector<8x1xf32>
    %553 = vector.broadcast %552 : vector<8x1xf32> to vector<8x32xf32>
    %554 = arith.mulf %549, %553 : vector<8x32xf32>
    %555 = vector.broadcast %22 : vector<1x32xf32> to vector<8x32xf32>
    %556 = arith.mulf %554, %555 : vector<8x32xf32>
    %557 = vector.broadcast %23 : vector<1x32xf32> to vector<8x32xf32>
    %558 = arith.addf %556, %557 : vector<8x32xf32>
    %559 = arith.truncf %558 : vector<8x32xf32> to vector<8x32xbf16>
    %cst_167 = arith.constant dense<0.000000e+00> : vector<8x64xf32>
    %560 = tpu.matmul %559, %16, %cst_167 {dimension_numbers = #tpu.dot_dimension_numbers<[1], [0], [0], [1], [0, 0, 1, 1], [], []>} : vector<8x32xbf16>, vector<32x64xbf16>, vector<8x64xf32> -> vector<8x64xf32>
    %561 = vector.broadcast %17 : vector<1x64xf32> to vector<8x64xf32>
    %562 = arith.addf %560, %561 : vector<8x64xf32>
    %cst_168 = arith.constant 0.000000e+00 : f32
    %563 = vector.broadcast %cst_168 : f32 to vector<8x64xf32>
    %564 = arith.maximumf %562, %563 : vector<8x64xf32>
    %565 = arith.truncf %564 : vector<8x64xf32> to vector<8x64xbf16>
    %cst_169 = arith.constant dense<0.000000e+00> : vector<8x32xf32>
    %566 = tpu.matmul %565, %18, %cst_169 {dimension_numbers = #tpu.dot_dimension_numbers<[1], [0], [0], [1], [0, 0, 1, 1], [], []>} : vector<8x64xbf16>, vector<64x32xbf16>, vector<8x32xf32> -> vector<8x32xf32>
    %567 = vector.broadcast %19 : vector<1x32xf32> to vector<8x32xf32>
    %568 = arith.addf %566, %567 : vector<8x32xf32>
    %569 = arith.addf %558, %568 : vector<8x32xf32>
    %cst_170 = arith.constant dense<0.000000e+00> : vector<8xf32>
    %570 = vector.multi_reduction <add>, %569, %cst_170 [1] : vector<8x32xf32> to vector<8xf32>
    %571 = vector.shape_cast %570 : vector<8xf32> to vector<8x1xf32>
    %cst_171 = arith.constant 3.200000e+01 : f32
    %572 = vector.broadcast %cst_171 : f32 to vector<8x1xf32>
    %573 = arith.divf %571, %572 : vector<8x1xf32>
    %574 = vector.broadcast %573 : vector<8x1xf32> to vector<8x32xf32>
    %575 = arith.subf %569, %574 : vector<8x32xf32>
    %576 = arith.mulf %575, %575 : vector<8x32xf32>
    %cst_172 = arith.constant dense<0.000000e+00> : vector<8xf32>
    %577 = vector.multi_reduction <add>, %576, %cst_172 [1] : vector<8x32xf32> to vector<8xf32>
    %578 = vector.shape_cast %577 : vector<8xf32> to vector<8x1xf32>
    %cst_173 = arith.constant 3.200000e+01 : f32
    %579 = vector.broadcast %cst_173 : f32 to vector<8x1xf32>
    %580 = arith.divf %578, %579 : vector<8x1xf32>
    %581 = vector.broadcast %573 : vector<8x1xf32> to vector<8x32xf32>
    %582 = arith.subf %569, %581 : vector<8x32xf32>
    %cst_174 = arith.constant 9.99999974E-6 : f32
    %583 = vector.broadcast %cst_174 : f32 to vector<8x1xf32>
    %584 = arith.addf %580, %583 : vector<8x1xf32>
    %585 = math.rsqrt %584 : vector<8x1xf32>
    %586 = vector.broadcast %585 : vector<8x1xf32> to vector<8x32xf32>
    %587 = arith.mulf %582, %586 : vector<8x32xf32>
    %588 = vector.broadcast %24 : vector<1x32xf32> to vector<8x32xf32>
    %589 = arith.mulf %587, %588 : vector<8x32xf32>
    %590 = vector.broadcast %25 : vector<1x32xf32> to vector<8x32xf32>
    %591 = arith.addf %589, %590 : vector<8x32xf32>
    %cst_175 = arith.constant dense<0.000000e+00> : vector<8xf32>
    %592 = vector.multi_reduction <add>, %591, %cst_175 [1] : vector<8x32xf32> to vector<8xf32>
    %593 = vector.shape_cast %592 : vector<8xf32> to vector<8x1xf32>
    %cst_176 = arith.constant 3.200000e+01 : f32
    %594 = vector.broadcast %cst_176 : f32 to vector<8x1xf32>
    %595 = arith.divf %593, %594 : vector<8x1xf32>
    %596 = vector.broadcast %595 : vector<8x1xf32> to vector<8x32xf32>
    %597 = arith.subf %591, %596 : vector<8x32xf32>
    %598 = arith.mulf %597, %597 : vector<8x32xf32>
    %cst_177 = arith.constant dense<0.000000e+00> : vector<8xf32>
    %599 = vector.multi_reduction <add>, %598, %cst_177 [1] : vector<8x32xf32> to vector<8xf32>
    %600 = vector.shape_cast %599 : vector<8xf32> to vector<8x1xf32>
    %cst_178 = arith.constant 3.200000e+01 : f32
    %601 = vector.broadcast %cst_178 : f32 to vector<8x1xf32>
    %602 = arith.divf %600, %601 : vector<8x1xf32>
    %603 = vector.broadcast %595 : vector<8x1xf32> to vector<8x32xf32>
    %604 = arith.subf %591, %603 : vector<8x32xf32>
    %cst_179 = arith.constant 9.99999974E-6 : f32
    %605 = vector.broadcast %cst_179 : f32 to vector<8x1xf32>
    %606 = arith.addf %602, %605 : vector<8x1xf32>
    %607 = math.rsqrt %606 : vector<8x1xf32>
    %608 = vector.broadcast %607 : vector<8x1xf32> to vector<8x32xf32>
    %609 = arith.mulf %604, %608 : vector<8x32xf32>
    %610 = vector.broadcast %26 : vector<1x32xf32> to vector<8x32xf32>
    %611 = arith.mulf %609, %610 : vector<8x32xf32>
    %612 = vector.broadcast %27 : vector<1x32xf32> to vector<8x32xf32>
    %613 = arith.addf %611, %612 : vector<8x32xf32>
    %c0_180 = arith.constant 0 : index
    %c0_181 = arith.constant 0 : index
    %c0_182 = arith.constant 0 : index
    %614 = vector.load %arg25[%c0_180, %c0_181, %c0_182] : memref<1x8x32xf32, #tpu.memory_space<vmem>>, vector<1x8x32xf32>
    %615 = vector.shape_cast %614 : vector<1x8x32xf32> to vector<8x32xf32>
    %616 = vector.shape_cast %613 : vector<8x32xf32> to vector<1x8x32xf32>
    tpu.vector_store %arg25[%c0_180, %c0_181, %c0_182], %616 {strides = array<i32>} : memref<1x8x32xf32, #tpu.memory_space<vmem>>, vector<1x8x32xf32>,
    return
  }
  func.func @transform_0(%arg0: i32) -> (i32, i32, i32) {
    %c0_i32 = arith.constant 0 : i32
    %c0_i32_0 = arith.constant 0 : i32
    %c0_i32_1 = arith.constant 0 : i32
    return %arg0, %c0_i32, %c0_i32_0 : i32, i32, i32
  }
  func.func @transform_1(%arg0: i32) -> (i32, i32, i32) {
    %c0_i32 = arith.constant 0 : i32
    %c0_i32_0 = arith.constant 0 : i32
    %c0_i32_1 = arith.constant 0 : i32
    return %arg0, %c0_i32, %c0_i32_0 : i32, i32, i32
  }
  func.func @transform_2(%arg0: i32) -> (i32, i32, i32) {
    %c0_i32 = arith.constant 0 : i32
    %c0_i32_0 = arith.constant 0 : i32
    %c0_i32_1 = arith.constant 0 : i32
    return %arg0, %c0_i32, %c0_i32_0 : i32, i32, i32
  }
  func.func @transform_3(%arg0: i32) -> (i32, i32, i32) {
    %c0_i32 = arith.constant 0 : i32
    %c0_i32_0 = arith.constant 0 : i32
    %c0_i32_1 = arith.constant 0 : i32
    return %arg0, %c0_i32, %c0_i32_0 : i32, i32, i32
  }
  func.func @transform_4(%arg0: i32) -> (i32, i32) {
    %c0_i32 = arith.constant 0 : i32
    %c0_i32_0 = arith.constant 0 : i32
    %c0_i32_1 = arith.constant 0 : i32
    return %c0_i32, %c0_i32_0 : i32, i32
  }
  func.func @transform_5(%arg0: i32) -> (i32, i32) {
    %c0_i32 = arith.constant 0 : i32
    %c0_i32_0 = arith.constant 0 : i32
    %c0_i32_1 = arith.constant 0 : i32
    return %c0_i32, %c0_i32_0 : i32, i32
  }
  func.func @transform_6(%arg0: i32) -> (i32, i32) {
    %c0_i32 = arith.constant 0 : i32
    %c0_i32_0 = arith.constant 0 : i32
    %c0_i32_1 = arith.constant 0 : i32
    return %c0_i32, %c0_i32_0 : i32, i32
  }
  func.func @transform_7(%arg0: i32) -> (i32, i32) {
    %c0_i32 = arith.constant 0 : i32
    %c0_i32_0 = arith.constant 0 : i32
    %c0_i32_1 = arith.constant 0 : i32
    return %c0_i32, %c0_i32_0 : i32, i32
  }
  func.func @transform_8(%arg0: i32) -> (i32, i32) {
    %c0_i32 = arith.constant 0 : i32
    %c0_i32_0 = arith.constant 0 : i32
    %c0_i32_1 = arith.constant 0 : i32
    return %c0_i32, %c0_i32_0 : i32, i32
  }
  func.func @transform_9(%arg0: i32) -> (i32, i32) {
    %c0_i32 = arith.constant 0 : i32
    %c0_i32_0 = arith.constant 0 : i32
    %c0_i32_1 = arith.constant 0 : i32
    return %c0_i32, %c0_i32_0 : i32, i32
  }
  func.func @transform_10(%arg0: i32) -> (i32, i32) {
    %c0_i32 = arith.constant 0 : i32
    %c0_i32_0 = arith.constant 0 : i32
    %c0_i32_1 = arith.constant 0 : i32
    return %c0_i32, %c0_i32_0 : i32, i32
  }
  func.func @transform_11(%arg0: i32) -> (i32, i32) {
    %c0_i32 = arith.constant 0 : i32
    %c0_i32_0 = arith.constant 0 : i32
    %c0_i32_1 = arith.constant 0 : i32
    return %c0_i32, %c0_i32_0 : i32, i32
  }
  func.func @transform_12(%arg0: i32) -> (i32, i32) {
    %c0_i32 = arith.constant 0 : i32
    %c0_i32_0 = arith.constant 0 : i32
    %c0_i32_1 = arith.constant 0 : i32
    return %c0_i32, %c0_i32_0 : i32, i32
  }
  func.func @transform_13(%arg0: i32) -> (i32, i32) {
    %c0_i32 = arith.constant 0 : i32
    %c0_i32_0 = arith.constant 0 : i32
    %c0_i32_1 = arith.constant 0 : i32
    return %c0_i32, %c0_i32_0 : i32, i32
  }
  func.func @transform_14(%arg0: i32) -> (i32, i32) {
    %c0_i32 = arith.constant 0 : i32
    %c0_i32_0 = arith.constant 0 : i32
    %c0_i32_1 = arith.constant 0 : i32
    return %c0_i32, %c0_i32_0 : i32, i32
  }
  func.func @transform_15(%arg0: i32) -> (i32, i32) {
    %c0_i32 = arith.constant 0 : i32
    %c0_i32_0 = arith.constant 0 : i32
    %c0_i32_1 = arith.constant 0 : i32
    return %c0_i32, %c0_i32_0 : i32, i32
  }
  func.func @transform_16(%arg0: i32) -> (i32, i32) {
    %c0_i32 = arith.constant 0 : i32
    %c0_i32_0 = arith.constant 0 : i32
    %c0_i32_1 = arith.constant 0 : i32
    return %c0_i32, %c0_i32_0 : i32, i32
  }
  func.func @transform_17(%arg0: i32) -> (i32, i32) {
    %c0_i32 = arith.constant 0 : i32
    %c0_i32_0 = arith.constant 0 : i32
    %c0_i32_1 = arith.constant 0 : i32
    return %c0_i32, %c0_i32_0 : i32, i32
  }
  func.func @transform_18(%arg0: i32) -> (i32, i32) {
    %c0_i32 = arith.constant 0 : i32
    %c0_i32_0 = arith.constant 0 : i32
    %c0_i32_1 = arith.constant 0 : i32
    return %c0_i32, %c0_i32_0 : i32, i32
  }
  func.func @transform_19(%arg0: i32) -> (i32, i32) {
    %c0_i32 = arith.constant 0 : i32
    %c0_i32_0 = arith.constant 0 : i32
    %c0_i32_1 = arith.constant 0 : i32
    return %c0_i32, %c0_i32_0 : i32, i32
  }
  func.func @transform_20(%arg0: i32) -> (i32, i32) {
    %c0_i32 = arith.constant 0 : i32
    %c0_i32_0 = arith.constant 0 : i32
    %c0_i32_1 = arith.constant 0 : i32
    return %c0_i32, %c0_i32_0 : i32, i32
  }
  func.func @transform_21(%arg0: i32) -> (i32, i32) {
    %c0_i32 = arith.constant 0 : i32
    %c0_i32_0 = arith.constant 0 : i32
    %c0_i32_1 = arith.constant 0 : i32
    return %c0_i32, %c0_i32_0 : i32, i32
  }
  func.func @transform_22(%arg0: i32) -> (i32, i32) {
    %c0_i32 = arith.constant 0 : i32
    %c0_i32_0 = arith.constant 0 : i32
    %c0_i32_1 = arith.constant 0 : i32
    return %c0_i32, %c0_i32_0 : i32, i32
  }
  func.func @transform_23(%arg0: i32) -> (i32, i32) {
    %c0_i32 = arith.constant 0 : i32
    %c0_i32_0 = arith.constant 0 : i32
    %c0_i32_1 = arith.constant 0 : i32
    return %c0_i32, %c0_i32_0 : i32, i32
  }
  func.func @transform_24(%arg0: i32) -> (i32, i32, i32) {
    %c0_i32 = arith.constant 0 : i32
    %c0_i32_0 = arith.constant 0 : i32
    %c0_i32_1 = arith.constant 0 : i32
    return %arg0, %c0_i32, %c0_i32_0 : i32, i32, i32
  }
}

</mosaic_0001>

<bundles_post_ra>
// kernel: _lambda_.1
= control target key start
LH: loop header
LB: loop body
LE: loop exit
PB: predicated region body
PF: predicated region fallthrough
CT: control target
= control target key end

     0   :  { %s5038_s0 = inlined_call_operand.vmem [shape: f32[2,8,32], index: 0, kind: input, shape index: {}]   ;;  %s5039_s1 = inlined_call_operand.vmem [shape: f32[2,8,32], index: 1, kind: input, shape index: {}]   ;;  %s5040_s2 = inlined_call_operand.vmem [shape: f32[2,8,8], index: 2, kind: input, shape index: {}]   ;;  %s5041_s3 = inlined_call_operand.vmem [shape: f32[2,8,8], index: 3, kind: input, shape index: {}]   ;;  %s5042_s4 = inlined_call_operand.vmem [shape: bf16[32,96], index: 4, kind: input, shape index: {}]   ;;  %s5043_s5 = inlined_call_operand.vmem [shape: f32[1,96], index: 5, kind: input, shape index: {}]   ;;  %s5044_s6 = inlined_call_operand.vmem [shape: bf16[32,32], index: 6, kind: input, shape index: {}]   ;;  %s5045_s7 = inlined_call_operand.vmem [shape: f32[1,32], index: 7, kind: input, shape index: {}]   ;;  %s5046_s8 = inlined_call_operand.vmem [shape: bf16[32,96], index: 8, kind: input, shape index: {}]   ;;  %s5047_s9 = inlined_call_operand.vmem [shape: f32[1,96], index: 9, kind: input, shape index: {}]   ;;  %s5048_s10 = inlined_call_operand.vmem [shape: bf16[32,32], index: 10, kind: input, shape index: {}]   ;;  %s5049_s11 = inlined_call_operand.vmem [shape: f32[1,32], index: 11, kind: input, shape index: {}]   ;;  %s5050_s12 = inlined_call_operand.vmem [shape: bf16[32,64], index: 12, kind: input, shape index: {}]   ;;  %s5051_s13 = inlined_call_operand.vmem [shape: f32[1,64], index: 13, kind: input, shape index: {}]   ;;  %s5052_s14 = inlined_call_operand.vmem [shape: bf16[64,32], index: 14, kind: input, shape index: {}]   ;;  %s5053_s15 = inlined_call_operand.vmem [shape: f32[1,32], index: 15, kind: input, shape index: {}]   ;;  %s5054_s16 = inlined_call_operand.vmem [shape: f32[1,32], index: 16, kind: input, shape index: {}]   ;;  %s5055_s17 = inlined_call_operand.vmem [shape: f32[1,32], index: 17, kind: input, shape index: {}]   ;;  %s5056_s18 = inlined_call_operand.vmem [shape: f32[1,32], index: 18, kind: input, shape index: {}]   ;;  %s5057_s19 = inlined_call_operand.vmem [shape: f32[1,32], index: 19, kind: input, shape index: {}]   ;;  %s5058_s20 = inlined_call_operand.vmem [shape: f32[1,32], index: 20, kind: input, shape index: {}]   ;;  %s5059_s21 = inlined_call_operand.vmem [shape: f32[1,32], index: 21, kind: input, shape index: {}]   ;;  %s5060_s22 = inlined_call_operand.vmem [shape: f32[1,32], index: 22, kind: input, shape index: {}]   ;;  %s5061_s23 = inlined_call_operand.vmem [shape: f32[1,32], index: 23, kind: input, shape index: {}]   ;;  %s5062_s24 = inlined_call_operand.vmem [shape: f32[2,8,32], index: 24, kind: output, shape index: {}]  }
   0x1   :  { %5091 = sst [smem:[#allocation2_spill]] %s5038_s0 }
   0x2   :  { %5092 = sst [smem:[#allocation3_spill]] %s5039_s1 }
   0x3   :  { %5093 = sst [smem:[#allocation4_spill]] %s5040_s2 }
   0x4   :  { %5094 = sst [smem:[#allocation5_spill]] %s5041_s3 }
   0x5   :  { %5095 = sst [smem:[#allocation6_spill]] %s5042_s4 }
   0x6   :  { %5096 = sst [smem:[#allocation7_spill]] %s5043_s5  ;;  %s4369_s5 = smov 0  }
   0x7   :  { %5097 = sst [smem:[#allocation8_spill]] %s5044_s6 }
   0x8   :  { %5098 = sst [smem:[#allocation9_spill]] %s5045_s7 }
   0x9   :  { %5099 = sst [smem:[#allocation10_spill]] %s5046_s8 }
   0xa   :  { %5100 = sst [smem:[#allocation11_spill]] %s5047_s9 }
   0xb   :  { %5101 = sst [smem:[#allocation12_spill]] %s5048_s10 }
   0xc   :  { %5102 = sst [smem:[#allocation13_spill]] %s5049_s11 }
   0xd   :  { %5103 = sst [smem:[#allocation14_spill]] %s5054_s16 }
   0xe LB: > { %s3602_s26 = sadd.s32 4294967295, %s4226_s5   ;;  %p3606_p0 = scmp.ge.s32.totalorder %s4226_s5, 1  ;;  %s4226_s5 = sphi %s4369_s5, %s34_s5  }
   0xf   : > { %p688_p1 = scmp.lt.s32.totalorder %s4226_s5, 3 }
  0x11   : > { %p689_p2 = pnand %p3606_p0, %p688_p1 }
  0x12   : > { %s5104_s6 = sld [smem:[#allocation6_spill]] (!%p689_p2)  ;;  %v4228_v1 = vmov (!%p689_p2), 0.0   ;;  %vm4229_vm0 = vmmov (!%p689_p2), 0   ;;  %p764_p3 = scmp.lt.s32.totalorder (!%p689_p2), %s3602_s26, 1  ;;  %vm856_vm1 = vcmask (!%p689_p2), 261120   ;;  %vm966_vm2 = vcmask (!%p689_p2), 64512  }
  0x13   : > { %692 = sbr.rel (%p689_p2) target bundleno = 8948 (0x22f4), region = 116  ;;  %3802 = vmatprep.subr.bf16.mxu1 (!%p689_p2), %v4228_v1  ;;  %3794 = vmatprep.subr.bf16.mxu0 (!%p689_p2), %v4228_v1  ;;  %s5105_s30 = sld [smem:[#allocation10_spill]] (!%p689_p2)  ;;  %vm1032_vm3 = vcmask (!%p689_p2), 1043456   ;;  %vm1425_vm4 = vcmask (!%p689_p2), 130048   ;;  %vm1427_vm5 = vcmask (!%p689_p2), 195584   ;;  %vm2214_vm6 = vcmask (!%p689_p2), 523264  }
  0x14   : > { %3806 = vmatprep.mubr.msk.bf16.mxu1 (!%p689_p2), %vm4229_vm0, %v4228_v1  ;;  %3798 = vmatprep.mubr.msk.bf16.mxu0 (!%p689_p2), %vm4229_vm0, %v4228_v1  ;;  %s5089_s8 = smov (!%p689_p2), 96   ;;  %s5106_s28 = sld [smem:[#allocation2_spill]] (!%p689_p2) }
  0x15   : > { %s5107_s0 = sld [smem:[#allocation3_spill]] (!%p689_p2)  ;;  %s5108_s1 = sld [smem:[#allocation7_spill]] (!%p689_p2) }
  0x16   : > { %s5085_s27 = smov (!%p689_p2), 120   ;;  %s5067_s29 = smov (!%p689_p2), 80  }
  0x17   : > { %s5109_s25 = sld [smem:[#allocation4_spill]] (!%p689_p2)  ;;  %s5073_s3 = smov (!%p689_p2), 64  }
  0x18   : > { %v4122_v0 = vld [vmem:[%s5104_s6] sm:$0xff] (!%p689_p2)   ;;  %v4123_v2 = vld [vmem:[%s5104_s6 + $0x8] sm:$0xff] (!%p689_p2)   ;;  %s5112_s9 = sld [smem:[#allocation11_spill]] (!%p689_p2)  ;;  %s5114_s16 = sld [smem:[#allocation14_spill]] (!%p689_p2) }
  0x19   : > { %3803 = vmatpush3.bf16.msra.mxu1 (!%p689_p2), %v4122_v0  ;;  %v4391_v3 = vld [vmem:[%s5105_s30] sm:$0xff] (!%p689_p2)   ;;  %v4398_v4 = vld [vmem:[%s5105_s30 + $0x8] sm:$0xff] (!%p689_p2)   ;;  %s5120_s10 = sld [smem:[#allocation12_spill]] (!%p689_p2)  ;;  %s5123_s11 = sld [smem:[#allocation13_spill]] (!%p689_p2) }
  0x1a   : > { %3804 = vmatprep.subr.bf16.mxu1 %v4228_v1  ;;  %s5132_s26 = smov (!%p764_p3, %s3602_s26), 1  ;;  %847 = vrot.lane.b32.xlu0 %v4391_v3, %s5089_s8 }
  0x1b   : > { %s4402_s4 = sshll.u32 %s5132_s26, 3  ;;  %v3616_v11 = vld [vmem:[%s5108_s1] ss:$0 sm:$0xff]  ;;  %s5077_s26 = smov 104  }
  0x1c   : > { %s767_s2 = scalar_lea.vmem %s5106_s28, %s4402_s4  ;;  %s771_s7 = scalar_lea.vmem %s5107_s0, %s4402_s4 }
  0x1d   : > { %3805 = vmatpush3.bf16.msra.mxu1 %v4123_v2  ;;  %v4409_v5 = vld [vmem:[%s767_s2] sm:$0xff]  ;;  %s5087_s28 = smov 112   ;;  %s5075_s2 = smov 88  }
  0x1e   : > { %3816 = vmatprep.subr.bf16.mxu1 %v4228_v1  ;;  %v900_v6 = vpack.c.bf16 %v4409_v5, %v4409_v5  ;;  %849 = vrot.lane.b32.xlu0 %v4398_v4, %s5089_s8  ;;  %v786_v8 = vld [vmem:[%s771_s7] sm:$0xff]  ;;  %s5069_s0 = smov 72   ;;  %s5074_s7 = smov 56  }
  0x1f   : > { %v831_v10 = vpack.c.bf16 %v786_v8, %v786_v8 }
  0x20   : > { %3807 = vmatmul.mubr.msk.bf16.vlgmr.msra.gmra.mrb[0].mxu1 %vm856_vm1, %v900_v6 }
  0x21   : > { %3818 = vmatprep.mubr.msk.bf16.mxu1 %vm4229_vm0, %v4228_v1 }
  0x8c   : > { %v848_v7 = vpop.permute.xlu0 %847 }
  0x8d   : > { %3795 = vmatpush3.bf16.msra.mxu0 %v848_v7 }
  0x8e   : > { %3796 = vmatprep.subr.bf16.mxu0 %v4228_v1 }
  0x90   : > { %v850_v9 = vpop.permute.xlu0 %849 }
  0x91   : > { %3797 = vmatpush3.bf16.msra.mxu0 %v850_v9 }
  0x92   : > { %3810 = vmatprep.subr.bf16.mxu0 %v4228_v1 }
  0x94   : > { %3799 = vmatmul.mubr.msk.bf16.vlgmr.msra.gmra.mrb[0].mxu0 %vm856_vm1, %v831_v10 }
  0x95   : > { %3812 = vmatprep.mubr.msk.bf16.mxu0 %vm4229_vm0, %v4228_v1 }
  0xf3   : > { %v956_v12 = vpop.f32.mrb[0].mxu1 }
  0xf4   : > { %v957_v13 = vadd.f32 %v3616_v11, %v956_v12  ;;  %v3808_v14 = vpop.f32.mrb[1].mxu1 }
  0xf5   : > { %v959_v15 = vpop.f32.mrb[2].mxu1 }
  0xf6   : > { %v4430_v16 = vpack.c.bf16 %v957_v13, %v957_v13  ;;  %v3809_v17 = vpop.f32.mrb[3].mxu1 }
  0xf8   : > { %1076 = vrot.lane.b32.xlu0 %v4430_v16, %s5085_s27  ;;  %964 = vrot.lane.b32.xlu1 %v4430_v16, %s5089_s8 }
  0xfc   : > { %1188 = vrot.lane.b32.xlu0 %v4430_v16, %s5087_s28  ;;  %1078 = vrot.lane.b32.xlu1 %v4430_v16, %s5075_s2  ;;  %s5117_s2 = smov 72  }
 0x100   : > { %1300 = vrot.lane.b32.xlu0 %v4430_v16, %s5077_s26  ;;  %1190 = vrot.lane.b32.xlu1 %v4430_v16, %s5067_s29  ;;  %s4473_s29 = scalar_lea.vmem %s5109_s25, %s4402_s4  ;;  %s5072_s25 = smov 40  }
 0x101   : > { %v4476_v34 = vld [vmem:[%s4473_s29] sm:$0xff]  ;;  %s5115_s26 = sld [smem:[#allocation5_spill]] }
 0x104   : > { %1302 = vrot.lane.b32.xlu1 %v4430_v16, %s5069_s0  ;;  %s5071_s0 = smov 48  }
 0x167   : > { %v4446_v18 = vpop.f32.mrb[0].mxu0 }
 0x168   : > { %v3800_v19 = vpop.f32.mrb[1].mxu0 }
 0x169   : > { %v897_v20 = vpop.f32.mrb[2].mxu0 }
 0x16a   : > { %v965_v21 = vpop.permute.xlu1 %964  ;;  %v3801_v23 = vpop.f32.mrb[3].mxu0 }
 0x16b   : > { %v971_v22 = vsel %vm966_vm2, %v965_v21, 0  ;;  %v1077_v27 = vpop.permute.xlu0 %1076 }
 0x16c   : > { %3811 = vmatpush3.bf16.xpose.msra.mxu0 %v971_v22 }
 0x16d   : > { %3822 = vmatprep.subr.bf16.mxu0 %v4228_v1 }
 0x16e   : > { %v1079_v24 = vpop.permute.xlu1 %1078 }
 0x16f   : > { %v1084_v25 = vsel %vm966_vm2, %v1079_v24, 0  ;;  %v1189_v30 = vpop.permute.xlu0 %1188 }
 0x172   : > { %v1191_v26 = vpop.permute.xlu1 %1190 }
 0x173   : > { %3813 = vmatmul.mubr.msk.bf16.vlgmr.msra.gmra.mrb[4].mxu0 %vm966_vm2, %v4430_v16  ;;  %v1196_v28 = vsel %vm966_vm2, %v1191_v26, 0  ;;  %v1301_v32 = vpop.permute.xlu0 %1300 }
 0x174   : > { %3823 = vmatpush3.bf16.xpose.msra.mxu0 %v1084_v25  ;;  %3824 = vmatprep.mubr.msk.bf16.mxu0 %vm4229_vm0, %v4228_v1 }
 0x175   : > { %3834 = vmatprep.subr.bf16.mxu0 %v4228_v1 }
 0x176   : > { %v1303_v29 = vpop.permute.xlu1 %1302 }
 0x177   : > { %v1308_v31 = vsel %vm966_vm2, %v1303_v29, 0 }
 0x17b   : > { %3825 = vmatmul.mubr.msk.bf16.vlgmr.msra.gmra.mrb[8].mxu0 %vm966_vm2, %v1077_v27 }
 0x17c   : > { %3835 = vmatpush3.bf16.xpose.msra.mxu0 %v1196_v28  ;;  %3836 = vmatprep.mubr.msk.bf16.mxu0 %vm4229_vm0, %v4228_v1 }
 0x17d   : > { %3846 = vmatprep.subr.bf16.mxu0 %v4228_v1 }
 0x183   : > { %3837 = vmatmul.mubr.msk.bf16.vlgmr.msra.gmra.mrb[12].mxu0 %vm966_vm2, %v1189_v30 }
 0x184   : > { %3847 = vmatpush3.bf16.xpose.msra.mxu0 %v1308_v31  ;;  %3848 = vmatprep.mubr.msk.bf16.mxu0 %vm4229_vm0, %v4228_v1 }
 0x185   : > { %3858 = vmatprep.subr.bf16.mxu0 %v4228_v1 }
 0x18b   : > { %3849 = vmatmul.mubr.msk.bf16.vlgmr.msra.gmra.mrb[16].mxu0 %vm966_vm2, %v1301_v32 }
 0x18c   : > { %3862 = vmatprep.mubr.msk.bf16.mxu0 %vm4229_vm0, %v4228_v1 }
 0x246   : > { %v1007_v33 = vpop.f32.mrb[4].mxu0 }
 0x247   : > { %v1013_v35 = vmul.f32 0.35355338, %v1007_v33  ;;  %v3814_v36 = vpop.f32.mrb[5].mxu0 }
 0x248   : > { %v1010_v37 = vpop.f32.mrb[6].mxu0 }
 0x249   : > { %v3815_v38 = vpop.f32.mrb[7].mxu0  ;;  %v1014_v39 = vadd.f32 %v1013_v35, %v4476_v34 }
 0x24b   : > { %v1015_v40 = vsel %vm966_vm2, %v1014_v39, -inf }
 0x24c   : > { %1016 = vmax.xlane.f32.xlu1 %v1015_v40 }
 0x24e   : > { %v1120_v41 = vpop.f32.mrb[8].mxu0 }
 0x24f   : > { %v1126_v42 = vmul.f32 0.35355338, %v1120_v41  ;;  %v3826_v43 = vpop.f32.mrb[9].mxu0 }
 0x250   : > { %v1123_v44 = vpop.f32.mrb[10].mxu0 }
 0x251   : > { %v3827_v45 = vpop.f32.mrb[11].mxu0  ;;  %v1127_v46 = vadd.f32 %v1126_v42, %v4476_v34 }
 0x253   : > { %v1128_v47 = vsel %vm966_vm2, %v1127_v46, -inf }
 0x254   : > { %1129 = vmax.xlane.f32.xlu0 %v1128_v47 }
 0x256   : > { %v1232_v48 = vpop.f32.mrb[12].mxu0 }
 0x257   : > { %v1238_v49 = vmul.f32 0.35355338, %v1232_v48  ;;  %v3838_v50 = vpop.f32.mrb[13].mxu0 }
 0x258   : > { %v1235_v51 = vpop.f32.mrb[14].mxu0 }
 0x259   : > { %v3839_v52 = vpop.f32.mrb[15].mxu0  ;;  %v1239_v53 = vadd.f32 %v1238_v49, %v4476_v34 }
 0x25b   : > { %v1240_v54 = vsel %vm966_vm2, %v1239_v53, -inf }
 0x25c   : > { %1241 = vmax.xlane.f32.xlu0 %v1240_v54 }
 0x25e   : > { %v1344_v55 = vpop.f32.mrb[16].mxu0 }
 0x25f   : > { %v1350_v56 = vmul.f32 0.35355338, %v1344_v55  ;;  %v3850_v57 = vpop.f32.mrb[17].mxu0 }
 0x260   : > { %v1347_v58 = vpop.f32.mrb[18].mxu0 }
 0x261   : > { %v3851_v59 = vpop.f32.mrb[19].mxu0  ;;  %v1351_v60 = vadd.f32 %v1350_v56, %v4476_v34 }
 0x263   : > { %v1352_v61 = vsel %vm966_vm2, %v1351_v60, -inf }
 0x264   : > { %1353 = vmax.xlane.f32.xlu1 %v1352_v61 }
 0x2d9   : > { %v1017_v62 = vpop.xlane.xlu1 %1016 }
 0x2da   : > { %v1018_v63 = vsub.f32 %v1014_v39, %v1017_v62 }
 0x2dc   : > { %v1019_v0 = vmul.f32 1.442695, %v1018_v63 }
 0x2de   : > { %4136 = vpow2.f32 %v1019_v0 }
 0x2e1   : > { %v1130_v2 = vpop.xlane.xlu0 %1129 }
 0x2e2   : > { %v1131_v6 = vsub.f32 %v1127_v46, %v1130_v2 }
 0x2e4   : > { %v1132_v7 = vmul.f32 1.442695, %v1131_v6 }
 0x2e6   : > { %4138 = vpow2.f32 %v1132_v7 }
 0x2e8   : > { %v4137_v8 = vpop.eup %4136 }
 0x2e9   : > { %v1242_v9 = vpop.xlane.xlu0 %1241  ;;  %v1021_v10 = vsel %vm966_vm2, %v4137_v8, 0.0 }
 0x2ea   : > { %v1243_v11 = vsub.f32 %v1239_v53, %v1242_v9  ;;  %1022 = vadd.xlane.f32.xlu0 %v1021_v10 }
 0x2ec   : > { %v1244_v12 = vmul.f32 1.442695, %v1243_v11 }
 0x2ee   : > { %4140 = vpow2.f32 %v1244_v12 }
 0x2f0   : > { %v4139_v13 = vpop.eup %4138 }
 0x2f1   : > { %v1134_v14 = vsel %vm966_vm2, %v4139_v13, 0.0  ;;  %v1354_v19 = vpop.xlane.xlu1 %1353 }
 0x2f2   : > { %1135 = vadd.xlane.f32.xlu1 %v1134_v14  ;;  %v1355_v20 = vsub.f32 %v1351_v60, %v1354_v19 }
 0x2f4   : > { %v1356_v21 = vmul.f32 1.442695, %v1355_v20 }
 0x2f6   : > { %4142 = vpow2.f32 %v1356_v21  ;;  %v4556_v21 = vld [vmem:[%s5112_s9] ss:$0 sm:$0xff]  ;;  %s5121_s9 = smov 16  }
 0x2f8   : > { %v4141_v15 = vpop.eup %4140 }
 0x2f9   : > { %v1246_v17 = vsel %vm966_vm2, %v4141_v15, 0.0 }
 0x2fa   : > { %1247 = vadd.xlane.f32.xlu0 %v1246_v17 }
 0x300   : > { %v4143_v22 = vpop.eup %4142 }
 0x301   : > { %v1358_v23 = vsel %vm966_vm2, %v4143_v22, 0.0 }
 0x303   : > { %1140 = vrot.lane.b32.xlu1 %v4430_v16, %s5074_s7  ;;  %s5110_s7 = sld [smem:[#allocation8_spill]] }
 0x309   : > { %v4526_v55 = vld [vmem:[%s5110_s7] sm:$0xff]  }
 0x30a   : > { %3859 = vmatpush3.bf16.msra.mxu0 %v4526_v55 }
 0x30b   : > { %3860 = vmatprep.subr.bf16.mxu0 %v4228_v1 }
 0x310   : > { %1027 = vrot.lane.b32.xlu0 %v4430_v16, %s5073_s3  ;;  %s5081_s3 = smov 24  }
 0x314   : > { %1364 = vrot.lane.b32.xlu0 %v4430_v16, %s5072_s25  ;;  %s5111_s25 = sld [smem:[#allocation9_spill]] }
 0x31a   : > { %v4548_v11 = vld [vmem:[%s5111_s25] ss:$0 sm:$0xff]  ;;  %s779_s25 = scalar_lea.vmem %s5115_s26, %s4402_s4  ;;  %s5118_s26 = smov 80  }
 0x327   : > { %1359 = vadd.xlane.f32.xlu1 %v1358_v23 }
 0x338   : > { %1252 = vrot.lane.b32.xlu1 %v4430_v16, %s5071_s0  ;;  %s5079_s0 = smov 8  }
 0x377   : > { %v1023_v24 = vpop.xlane.xlu0 %1022 }
 0x378   : > { %4144 = vrcp.f32 %v1023_v24 }
 0x37f   : > { %v1136_v25 = vpop.xlane.xlu1 %1135 }
 0x380   : > { %4146 = vrcp.f32 %v1136_v25 }
 0x382   : > { %v4145_v26 = vpop.eup %4144 }
 0x383   : > { %v1025_v28 = vmul.f32 %v4145_v26, %v4137_v8  ;;  %v1141_v31 = vpop.permute.xlu1 %1140 }
 0x384   : > { %v1146_v35 = vsel %vm1032_vm3, %v1141_v31, 0 }
 0x385   : > { %v1026_v32 = vpack.c.bf16 %v1025_v28, %v1025_v28 }
 0x387   : > { %v1248_v27 = vpop.xlane.xlu0 %1247 }
 0x388   : > { %4148 = vrcp.f32 %v1248_v27 }
 0x38a   : > { %v4147_v33 = vpop.eup %4146 }
 0x38b   : > { %v1028_v29 = vpop.permute.xlu0 %1027  ;;  %v1138_v16 = vmul.f32 %v4147_v33, %v4139_v13  ;;  %v4579_v33 = vld [vmem:[%s5114_s16] ss:$0 sm:$0xff] }
 0x38c   : > { %v1034_v30 = vsel %vm1032_vm3, %v1028_v29, 0 }
 0x38d   : > { %3817 = vmatpush3.bf16.msra.mxu1 %v1034_v30  ;;  %v1139_v36 = vpack.c.bf16 %v1138_v16, %v1138_v16  ;;  %v4584_v16 = vld [vmem:[%s5055_s17] ss:$0 sm:$0xff] }
 0x38e   : > { %3828 = vmatprep.subr.bf16.mxu1 %v4228_v1 }
 0x38f   : > { %v1365_v42 = vpop.permute.xlu0 %1364 }
 0x390   : > { %3819 = vmatmul.mubr.msk.bf16.vlgmr.msra.gmra.mrb[4].mxu1 %vm966_vm2, %v1026_v32  ;;  %v1370_v44 = vsel %vm1032_vm3, %v1365_v42, 0 }
 0x391   : > { %3829 = vmatpush3.bf16.msra.mxu1 %v1146_v35  ;;  %3830 = vmatprep.mubr.msk.bf16.mxu1 %vm4229_vm0, %v4228_v1 }
 0x392   : > { %3840 = vmatprep.subr.bf16.mxu1 %v4228_v1  ;;  %v4149_v37 = vpop.eup %4148 }
 0x393   : > { %v1250_v39 = vmul.f32 %v4149_v37, %v4141_v15 }
 0x395   : > { %v1251_v43 = vpack.c.bf16 %v1250_v39, %v1250_v39 }
 0x398   : > { %3831 = vmatmul.mubr.msk.bf16.vlgmr.msra.gmra.mrb[8].mxu1 %vm966_vm2, %v1139_v36 }
 0x399   : > { %3842 = vmatprep.mubr.msk.bf16.mxu1 %vm4229_vm0, %v4228_v1 }
 0x3b4   : > { %v1360_v38 = vpop.xlane.xlu1 %1359 }
 0x3b5   : > { %4150 = vrcp.f32 %v1360_v38 }
 0x3b8   : > { %v1253_v40 = vpop.permute.xlu1 %1252 }
 0x3b9   : > { %v1258_v41 = vsel %vm1032_vm3, %v1253_v40, 0 }
 0x3ba   : > { %3841 = vmatpush3.bf16.msra.mxu1 %v1258_v41 }
 0x3bb   : > { %3852 = vmatprep.subr.bf16.mxu1 %v4228_v1 }
 0x3bd   : > { %3843 = vmatmul.mubr.msk.bf16.vlgmr.msra.gmra.mrb[12].mxu1 %vm966_vm2, %v1251_v43 }
 0x3be   : > { %3853 = vmatpush3.bf16.msra.mxu1 %v1370_v44  ;;  %3854 = vmatprep.mubr.msk.bf16.mxu1 %vm4229_vm0, %v4228_v1 }
 0x3bf   : > { %v4151_v45 = vpop.eup %4150  ;;  %3866 = vmatprep.subr.bf16.mxu1 %v4228_v1 }
 0x3c0   : > { %v1362_v46 = vmul.f32 %v4151_v45, %v4143_v22 }
 0x3c2   : > { %v1363_v47 = vpack.c.bf16 %v1362_v46, %v1362_v46 }
 0x3c5   : > { %3855 = vmatmul.mubr.msk.bf16.vlgmr.msra.gmra.mrb[16].mxu1 %vm966_vm2, %v1363_v47 }
 0x3c6   : > { %3867 = vmatpush3.bf16.msra.mxu1 %v4391_v3  ;;  %3870 = vmatprep.mubr.msk.bf16.mxu1 %vm4229_vm0, %v4228_v1 }
 0x3c7   : > { %3868 = vmatprep.subr.bf16.mxu1 %v4228_v1 }
 0x3ca   : > { %3869 = vmatpush3.bf16.msra.mxu1 %v4398_v4  ;;  %v4533_v4 = vld [vmem:[%s5110_s7 + $0x8] sm:$0xff]   ;;  %s5124_s7 = smov 96  }
 0x3cb   : > { %3880 = vmatprep.subr.bf16.mxu1 %v4228_v1  ;;  %3861 = vmatpush3.bf16.msra.mxu0 %v4533_v4 }
 0x3cc   : > { %3874 = vmatprep.subr.bf16.mxu0 %v4228_v1 }
 0x463   : > { %v1070_v48 = vpop.f32.mrb[4].mxu1 }
 0x464   : > { %v3820_v49 = vpop.f32.mrb[5].mxu1 }
 0x465   : > { %v1073_v50 = vpop.f32.mrb[6].mxu1 }
 0x466   : > { %v3821_v51 = vpop.f32.mrb[7].mxu1 }
 0x46b   : > { %v1182_v52 = vpop.f32.mrb[8].mxu1 }
 0x46c   : > { %1413 = vrot.lane.b32.xlu1 %v1182_v52, %s5079_s0  ;;  %v3832_v53 = vpop.f32.mrb[9].mxu1  ;;  %s5083_s0 = smov 16  }
 0x46d   : > { %v1185_v54 = vpop.f32.mrb[10].mxu1 }
 0x46e   : > { %v3833_v3 = vpop.f32.mrb[11].mxu1 }
 0x46f   : > { %v4630_v3 = vld [vmem:[%s779_s25] sm:$0xff]  ;;  %s5119_s25 = smov 8  }
 0x490   : > { %v1294_v56 = vpop.f32.mrb[12].mxu1 }
 0x491   : > { %1417 = vrot.lane.b32.xlu0 %v1294_v56, %s5083_s0  ;;  %v3844_v57 = vpop.f32.mrb[13].mxu1  ;;  %s5113_s0 = smov 104  }
 0x492   : > { %v1297_v58 = vpop.f32.mrb[14].mxu1 }
 0x493   : > { %v3845_v59 = vpop.f32.mrb[15].mxu1 }
 0x498   : > { %v1406_v60 = vpop.f32.mrb[16].mxu1 }
 0x499   : > { %1421 = vrot.lane.b32.xlu1 %v1406_v60, %s5081_s3  ;;  %v3856_v61 = vpop.f32.mrb[17].mxu1  ;;  %s5116_s3 = smov 88  }
 0x49a   : > { %v1409_v62 = vpop.f32.mrb[18].mxu1 }
 0x49b   : > { %v3857_v63 = vpop.f32.mrb[19].mxu1 }
 0x4de   : > { %v1414_v0 = vpop.permute.xlu1 %1413 }
 0x4df   : > { %v1424_v6 = vsel %vm966_vm2, %v1070_v48, %v1414_v0 }
 0x503   : > { %v1418_v2 = vpop.permute.xlu0 %1417 }
 0x504   : > { %v1426_v7 = vsel %vm1425_vm4, %v1424_v6, %v1418_v2 }
 0x50b   : > { %v1422_v8 = vpop.permute.xlu1 %1421 }
 0x50c   : > { %v1428_v9 = vsel %vm1427_vm5, %v1426_v7, %v1422_v8 }
 0x50d   : > { %v1429_v10 = vpack.c.bf16 %v1428_v9, %v1428_v9 }
 0x50f   : > { %3863 = vmatmul.mubr.msk.bf16.vlgmr.msra.gmra.mrb[20].mxu0 %vm856_vm1, %v1429_v10 }
 0x510   : > { %3876 = vmatprep.mubr.msk.bf16.mxu0 %vm4229_vm0, %v4228_v1 }
 0x5e2   : > { %v1485_v12 = vpop.f32.mrb[20].mxu0 }
 0x5e3   : > { %v1486_v13 = vadd.f32 %v4548_v11, %v1485_v12  ;;  %v3864_v14 = vpop.f32.mrb[21].mxu0 }
 0x5e4   : > { %v1488_v15 = vpop.f32.mrb[22].mxu0 }
 0x5e5   : > { %v3865_v17 = vpop.f32.mrb[23].mxu0  ;;  %v1491_v19 = vadd.f32 %v1486_v13, %v4409_v5 }
 0x5e7   : > { %v1492_v20 = vsel %vm856_vm1, %v1491_v19, 0.0 }
 0x5e8   : > { %1493 = vadd.xlane.f32.xlu0 %v1492_v20 }
 0x5fe   : > { %853 = vrot.lane.b32.xlu0 %v4556_v21, %s5089_s8 }
 0x675   : > { %v1494_v22 = vpop.xlane.xlu0 %1493 }
 0x676   : > { %v1496_v23 = vmul.f32 0.03125, %v1494_v22 }
 0x678   : > { %v1497_v24 = vsub.f32 %v1491_v19, %v1496_v23 }
 0x679   : > { %v854_v25 = vpop.permute.xlu0 %853 }
 0x67a   : > { %v895_v26 = vadd.f32 %v4446_v18, %v854_v25  ;;  %v1498_v27 = vmul.f32 %v1497_v24, %v1497_v24 }
 0x67c   : > { %v4561_v28 = vpack.c.bf16 %v895_v26, %v895_v26  ;;  %v1499_v5 = vsel %vm856_vm1, %v1498_v27, 0.0 }
 0x67d   : > { %1500 = vadd.xlane.f32.xlu1 %v1499_v5 }
 0x67e   : > { %v4566_v29 = vsel %vm966_vm2, %v4561_v28, 0 }
 0x67f   : > { %3875 = vmatpush3.bf16.xpose.msra.mxu0 %v4566_v29 }
 0x680   : > { %3886 = vmatprep.subr.bf16.mxu0 %v4228_v1 }
 0x68e   : > { %1681 = vrot.lane.b32.xlu1 %v4561_v28, %s5085_s27 }
 0x692   : > { %1793 = vrot.lane.b32.xlu1 %v4561_v28, %s5087_s28 }
 0x696   : > { %1905 = vrot.lane.b32.xlu1 %v4561_v28, %s5113_s0 }
 0x70a   : > { %v1501_v18 = vpop.xlane.xlu1 %1500 }
 0x70b   : > { %v1502_v30 = vmul.f32 0.03125, %v1501_v18 }
 0x70d   : > { %v1503_v31 = vadd.f32 1e-05, %v1502_v30 }
 0x70e   : > { %v1682_v42 = vpop.permute.xlu1 %1681 }
 0x70f   : > { %4152 = vrsqrt.f32 %v1503_v31  ;;  %v4597_v46 = vsel %vm966_vm2, %v1682_v42, 0 }
 0x712   : > { %v1794_v47 = vpop.permute.xlu1 %1793 }
 0x713   : > { %v4608_v49 = vsel %vm966_vm2, %v1794_v47, 0 }
 0x716   : > { %v1906_v50 = vpop.permute.xlu1 %1905 }
 0x717   : > { %v4616_v52 = vsel %vm966_vm2, %v1906_v50, 0 }
 0x719   : > { %v4153_v32 = vpop.eup %4152 }
 0x71a   : > { %v1505_v35 = vmul.f32 %v4153_v32, %v1497_v24 }
 0x71c   : > { %v1512_v36 = vmul.f32 %v4579_v33, %v1505_v35 }
 0x71e   : > { %v4588_v37 = vadd.f32 %v4584_v16, %v1512_v36 }
 0x720   : > { %v1520_v38 = vpack.c.bf16 %v4588_v37, %v4588_v37 }
 0x722   : > { %3871 = vmatmul.mubr.msk.bf16.vlgmr.msra.gmra.mrb[20].mxu1 %vm856_vm1, %v1520_v38 }
 0x723   : > { %3882 = vmatprep.mubr.msk.bf16.mxu1 %vm4229_vm0, %v4228_v1 }
 0x7f5   : > { %v1561_v39 = vpop.f32.mrb[20].mxu1 }
 0x7f6   : > { %v1562_v40 = vadd.f32 %v4556_v21, %v1561_v39  ;;  %v3872_v41 = vpop.f32.mrb[21].mxu1 }
 0x7f7   : > { %v1564_v43 = vpop.f32.mrb[22].mxu1 }
 0x7f8   : > { %v1567_v44 = vpack.c.bf16 %v1562_v40, %v1562_v40  ;;  %v3873_v45 = vpop.f32.mrb[23].mxu1 }
 0x7fa   : > { %1679 = vrot.lane.b32.xlu0 %v1567_v44, %s5085_s27  ;;  %3877 = vmatmul.mubr.msk.bf16.vlgmr.msra.gmra.mrb[24].mxu0 %vm966_vm2, %v1567_v44  ;;  %s5122_s27 = smov 24  }
 0x7fb   : > { %3887 = vmatpush3.bf16.xpose.msra.mxu0 %v4597_v46  ;;  %3888 = vmatprep.mubr.msk.bf16.mxu0 %vm4229_vm0, %v4228_v1 }
 0x7fc   : > { %3898 = vmatprep.subr.bf16.mxu0 %v4228_v1 }
 0x7fe   : > { %1791 = vrot.lane.b32.xlu0 %v1567_v44, %s5087_s28 }
 0x802   : > { %1903 = vrot.lane.b32.xlu0 %v1567_v44, %s5113_s0 }
 0x86c   : > { %v1680_v48 = vpop.permute.xlu0 %1679 }
 0x86d   : > { %3889 = vmatmul.mubr.msk.bf16.vlgmr.msra.gmra.mrb[28].mxu0 %vm966_vm2, %v1680_v48 }
 0x86e   : > { %3899 = vmatpush3.bf16.xpose.msra.mxu0 %v4608_v49  ;;  %3900 = vmatprep.mubr.msk.bf16.mxu0 %vm4229_vm0, %v4228_v1 }
 0x86f   : > { %3910 = vmatprep.subr.bf16.mxu0 %v4228_v1 }
 0x870   : > { %v1792_v51 = vpop.permute.xlu0 %1791 }
 0x874   : > { %v1904_v53 = vpop.permute.xlu0 %1903 }
 0x875   : > { %3901 = vmatmul.mubr.msk.bf16.vlgmr.msra.gmra.mrb[32].mxu0 %vm966_vm2, %v1792_v51 }
 0x876   : > { %3911 = vmatpush3.bf16.xpose.msra.mxu0 %v4616_v52  ;;  %3912 = vmatprep.mubr.msk.bf16.mxu0 %vm4229_vm0, %v4228_v1 }
 0x877   : > { %3922 = vmatprep.subr.bf16.mxu0 %v4228_v1 }
 0x87d   : > { %3913 = vmatmul.mubr.msk.bf16.vlgmr.msra.gmra.mrb[36].mxu0 %vm966_vm2, %v1904_v53 }
 0x87e   : > { %3926 = vmatprep.mubr.msk.bf16.mxu0 %vm4229_vm0, %v4228_v1 }
 0x8cd   : > { %v1609_v54 = vpop.f32.mrb[24].mxu0 }
 0x8ce   : > { %v1615_v56 = vmul.f32 0.35355338, %v1609_v54  ;;  %v3878_v57 = vpop.f32.mrb[25].mxu0 }
 0x8cf   : > { %v1612_v58 = vpop.f32.mrb[26].mxu0 }
 0x8d0   : > { %v3879_v59 = vpop.f32.mrb[27].mxu0  ;;  %v1616_v60 = vadd.f32 %v1615_v56, %v4630_v3 }
 0x8d2   : > { %v1617_v61 = vsel %vm966_vm2, %v1616_v60, -inf }
 0x8d3   : > { %1618 = vmax.xlane.f32.xlu1 %v1617_v61 }
 0x940   : > { %v1723_v62 = vpop.f32.mrb[28].mxu0 }
 0x941   : > { %v1729_v63 = vmul.f32 0.35355338, %v1723_v62  ;;  %v3890_v0 = vpop.f32.mrb[29].mxu0 }
 0x942   : > { %v1726_v2 = vpop.f32.mrb[30].mxu0 }
 0x943   : > { %v3891_v6 = vpop.f32.mrb[31].mxu0  ;;  %v1730_v7 = vadd.f32 %v1729_v63, %v4630_v3 }
 0x945   : > { %v1731_v8 = vsel %vm966_vm2, %v1730_v7, -inf }
 0x946   : > { %1732 = vmax.xlane.f32.xlu0 %v1731_v8 }
 0x948   : > { %v1835_v9 = vpop.f32.mrb[32].mxu0 }
 0x949   : > { %v1841_v10 = vmul.f32 0.35355338, %v1835_v9  ;;  %v3902_v12 = vpop.f32.mrb[33].mxu0 }
 0x94a   : > { %v1838_v13 = vpop.f32.mrb[34].mxu0 }
 0x94b   : > { %v3903_v14 = vpop.f32.mrb[35].mxu0  ;;  %v1842_v15 = vadd.f32 %v1841_v10, %v4630_v3 }
 0x94d   : > { %v1843_v17 = vsel %vm966_vm2, %v1842_v15, -inf }
 0x94e   : > { %1844 = vmax.xlane.f32.xlu0 %v1843_v17 }
 0x950   : > { %v1947_v19 = vpop.f32.mrb[36].mxu0 }
 0x951   : > { %v1953_v20 = vmul.f32 0.35355338, %v1947_v19  ;;  %v3914_v22 = vpop.f32.mrb[37].mxu0 }
 0x952   : > { %v1950_v23 = vpop.f32.mrb[38].mxu0 }
 0x953   : > { %v3915_v24 = vpop.f32.mrb[39].mxu0  ;;  %v1954_v25 = vadd.f32 %v1953_v20, %v4630_v3 }
 0x955   : > { %v1955_v26 = vsel %vm966_vm2, %v1954_v25, -inf }
 0x956   : > { %1956 = vmax.xlane.f32.xlu1 %v1955_v26 }
 0x960   : > { %v1619_v27 = vpop.xlane.xlu1 %1618 }
 0x961   : > { %v1620_v5 = vsub.f32 %v1616_v60, %v1619_v27 }
 0x963   : > { %v1621_v18 = vmul.f32 1.442695, %v1620_v5 }
 0x965   : > { %4154 = vpow2.f32 %v1621_v18  ;;  %v4688_v18 = vld [vmem:[%s5120_s10] sm:$0xff]  }
 0x966   : > { %3923 = vmatpush3.bf16.msra.mxu0 %v4688_v18 }
 0x967   : > { %3924 = vmatprep.subr.bf16.mxu0 %v4228_v1 }
 0x96f   : > { %v4155_v30 = vpop.eup %4154 }
 0x970   : > { %v1623_v31 = vsel %vm966_vm2, %v4155_v30, 0.0 }
 0x971   : > { %1624 = vadd.xlane.f32.xlu0 %v1623_v31 }
 0x9d3   : > { %v1733_v32 = vpop.xlane.xlu0 %1732 }
 0x9d4   : > { %v1734_v35 = vsub.f32 %v1730_v7, %v1733_v32 }
 0x9d6   : > { %v1735_v36 = vmul.f32 1.442695, %v1734_v35 }
 0x9d8   : > { %4156 = vpow2.f32 %v1735_v36 }
 0x9db   : > { %v1845_v38 = vpop.xlane.xlu0 %1844 }
 0x9dc   : > { %v1846_v39 = vsub.f32 %v1842_v15, %v1845_v38 }
 0x9de   : > { %v1847_v40 = vmul.f32 1.442695, %v1846_v39 }
 0x9e0   : > { %4158 = vpow2.f32 %v1847_v40 }
 0x9e2   : > { %v4157_v41 = vpop.eup %4156 }
 0x9e3   : > { %v1737_v42 = vsel %vm966_vm2, %v4157_v41, 0.0  ;;  %v1957_v45 = vpop.xlane.xlu1 %1956 }
 0x9e4   : > { %1738 = vadd.xlane.f32.xlu1 %v1737_v42  ;;  %v1958_v47 = vsub.f32 %v1954_v25, %v1957_v45 }
 0x9e6   : > { %v1959_v48 = vmul.f32 1.442695, %v1958_v47 }
 0x9e8   : > { %4160 = vpow2.f32 %v1959_v48 }
 0x9ea   : > { %v4159_v43 = vpop.eup %4158 }
 0x9eb   : > { %v1849_v44 = vsel %vm966_vm2, %v4159_v43, 0.0 }
 0x9ec   : > { %1850 = vadd.xlane.f32.xlu0 %v1849_v44 }
 0x9f2   : > { %v4161_v50 = vpop.eup %4160 }
 0x9f3   : > { %v1961_v51 = vsel %vm966_vm2, %v4161_v50, 0.0 }
 0x9f5   : > { %1743 = vrot.lane.b32.xlu1 %v4561_v28, %s5116_s3 }
 0x9fe   : > { %v1625_v53 = vpop.xlane.xlu0 %1624 }
 0x9ff   : > { %4162 = vrcp.f32 %v1625_v53 }
 0xa02   : > { %1630 = vrot.lane.b32.xlu0 %v4561_v28, %s5089_s8  ;;  %s5125_s8 = smov 112  }
 0xa06   : > { %1967 = vrot.lane.b32.xlu0 %v4561_v28, %s5117_s2 }
 0xa09   : > { %v4163_v56 = vpop.eup %4162 }
 0xa0a   : > { %v1627_v58 = vmul.f32 %v4163_v56, %v4155_v30  ;;  %v4695_v30 = vld [vmem:[%s5120_s10 + $0x8] sm:$0xff]   ;;  %s5126_s10 = smov 120  }
 0xa0b   : > { %3925 = vmatpush3.bf16.msra.mxu0 %v4695_v30 }
 0xa0c   : > { %v1628_v62 = vpack.c.bf16 %v1627_v58, %v1627_v58  ;;  %3938 = vmatprep.subr.bf16.mxu0 %v4228_v1 }
 0xa19   : > { %1962 = vadd.xlane.f32.xlu1 %v1961_v51  ;;  %v4710_v51 = vld [vmem:[%s5123_s11] ss:$0 sm:$0xff] }
 0xa2a   : > { %1855 = vrot.lane.b32.xlu1 %v4561_v28, %s5118_s26 }
 0xa71   : > { %v1739_v54 = vpop.xlane.xlu1 %1738 }
 0xa72   : > { %4164 = vrcp.f32 %v1739_v54 }
 0xa75   : > { %v1744_v61 = vpop.permute.xlu1 %1743 }
 0xa76   : > { %v4658_v28 = vsel %vm1032_vm3, %v1744_v61, 0 }
 0xa79   : > { %v1851_v57 = vpop.xlane.xlu0 %1850 }
 0xa7a   : > { %4166 = vrcp.f32 %v1851_v57 }
 0xa7c   : > { %v4165_v63 = vpop.eup %4164 }
 0xa7d   : > { %v1631_v59 = vpop.permute.xlu0 %1630  ;;  %v1741_v0 = vmul.f32 %v4165_v63, %v4157_v41 }
 0xa7e   : > { %v4653_v60 = vsel %vm1032_vm3, %v1631_v59, 0 }
 0xa7f   : > { %3881 = vmatpush3.bf16.msra.mxu1 %v4653_v60  ;;  %v1742_v2 = vpack.c.bf16 %v1741_v0, %v1741_v0 }
 0xa80   : > { %3892 = vmatprep.subr.bf16.mxu1 %v4228_v1 }
 0xa81   : > { %v1968_v12 = vpop.permute.xlu0 %1967 }
 0xa82   : > { %3883 = vmatmul.mubr.msk.bf16.vlgmr.msra.gmra.mrb[24].mxu1 %vm966_vm2, %v1628_v62  ;;  %v4674_v14 = vsel %vm1032_vm3, %v1968_v12, 0 }
 0xa83   : > { %3893 = vmatpush3.bf16.msra.mxu1 %v4658_v28  ;;  %3894 = vmatprep.mubr.msk.bf16.mxu1 %vm4229_vm0, %v4228_v1 }
 0xa84   : > { %3904 = vmatprep.subr.bf16.mxu1 %v4228_v1  ;;  %v4167_v6 = vpop.eup %4166 }
 0xa85   : > { %v1853_v8 = vmul.f32 %v4167_v6, %v4159_v43 }
 0xa87   : > { %v1854_v13 = vpack.c.bf16 %v1853_v8, %v1853_v8  ;;  %v4733_v8 = vld [vmem:[%s5052_s14] sm:$0xff]  }
 0xa8a   : > { %3895 = vmatmul.mubr.msk.bf16.vlgmr.msra.gmra.mrb[28].mxu1 %vm966_vm2, %v1742_v2 }
 0xa8b   : > { %3906 = vmatprep.mubr.msk.bf16.mxu1 %vm4229_vm0, %v4228_v1 }
 0xaa6   : > { %v1963_v7 = vpop.xlane.xlu1 %1962 }
 0xaa7   : > { %4168 = vrcp.f32 %v1963_v7  ;;  %v4719_v7 = vld [vmem:[%s5050_s12] sm:$0xff]  }
 0xaaa   : > { %v1856_v9 = vpop.permute.xlu1 %1855 }
 0xaab   : > { %v4669_v10 = vsel %vm1032_vm3, %v1856_v9, 0  ;;  %v4739_v9 = vld [vmem:[%s5052_s14 + $0x8] sm:$0xff]  }
 0xaac   : > { %3905 = vmatpush3.bf16.msra.mxu1 %v4669_v10 }
 0xaad   : > { %3916 = vmatprep.subr.bf16.mxu1 %v4228_v1 }
 0xaaf   : > { %3907 = vmatmul.mubr.msk.bf16.vlgmr.msra.gmra.mrb[32].mxu1 %vm966_vm2, %v1854_v13 }
 0xab0   : > { %3917 = vmatpush3.bf16.msra.mxu1 %v4674_v14  ;;  %3918 = vmatprep.mubr.msk.bf16.mxu1 %vm4229_vm0, %v4228_v1 }
 0xab1   : > { %v4169_v15 = vpop.eup %4168  ;;  %3930 = vmatprep.subr.bf16.mxu1 %v4228_v1 }
 0xab2   : > { %v1965_v17 = vmul.f32 %v4169_v15, %v4161_v50 }
 0xab4   : > { %v1966_v19 = vpack.c.bf16 %v1965_v17, %v1965_v17 }
 0xab7   : > { %3919 = vmatmul.mubr.msk.bf16.vlgmr.msra.gmra.mrb[36].mxu1 %vm966_vm2, %v1966_v19  ;;  %v4747_v19 = vld [vmem:[%s5056_s18] ss:$0 sm:$0xff] }
 0xab8   : > { %3934 = vmatprep.mubr.msk.bf16.mxu1 %vm4229_vm0, %v4228_v1  ;;  %3931 = vmatpush3.bf16.msra.mxu1 %v4719_v7 }
 0xab9   : > { %3932 = vmatprep.subr.bf16.mxu1 %v4228_v1 }
 0xb55   : > { %v1672_v20 = vpop.f32.mrb[24].mxu1 }
 0xb56   : > { %v3884_v22 = vpop.f32.mrb[25].mxu1 }
 0xb57   : > { %v1675_v23 = vpop.f32.mrb[26].mxu1  ;;  %v4752_v22 = vld [vmem:[%s5057_s19] ss:$0 sm:$0xff] }
 0xb58   : > { %v3885_v24 = vpop.f32.mrb[27].mxu1 }
 0xb5d   : > { %v1785_v25 = vpop.f32.mrb[28].mxu1 }
 0xb5e   : > { %2016 = vrot.lane.b32.xlu1 %v1785_v25, %s5119_s25  ;;  %v3896_v26 = vpop.f32.mrb[29].mxu1 }
 0xb5f   : > { %v1788_v27 = vpop.f32.mrb[30].mxu1  ;;  %v4214_v26 = vld [vmem:[%s5104_s6] sm:$0xff]  }
 0xb60   : > { %v3897_v5 = vpop.f32.mrb[31].mxu1  ;;  %v4215_v27 = vld [vmem:[%s5104_s6 + $0x8] sm:$0xff]  }
 0xb61   : > { %v4770_v5 = vld [vmem:[%s5052_s14 + $0x10] sm:$0xff]  }
 0xb82   : > { %v1897_v31 = vpop.f32.mrb[32].mxu1 }
 0xb83   : > { %2020 = vrot.lane.b32.xlu0 %v1897_v31, %s5121_s9  ;;  %v3908_v32 = vpop.f32.mrb[33].mxu1  ;;  %v4777_v31 = vld [vmem:[%s5052_s14 + $0x18] sm:$0xff]  }
 0xb84   : > { %v1900_v35 = vpop.f32.mrb[34].mxu1  ;;  %v4784_v32 = vld [vmem:[%s5051_s13] ss:$0 sm:$0xff] }
 0xb85   : > { %v3909_v36 = vpop.f32.mrb[35].mxu1 }
 0xb8a   : > { %v2009_v38 = vpop.f32.mrb[36].mxu1 }
 0xb8b   : > { %2024 = vrot.lane.b32.xlu1 %v2009_v38, %s5122_s27  ;;  %v3920_v39 = vpop.f32.mrb[37].mxu1 }
 0xb8c   : > { %v2012_v40 = vpop.f32.mrb[38].mxu1 }
 0xb8d   : > { %v3921_v41 = vpop.f32.mrb[39].mxu1 }
 0xbd0   : > { %v2017_v42 = vpop.permute.xlu1 %2016 }
 0xbd1   : > { %v2027_v44 = vsel %vm966_vm2, %v1672_v20, %v2017_v42 }
 0xbf5   : > { %v2021_v43 = vpop.permute.xlu0 %2020 }
 0xbf6   : > { %v2028_v45 = vsel %vm1425_vm4, %v2027_v44, %v2021_v43  ;;  %v4793_v43 = vld [vmem:[%s5053_s15] ss:$0 sm:$0xff] }
 0xbfd   : > { %v2025_v47 = vpop.permute.xlu1 %2024 }
 0xbfe   : > { %v2029_v48 = vsel %vm1427_vm5, %v2028_v45, %v2025_v47 }
 0xbff   : > { %v2030_v50 = vpack.c.bf16 %v2029_v48, %v2029_v48 }
 0xc01   : > { %3927 = vmatmul.mubr.msk.bf16.vlgmr.msra.gmra.mrb[40].mxu0 %vm856_vm1, %v2030_v50 }
 0xc02   : > { %3946 = vmatprep.mubr.msk.bf16.mxu0 %vm4229_vm0, %v4228_v1  ;;  %3939 = vmatpush3.bf16.msra.mxu0 %v4733_v8 }
 0xc03   : > { %3940 = vmatprep.subr.bf16.mxu0 %v4228_v1 }
 0xc06   : > { %3941 = vmatpush3.bf16.msra.mxu0 %v4739_v9 }
 0xc07   : > { %3942 = vmatprep.subr.bf16.mxu0 %v4228_v1 }
 0xc0a   : > { %3943 = vmatpush3.bf16.msra.mxu0 %v4770_v5 }
 0xc0b   : > { %3944 = vmatprep.subr.bf16.mxu0 %v4228_v1 }
 0xc0e   : > { %3945 = vmatpush3.bf16.msra.mxu0 %v4777_v31 }
 0xc0f   : > { %3964 = vmatprep.subr.bf16.mxu0 %v4228_v1 }
 0xcd4   : > { %v2086_v53 = vpop.f32.mrb[40].mxu0 }
 0xcd5   : > { %v2087_v54 = vadd.f32 %v4710_v51, %v2086_v53  ;;  %v3928_v56 = vpop.f32.mrb[41].mxu0 }
 0xcd6   : > { %v2089_v57 = vpop.f32.mrb[42].mxu0 }
 0xcd7   : > { %v3929_v58 = vpop.f32.mrb[43].mxu0  ;;  %v2092_v59 = vadd.f32 %v2087_v54, %v4588_v37  ;;  %v4725_v37 = vld [vmem:[%s5050_s12 + $0x8] sm:$0xff]  }
 0xcd8   : > { %3933 = vmatpush3.bf16.msra.mxu1 %v4725_v37 }
 0xcd9   : > { %v2093_v61 = vsel %vm856_vm1, %v2092_v59, 0.0  ;;  %3950 = vmatprep.subr.bf16.mxu1 %v4228_v1 }
 0xcda   : > { %2094 = vadd.xlane.f32.xlu0 %v2093_v61 }
 0xd67   : > { %v2095_v62 = vpop.xlane.xlu0 %2094 }
 0xd68   : > { %v2096_v63 = vmul.f32 0.03125, %v2095_v62 }
 0xd6a   : > { %v2097_v0 = vsub.f32 %v2092_v59, %v2096_v63 }
 0xd6c   : > { %v2098_v2 = vmul.f32 %v2097_v0, %v2097_v0 }
 0xd6e   : > { %v2099_v6 = vsel %vm856_vm1, %v2098_v2, 0.0 }
 0xd6f   : > { %2100 = vadd.xlane.f32.xlu1 %v2099_v6  ;;  %v4801_v6 = vld [vmem:[%s5058_s20] ss:$0 sm:$0xff] }
 0xdfc   : > { %v2101_v12 = vpop.xlane.xlu1 %2100 }
 0xdfd   : > { %v2102_v13 = vmul.f32 0.03125, %v2101_v12 }
 0xdff   : > { %v2103_v15 = vadd.f32 1e-05, %v2102_v13  ;;  %v4806_v13 = vld [vmem:[%s5059_s21] ss:$0 sm:$0xff] }
 0xe01   : > { %4170 = vrsqrt.f32 %v2103_v15 }
 0xe0b   : > { %v4171_v17 = vpop.eup %4170 }
 0xe0c   : > { %v2105_v20 = vmul.f32 %v4171_v17, %v2097_v0 }
 0xe0e   : > { %v2112_v23 = vmul.f32 %v4747_v19, %v2105_v20 }
 0xe10   : > { %v2119_v24 = vadd.f32 %v4752_v22, %v2112_v23 }
 0xe12   : > { %v2120_v25 = vpack.c.bf16 %v2119_v24, %v2119_v24 }
 0xe14   : > { %3935 = vmatmul.mubr.msk.bf16.vlgmr.msra.gmra.mrb[40].mxu1 %vm856_vm1, %v2120_v25 }
 0xe15   : > { %3951 = vmatpush3.bf16.msra.mxu1 %v4214_v26  ;;  %3954 = vmatprep.mubr.msk.bf16.mxu1 %vm4229_vm0, %v4228_v1 }
 0xe16   : > { %3952 = vmatprep.subr.bf16.mxu1 %v4228_v1 }
 0xe19   : > { %3953 = vmatpush3.bf16.msra.mxu1 %v4215_v27 }
 0xe1a   : > { %3958 = vmatprep.subr.bf16.mxu1 %v4228_v1 }
 0xee7   : > { %v2176_v35 = vpop.f32.mrb[40].mxu1 }
 0xee8   : > { %v2177_v36 = vadd.f32 %v4784_v32, %v2176_v35  ;;  %v3936_v38 = vpop.f32.mrb[41].mxu1 }
 0xee9   : > { %v2179_v39 = vpop.f32.mrb[42].mxu1 }
 0xeea   : > { %v2182_v40 = vmax.f32 %v2177_v36, 0.0  ;;  %v3937_v41 = vpop.f32.mrb[43].mxu1 }
 0xeec   : > { %v2183_v42 = vpack.c.bf16 %v2182_v40, %v2182_v40 }
 0xeee   : > { %3947 = vmatmul.mubr.msk.bf16.vlgmr.msra.gmra.mrb[44].mxu0 %vm2214_vm6, %v2183_v42 }
 0xeef   : > { %3966 = vmatprep.mubr.msk.bf16.mxu0 %vm4229_vm0, %v4228_v1 }
 0xfc1   : > { %v2252_v44 = vpop.f32.mrb[44].mxu0 }
 0xfc2   : > { %v2253_v45 = vadd.f32 %v4793_v43, %v2252_v44  ;;  %v3948_v47 = vpop.f32.mrb[45].mxu0 }
 0xfc3   : > { %v2255_v48 = vpop.f32.mrb[46].mxu0 }
 0xfc4   : > { %v3949_v50 = vpop.f32.mrb[47].mxu0  ;;  %v2258_v53 = vadd.f32 %v2253_v45, %v2119_v24  ;;  %v4216_v24 = vld [vmem:[%s5108_s1] ss:$0 sm:$0xff] }
 0xfc6   : > { %v2259_v54 = vsel %vm856_vm1, %v2258_v53, 0.0 }
 0xfc7   : > { %2260 = vadd.xlane.f32.xlu0 %v2259_v54 }
0x1054   : > { %v2261_v56 = vpop.xlane.xlu0 %2260 }
0x1055   : > { %v2262_v57 = vmul.f32 0.03125, %v2261_v56 }
0x1057   : > { %v2263_v58 = vsub.f32 %v2258_v53, %v2262_v57 }
0x1059   : > { %v2264_v59 = vmul.f32 %v2263_v58, %v2263_v58 }
0x105b   : > { %v2265_v61 = vsel %vm856_vm1, %v2264_v59, 0.0 }
0x105c   : > { %2266 = vadd.xlane.f32.xlu0 %v2265_v61 }
0x10e9   : > { %v2267_v62 = vpop.xlane.xlu0 %2266 }
0x10ea   : > { %v2268_v63 = vmul.f32 0.03125, %v2267_v62 }
0x10ec   : > { %v2269_v0 = vadd.f32 1e-05, %v2268_v63 }
0x10ee   : > { %4172 = vrsqrt.f32 %v2269_v0 }
0x10f8   : > { %v4173_v2 = vpop.eup %4172 }
0x10f9   : > { %v2271_v12 = vmul.f32 %v4173_v2, %v2263_v58 }
0x10fb   : > { %v2278_v15 = vmul.f32 %v4801_v6, %v2271_v12 }
0x10fd   : > { %v4810_v17 = vadd.f32 %v4806_v13, %v2278_v15  ;;  %v4217_v15 = vld [vmem:[%s4473_s29] sm:$0xff]  ;;  %s5127_s29 = smov 56  }
0x10ff   : > { %v2286_v20 = vpack.c.bf16 %v4810_v17, %v4810_v17 }
0x1101   : > { %3955 = vmatmul.mubr.msk.bf16.vlgmr.msra.gmra.mrb[44].mxu1 %vm856_vm1, %v2286_v20 }
0x1102   : > { %3960 = vmatprep.mubr.msk.bf16.mxu1 %vm4229_vm0, %v4228_v1 }
0x11d4   : > { %v2324_v23 = vpop.f32.mrb[44].mxu1 }
0x11d5   : > { %v2325_v25 = vadd.f32 %v4216_v24, %v2324_v23  ;;  %v3956_v26 = vpop.f32.mrb[45].mxu1 }
0x11d6   : > { %v2327_v27 = vpop.f32.mrb[46].mxu1 }
0x11d7   : > { %v4820_v35 = vpack.c.bf16 %v2325_v25, %v2325_v25  ;;  %v3957_v36 = vpop.f32.mrb[47].mxu1 }
0x11d9   : > { %2444 = vrot.lane.b32.xlu0 %v4820_v35, %s5116_s3  ;;  %2332 = vrot.lane.b32.xlu1 %v4820_v35, %s5124_s7  ;;  %s5128_s3 = smov 64  }
0x11dd   : > { %2554 = vrot.lane.b32.xlu0 %v4820_v35, %s5125_s8  ;;  %2442 = vrot.lane.b32.xlu1 %v4820_v35, %s5126_s10 }
0x11e1   : > { %2666 = vrot.lane.b32.xlu0 %v4820_v35, %s5113_s0  ;;  %2556 = vrot.lane.b32.xlu1 %v4820_v35, %s5118_s26  ;;  %s5130_s26 = smov 48  }
0x11e5   : > { %2668 = vrot.lane.b32.xlu1 %v4820_v35, %s5117_s2  ;;  %s5129_s2 = smov 40  }
0x124b   : > { %v2333_v38 = vpop.permute.xlu1 %2332  ;;  %v2445_v40 = vpop.permute.xlu0 %2444 }
0x124c   : > { %v2338_v39 = vsel %vm966_vm2, %v2333_v38, 0  ;;  %v2450_v42 = vsel %vm966_vm2, %v2445_v40, 0 }
0x124d   : > { %3959 = vmatpush3.bf16.xpose.msra.mxu1 %v2338_v39 }
0x124e   : > { %3970 = vmatprep.subr.bf16.mxu1 %v4228_v1 }
0x124f   : > { %v2443_v41 = vpop.permute.xlu1 %2442  ;;  %v2555_v48 = vpop.permute.xlu0 %2554 }
0x1253   : > { %v2557_v44 = vpop.permute.xlu1 %2556  ;;  %v2667_v53 = vpop.permute.xlu0 %2666 }
0x1254   : > { %3961 = vmatmul.mubr.msk.bf16.vlgmr.msra.gmra.mrb[48].mxu1 %vm966_vm2, %v4820_v35  ;;  %v2562_v45 = vsel %vm966_vm2, %v2557_v44, 0 }
0x1255   : > { %3971 = vmatpush3.bf16.xpose.msra.mxu1 %v2450_v42  ;;  %3972 = vmatprep.mubr.msk.bf16.mxu1 %vm4229_vm0, %v4228_v1 }
0x1256   : > { %3982 = vmatprep.subr.bf16.mxu1 %v4228_v1 }
0x1257   : > { %v2669_v47 = vpop.permute.xlu1 %2668 }
0x1258   : > { %v2674_v50 = vsel %vm966_vm2, %v2669_v47, 0 }
0x125c   : > { %3973 = vmatmul.mubr.msk.bf16.vlgmr.msra.gmra.mrb[52].mxu1 %vm966_vm2, %v2443_v41 }
0x125d   : > { %3983 = vmatpush3.bf16.xpose.msra.mxu1 %v2562_v45  ;;  %3984 = vmatprep.mubr.msk.bf16.mxu1 %vm4229_vm0, %v4228_v1 }
0x125e   : > { %3994 = vmatprep.subr.bf16.mxu1 %v4228_v1 }
0x1264   : > { %3985 = vmatmul.mubr.msk.bf16.vlgmr.msra.gmra.mrb[56].mxu1 %vm966_vm2, %v2555_v48 }
0x1265   : > { %3995 = vmatpush3.bf16.xpose.msra.mxu1 %v2674_v50  ;;  %3996 = vmatprep.mubr.msk.bf16.mxu1 %vm4229_vm0, %v4228_v1 }
0x1266   : > { %4006 = vmatprep.subr.bf16.mxu1 %v4228_v1 }
0x126c   : > { %3997 = vmatmul.mubr.msk.bf16.vlgmr.msra.gmra.mrb[60].mxu1 %vm966_vm2, %v2667_v53 }
0x126d   : > { %4007 = vmatpush3.bf16.msra.mxu1 %v4526_v55  ;;  %4010 = vmatprep.mubr.msk.bf16.mxu1 %vm4229_vm0, %v4228_v1 }
0x126e   : > { %4008 = vmatprep.subr.bf16.mxu1 %v4228_v1 }
0x1271   : > { %4009 = vmatpush3.bf16.msra.mxu1 %v4533_v4 }
0x1272   : > { %4022 = vmatprep.subr.bf16.mxu1 %v4228_v1 }
0x1327   : > { %v2374_v54 = vpop.f32.mrb[48].mxu1 }
0x1328   : > { %v2380_v56 = vmul.f32 0.35355338, %v2374_v54  ;;  %v3962_v57 = vpop.f32.mrb[49].mxu1 }
0x1329   : > { %v2377_v58 = vpop.f32.mrb[50].mxu1 }
0x132a   : > { %v3963_v59 = vpop.f32.mrb[51].mxu1  ;;  %v2381_v61 = vadd.f32 %v2380_v56, %v4476_v34 }
0x132c   : > { %v2382_v62 = vsel %vm966_vm2, %v2381_v61, -inf }
0x132d   : > { %2383 = vmax.xlane.f32.xlu1 %v2382_v62 }
0x132f   : > { %v2486_v55 = vpop.f32.mrb[52].mxu1 }
0x1330   : > { %v2492_v63 = vmul.f32 0.35355338, %v2486_v55  ;;  %v3974_v0 = vpop.f32.mrb[53].mxu1 }
0x1331   : > { %v2489_v2 = vpop.f32.mrb[54].mxu1 }
0x1332   : > { %v3975_v12 = vpop.f32.mrb[55].mxu1  ;;  %v2493_v20 = vadd.f32 %v4217_v15, %v2492_v63 }
0x1334   : > { %v2494_v4 = vsel %vm966_vm2, %v2493_v20, -inf }
0x1335   : > { %2495 = vmax.xlane.f32.xlu0 %v2494_v4 }
0x1337   : > { %v2598_v23 = vpop.f32.mrb[56].mxu1 }
0x1338   : > { %v2604_v24 = vmul.f32 0.35355338, %v2598_v23  ;;  %v3986_v25 = vpop.f32.mrb[57].mxu1 }
0x1339   : > { %v2601_v26 = vpop.f32.mrb[58].mxu1 }
0x133a   : > { %v3987_v27 = vpop.f32.mrb[59].mxu1  ;;  %v2605_v36 = vadd.f32 %v4217_v15, %v2604_v24 }
0x133c   : > { %v2606_v34 = vsel %vm966_vm2, %v2605_v36, -inf }
0x133d   : > { %2607 = vmax.xlane.f32.xlu0 %v2606_v34 }
0x133f   : > { %v2710_v38 = vpop.f32.mrb[60].mxu1 }
0x1340   : > { %v2716_v39 = vmul.f32 0.35355338, %v2710_v38  ;;  %v3998_v40 = vpop.f32.mrb[61].mxu1 }
0x1341   : > { %v2713_v41 = vpop.f32.mrb[62].mxu1 }
0x1342   : > { %v3999_v42 = vpop.f32.mrb[63].mxu1  ;;  %v2717_v44 = vadd.f32 %v4217_v15, %v2716_v39 }
0x1344   : > { %v2718_v45 = vsel %vm966_vm2, %v2717_v44, -inf }
0x1345   : > { %2719 = vmax.xlane.f32.xlu1 %v2718_v45 }
0x13ba   : > { %v2384_v47 = vpop.xlane.xlu1 %2383 }
0x13bb   : > { %v2385_v48 = vsub.f32 %v2381_v61, %v2384_v47 }
0x13bd   : > { %v2386_v50 = vmul.f32 1.442695, %v2385_v48 }
0x13bf   : > { %4174 = vpow2.f32 %v2386_v50 }
0x13c2   : > { %v2496_v53 = vpop.xlane.xlu0 %2495 }
0x13c3   : > { %v2497_v54 = vsub.f32 %v2493_v20, %v2496_v53 }
0x13c5   : > { %v2498_v56 = vmul.f32 1.442695, %v2497_v54 }
0x13c7   : > { %4176 = vpow2.f32 %v2498_v56 }
0x13c9   : > { %v4175_v57 = vpop.eup %4174 }
0x13ca   : > { %v2608_v58 = vpop.xlane.xlu0 %2607  ;;  %v2388_v59 = vsel %vm966_vm2, %v4175_v57, 0.0 }
0x13cb   : > { %v2609_v62 = vsub.f32 %v2605_v36, %v2608_v58  ;;  %2389 = vadd.xlane.f32.xlu0 %v2388_v59 }
0x13cd   : > { %v2610_v55 = vmul.f32 1.442695, %v2609_v62 }
0x13cf   : > { %4178 = vpow2.f32 %v2610_v55  ;;  %v4218_v55 = vld [vmem:[%s5105_s30] sm:$0xff]  }
0x13d1   : > { %v4177_v63 = vpop.eup %4176 }
0x13d2   : > { %v2500_v0 = vsel %vm966_vm2, %v4177_v63, 0.0  ;;  %v2720_v12 = vpop.xlane.xlu1 %2719 }
0x13d3   : > { %2501 = vadd.xlane.f32.xlu1 %v2500_v0  ;;  %v2721_v15 = vsub.f32 %v2717_v44, %v2720_v12 }
0x13d5   : > { %v2722_v20 = vmul.f32 1.442695, %v2721_v15 }
0x13d7   : > { %4180 = vpow2.f32 %v2722_v20 }
0x13d9   : > { %v4179_v2 = vpop.eup %4178 }
0x13da   : > { %v2612_v61 = vsel %vm966_vm2, %v4179_v2, 0.0 }
0x13db   : > { %2613 = vadd.xlane.f32.xlu0 %v2612_v61 }
0x13e1   : > { %v4181_v4 = vpop.eup %4180 }
0x13e2   : > { %v2724_v23 = vsel %vm966_vm2, %v4181_v4, 0.0 }
0x13e4   : > { %2506 = vrot.lane.b32.xlu1 %v4820_v35, %s5127_s29  ;;  %s783_s29 = scalar_lea.vmem %s5062_s24, %s4402_s4 }
0x13f1   : > { %2394 = vrot.lane.b32.xlu0 %v4820_v35, %s5128_s3 }
0x13f5   : > { %2730 = vrot.lane.b32.xlu0 %v4820_v35, %s5129_s2 }
0x1408   : > { %2725 = vadd.xlane.f32.xlu1 %v2724_v23 }
0x1419   : > { %2618 = vrot.lane.b32.xlu1 %v4820_v35, %s5130_s26 }
0x1458   : > { %v2390_v24 = vpop.xlane.xlu0 %2389 }
0x1459   : > { %4182 = vrcp.f32 %v2390_v24 }
0x1460   : > { %v2502_v25 = vpop.xlane.xlu1 %2501 }
0x1461   : > { %4184 = vrcp.f32 %v2502_v25 }
0x1463   : > { %v4183_v26 = vpop.eup %4182 }
0x1464   : > { %v2392_v36 = vmul.f32 %v4183_v26, %v4175_v57  ;;  %v2507_v39 = vpop.permute.xlu1 %2506 }
0x1465   : > { %v2512_v42 = vsel %vm1032_vm3, %v2507_v39, 0 }
0x1466   : > { %v2393_v40 = vpack.c.bf16 %v2392_v36, %v2392_v36 }
0x1468   : > { %v2614_v27 = vpop.xlane.xlu0 %2613 }
0x1469   : > { %4186 = vrcp.f32 %v2614_v27 }
0x146b   : > { %v4185_v41 = vpop.eup %4184 }
0x146c   : > { %v2395_v34 = vpop.permute.xlu0 %2394  ;;  %v2504_v35 = vmul.f32 %v4185_v41, %v4177_v63  ;;  %v4219_v63 = vld [vmem:[%s5105_s30 + $0x8] sm:$0xff]  }
0x146d   : > { %v2400_v38 = vsel %vm1032_vm3, %v2395_v34, 0 }
0x146e   : > { %3965 = vmatpush3.bf16.msra.mxu0 %v2400_v38  ;;  %v2505_v44 = vpack.c.bf16 %v2504_v35, %v2504_v35 }
0x146f   : > { %3976 = vmatprep.subr.bf16.mxu0 %v4228_v1 }
0x1470   : > { %v2731_v54 = vpop.permute.xlu0 %2730 }
0x1471   : > { %3967 = vmatmul.mubr.msk.bf16.vlgmr.msra.gmra.mrb[48].mxu0 %vm966_vm2, %v2393_v40  ;;  %v2736_v57 = vsel %vm1032_vm3, %v2731_v54, 0 }
0x1472   : > { %3977 = vmatpush3.bf16.msra.mxu0 %v2512_v42  ;;  %3978 = vmatprep.mubr.msk.bf16.mxu0 %vm4229_vm0, %v4228_v1 }
0x1473   : > { %3988 = vmatprep.subr.bf16.mxu0 %v4228_v1  ;;  %v4187_v45 = vpop.eup %4186 }
0x1474   : > { %v2616_v48 = vmul.f32 %v4187_v45, %v4179_v2 }
0x1476   : > { %v2617_v56 = vpack.c.bf16 %v2616_v48, %v2616_v48 }
0x1479   : > { %3979 = vmatmul.mubr.msk.bf16.vlgmr.msra.gmra.mrb[52].mxu0 %vm966_vm2, %v2505_v44 }
0x147a   : > { %3990 = vmatprep.mubr.msk.bf16.mxu0 %vm4229_vm0, %v4228_v1 }
0x1495   : > { %v2726_v47 = vpop.xlane.xlu1 %2725 }
0x1496   : > { %4188 = vrcp.f32 %v2726_v47 }
0x1499   : > { %v2619_v50 = vpop.permute.xlu1 %2618 }
0x149a   : > { %v2624_v53 = vsel %vm1032_vm3, %v2619_v50, 0 }
0x149b   : > { %3989 = vmatpush3.bf16.msra.mxu0 %v2624_v53 }
0x149c   : > { %4000 = vmatprep.subr.bf16.mxu0 %v4228_v1 }
0x149e   : > { %3991 = vmatmul.mubr.msk.bf16.vlgmr.msra.gmra.mrb[56].mxu0 %vm966_vm2, %v2617_v56 }
0x149f   : > { %4001 = vmatpush3.bf16.msra.mxu0 %v2736_v57  ;;  %4002 = vmatprep.mubr.msk.bf16.mxu0 %vm4229_vm0, %v4228_v1 }
0x14a0   : > { %v4189_v58 = vpop.eup %4188  ;;  %4014 = vmatprep.subr.bf16.mxu0 %v4228_v1 }
0x14a1   : > { %v2728_v59 = vmul.f32 %v4189_v58, %v4181_v4 }
0x14a3   : > { %v2729_v62 = vpack.c.bf16 %v2728_v59, %v2728_v59 }
0x14a6   : > { %4003 = vmatmul.mubr.msk.bf16.vlgmr.msra.gmra.mrb[60].mxu0 %vm966_vm2, %v2729_v62 }
0x14a7   : > { %4015 = vmatpush3.bf16.msra.mxu0 %v4218_v55  ;;  %4018 = vmatprep.mubr.msk.bf16.mxu0 %vm4229_vm0, %v4228_v1 }
0x14a8   : > { %4016 = vmatprep.subr.bf16.mxu0 %v4228_v1 }
0x14ab   : > { %4017 = vmatpush3.bf16.msra.mxu0 %v4219_v63 }
0x14ac   : > { %4028 = vmatprep.subr.bf16.mxu0 %v4228_v1 }
0x1544   : > { %v2436_v0 = vpop.f32.mrb[48].mxu0 }
0x1545   : > { %v3968_v2 = vpop.f32.mrb[49].mxu0 }
0x1546   : > { %v2439_v61 = vpop.f32.mrb[50].mxu0 }
0x1547   : > { %v3969_v12 = vpop.f32.mrb[51].mxu0 }
0x154c   : > { %v2548_v15 = vpop.f32.mrb[52].mxu0 }
0x154d   : > { %2779 = vrot.lane.b32.xlu1 %v2548_v15, %s5119_s25  ;;  %v3980_v20 = vpop.f32.mrb[53].mxu0 }
0x154e   : > { %v2551_v4 = vpop.f32.mrb[54].mxu0 }
0x154f   : > { %v3981_v23 = vpop.f32.mrb[55].mxu0 }
0x1571   : > { %v2660_v24 = vpop.f32.mrb[56].mxu0 }
0x1572   : > { %2783 = vrot.lane.b32.xlu0 %v2660_v24, %s5121_s9  ;;  %v3992_v25 = vpop.f32.mrb[57].mxu0 }
0x1573   : > { %v2663_v26 = vpop.f32.mrb[58].mxu0 }
0x1574   : > { %v3993_v27 = vpop.f32.mrb[59].mxu0 }
0x1579   : > { %v2772_v36 = vpop.f32.mrb[60].mxu0 }
0x157a   : > { %2787 = vrot.lane.b32.xlu1 %v2772_v36, %s5122_s27  ;;  %v4004_v34 = vpop.f32.mrb[61].mxu0 }
0x157b   : > { %v2775_v38 = vpop.f32.mrb[62].mxu0 }
0x157c   : > { %v4005_v39 = vpop.f32.mrb[63].mxu0 }
0x15bf   : > { %v2780_v40 = vpop.permute.xlu1 %2779 }
0x15c0   : > { %v2790_v42 = vsel %vm966_vm2, %v2436_v0, %v2780_v40 }
0x15e4   : > { %v2784_v41 = vpop.permute.xlu0 %2783 }
0x15e5   : > { %v2791_v35 = vsel %vm1425_vm4, %v2790_v42, %v2784_v41 }
0x15ec   : > { %v2788_v44 = vpop.permute.xlu1 %2787 }
0x15ed   : > { %v2792_v45 = vsel %vm1427_vm5, %v2791_v35, %v2788_v44 }
0x15ee   : > { %v2793_v47 = vpack.c.bf16 %v2792_v45, %v2792_v45 }
0x15f0   : > { %4011 = vmatmul.mubr.msk.bf16.vlgmr.msra.gmra.mrb[64].mxu1 %vm856_vm1, %v2793_v47 }
0x15f1   : > { %4023 = vmatpush3.bf16.xpose.msra.mxu1 %v4566_v29  ;;  %4024 = vmatprep.mubr.msk.bf16.mxu1 %vm4229_vm0, %v4228_v1 }
0x15f2   : > { %4034 = vmatprep.subr.bf16.mxu1 %v4228_v1 }
0x16c3   : > { %v2831_v48 = vpop.f32.mrb[64].mxu1 }
0x16c4   : > { %v2832_v50 = vadd.f32 %v4548_v11, %v2831_v48  ;;  %v4012_v53 = vpop.f32.mrb[65].mxu1 }
0x16c5   : > { %v2834_v54 = vpop.f32.mrb[66].mxu1 }
0x16c6   : > { %v4013_v56 = vpop.f32.mrb[67].mxu1  ;;  %v2837_v57 = vadd.f32 %v2832_v50, %v4810_v17 }
0x16c8   : > { %v2838_v58 = vsel %vm856_vm1, %v2837_v57, 0.0 }
0x16c9   : > { %2839 = vadd.xlane.f32.xlu0 %v2838_v58 }
0x1756   : > { %v2840_v59 = vpop.xlane.xlu0 %2839 }
0x1757   : > { %v2841_v62 = vmul.f32 0.03125, %v2840_v59 }
0x1759   : > { %v2842_v55 = vsub.f32 %v2837_v57, %v2841_v62 }
0x175b   : > { %v2843_v29 = vmul.f32 %v2842_v55, %v2842_v55 }
0x175d   : > { %v2844_v63 = vsel %vm856_vm1, %v2843_v29, 0.0 }
0x175e   : > { %2845 = vadd.xlane.f32.xlu1 %v2844_v63 }
0x17eb   : > { %v2846_v0 = vpop.xlane.xlu1 %2845 }
0x17ec   : > { %v2847_v2 = vmul.f32 0.03125, %v2846_v0 }
0x17ee   : > { %v2848_v61 = vadd.f32 1e-05, %v2847_v2 }
0x17f0   : > { %4190 = vrsqrt.f32 %v2848_v61 }
0x17fa   : > { %v4191_v11 = vpop.eup %4190 }
0x17fb   : > { %v2850_v12 = vmul.f32 %v4191_v11, %v2842_v55 }
0x17fd   : > { %v2851_v15 = vmul.f32 %v4579_v33, %v2850_v12 }
0x17ff   : > { %v4924_v17 = vadd.f32 %v4584_v16, %v2851_v15 }
0x1801   : > { %v2853_v20 = vpack.c.bf16 %v4924_v17, %v4924_v17 }
0x1803   : > { %4019 = vmatmul.mubr.msk.bf16.vlgmr.msra.gmra.mrb[64].mxu0 %vm856_vm1, %v2853_v20 }
0x1804   : > { %4029 = vmatpush3.bf16.msra.mxu0 %v4653_v60  ;;  %4030 = vmatprep.mubr.msk.bf16.mxu0 %vm4229_vm0, %v4228_v1 }
0x1805   : > { %4040 = vmatprep.subr.bf16.mxu0 %v4228_v1 }
0x18d6   : > { %v2891_v4 = vpop.f32.mrb[64].mxu0 }
0x18d7   : > { %v2892_v23 = vadd.f32 %v4556_v21, %v2891_v4  ;;  %v4020_v24 = vpop.f32.mrb[65].mxu0 }
0x18d8   : > { %v2894_v33 = vpop.f32.mrb[66].mxu0 }
0x18d9   : > { %v2897_v25 = vpack.c.bf16 %v2892_v23, %v2892_v23  ;;  %v4021_v16 = vpop.f32.mrb[67].mxu0 }
0x18db   : > { %3101 = vrot.lane.b32.xlu1 %v2897_v25, %s5125_s8  ;;  %2999 = vrot.lane.b32.xlu0 %v2897_v25, %s5126_s10 }
0x18dc   : > { %4025 = vmatmul.mubr.msk.bf16.vlgmr.msra.gmra.mrb[68].mxu1 %vm966_vm2, %v2897_v25 }
0x18dd   : > { %4035 = vmatpush3.bf16.xpose.msra.mxu1 %v4597_v46  ;;  %4036 = vmatprep.mubr.msk.bf16.mxu1 %vm4229_vm0, %v4228_v1 }
0x18de   : > { %4046 = vmatprep.subr.bf16.mxu1 %v4228_v1 }
0x18df   : > { %3203 = vrot.lane.b32.xlu0 %v2897_v25, %s5113_s0 }
0x194d   : > { %v3000_v21 = vpop.permute.xlu0 %2999  ;;  %v3102_v60 = vpop.permute.xlu1 %3101 }
0x194e   : > { %4037 = vmatmul.mubr.msk.bf16.vlgmr.msra.gmra.mrb[72].mxu1 %vm966_vm2, %v3000_v21 }
0x194f   : > { %4047 = vmatpush3.bf16.xpose.msra.mxu1 %v4608_v49  ;;  %4048 = vmatprep.mubr.msk.bf16.mxu1 %vm4229_vm0, %v4228_v1 }
0x1950   : > { %4058 = vmatprep.subr.bf16.mxu1 %v4228_v1 }
0x1951   : > { %v3204_v46 = vpop.permute.xlu0 %3203 }
0x1956   : > { %4049 = vmatmul.mubr.msk.bf16.vlgmr.msra.gmra.mrb[76].mxu1 %vm966_vm2, %v3102_v60 }
0x1957   : > { %4059 = vmatpush3.bf16.xpose.msra.mxu1 %v4616_v52  ;;  %4060 = vmatprep.mubr.msk.bf16.mxu1 %vm4229_vm0, %v4228_v1 }
0x1958   : > { %4070 = vmatprep.subr.bf16.mxu1 %v4228_v1 }
0x195e   : > { %4061 = vmatmul.mubr.msk.bf16.vlgmr.msra.gmra.mrb[80].mxu1 %vm966_vm2, %v3204_v46 }
0x195f   : > { %4071 = vmatpush3.bf16.msra.mxu1 %v4688_v18  ;;  %4074 = vmatprep.mubr.msk.bf16.mxu1 %vm4229_vm0, %v4228_v1 }
0x1960   : > { %4072 = vmatprep.subr.bf16.mxu1 %v4228_v1 }
0x1963   : > { %4073 = vmatpush3.bf16.msra.mxu1 %v4695_v30 }
0x1964   : > { %4086 = vmatprep.subr.bf16.mxu1 %v4228_v1 }
0x19af   : > { %v2935_v49 = vpop.f32.mrb[68].mxu1 }
0x19b0   : > { %v2941_v52 = vmul.f32 0.35355338, %v2935_v49  ;;  %v4026_v26 = vpop.f32.mrb[69].mxu1 }
0x19b1   : > { %v2938_v27 = vpop.f32.mrb[70].mxu1 }
0x19b2   : > { %v4027_v36 = vpop.f32.mrb[71].mxu1  ;;  %v2942_v34 = vadd.f32 %v2941_v52, %v4630_v3 }
0x19b4   : > { %v2943_v38 = vsel %vm966_vm2, %v2942_v34, -inf }
0x19b5   : > { %2944 = vmax.xlane.f32.xlu1 %v2943_v38 }
0x1a21   : > { %v3038_v18 = vpop.f32.mrb[72].mxu1 }
0x1a22   : > { %v3044_v39 = vmul.f32 0.35355338, %v3038_v18  ;;  %v4038_v40 = vpop.f32.mrb[73].mxu1 }
0x1a23   : > { %v3041_v41 = vpop.f32.mrb[74].mxu1 }
0x1a24   : > { %v4039_v42 = vpop.f32.mrb[75].mxu1  ;;  %v3045_v35 = vadd.f32 %v3044_v39, %v4630_v3 }
0x1a26   : > { %v3046_v30 = vsel %vm966_vm2, %v3045_v35, -inf }
0x1a27   : > { %3047 = vmax.xlane.f32.xlu0 %v3046_v30 }
0x1a29   : > { %v3140_v44 = vpop.f32.mrb[76].mxu1 }
0x1a2a   : > { %v3146_v45 = vmul.f32 0.35355338, %v3140_v44  ;;  %v4050_v47 = vpop.f32.mrb[77].mxu1 }
0x1a2b   : > { %v3143_v48 = vpop.f32.mrb[78].mxu1 }
0x1a2c   : > { %v4051_v50 = vpop.f32.mrb[79].mxu1  ;;  %v3147_v53 = vadd.f32 %v3146_v45, %v4630_v3 }
0x1a2e   : > { %v3148_v54 = vsel %vm966_vm2, %v3147_v53, -inf }
0x1a2f   : > { %3149 = vmax.xlane.f32.xlu0 %v3148_v54 }
0x1a31   : > { %v3242_v56 = vpop.f32.mrb[80].mxu1 }
0x1a32   : > { %v3248_v57 = vmul.f32 0.35355338, %v3242_v56  ;;  %v4062_v58 = vpop.f32.mrb[81].mxu1 }
0x1a33   : > { %v3245_v59 = vpop.f32.mrb[82].mxu1 }
0x1a34   : > { %v4063_v62 = vpop.f32.mrb[83].mxu1  ;;  %v3249_v55 = vadd.f32 %v3248_v57, %v4630_v3 }
0x1a36   : > { %v3250_v29 = vsel %vm966_vm2, %v3249_v55, -inf }
0x1a37   : > { %3251 = vmax.xlane.f32.xlu1 %v3250_v29 }
0x1a42   : > { %v2945_v63 = vpop.xlane.xlu1 %2944 }
0x1a43   : > { %v2946_v0 = vsub.f32 %v2942_v34, %v2945_v63 }
0x1a45   : > { %v2947_v2 = vmul.f32 1.442695, %v2946_v0 }
0x1a47   : > { %4192 = vpow2.f32 %v2947_v2 }
0x1a51   : > { %v4193_v61 = vpop.eup %4192 }
0x1a52   : > { %v2949_v11 = vsel %vm966_vm2, %v4193_v61, 0.0 }
0x1a53   : > { %2950 = vadd.xlane.f32.xlu0 %v2949_v11 }
0x1ab4   : > { %v3048_v12 = vpop.xlane.xlu0 %3047 }
0x1ab5   : > { %v3049_v15 = vsub.f32 %v3045_v35, %v3048_v12 }
0x1ab7   : > { %v3050_v20 = vmul.f32 1.442695, %v3049_v15 }
0x1ab9   : > { %4194 = vpow2.f32 %v3050_v20 }
0x1abc   : > { %v3150_v4 = vpop.xlane.xlu0 %3149 }
0x1abd   : > { %v3151_v23 = vsub.f32 %v3147_v53, %v3150_v4 }
0x1abf   : > { %v3152_v24 = vmul.f32 1.442695, %v3151_v23 }
0x1ac1   : > { %4196 = vpow2.f32 %v3152_v24 }
0x1ac3   : > { %v4195_v3 = vpop.eup %4194 }
0x1ac4   : > { %v3252_v33 = vpop.xlane.xlu1 %3251  ;;  %v3052_v25 = vsel %vm966_vm2, %v4195_v3, 0.0 }
0x1ac5   : > { %v3253_v16 = vsub.f32 %v3249_v55, %v3252_v33  ;;  %3053 = vadd.xlane.f32.xlu1 %v3052_v25 }
0x1ac7   : > { %v3254_v21 = vmul.f32 1.442695, %v3253_v16 }
0x1ac9   : > { %4198 = vpow2.f32 %v3254_v21 }
0x1acb   : > { %v4197_v60 = vpop.eup %4196 }
0x1acc   : > { %v3154_v46 = vsel %vm966_vm2, %v4197_v60, 0.0 }
0x1acd   : > { %3155 = vadd.xlane.f32.xlu0 %v3154_v46 }
0x1ad3   : > { %v4199_v49 = vpop.eup %4198 }
0x1ad4   : > { %v3256_v52 = vsel %vm966_vm2, %v4199_v49, 0.0 }
0x1ad5   : > { %3257 = vadd.xlane.f32.xlu1 %v3256_v52 }
0x1ae0   : > { %v2951_v26 = vpop.xlane.xlu0 %2950 }
0x1ae1   : > { %4200 = vrcp.f32 %v2951_v26 }
0x1aeb   : > { %v4201_v27 = vpop.eup %4200 }
0x1aec   : > { %v2953_v36 = vmul.f32 %v4201_v27, %v4193_v61 }
0x1aee   : > { %v2954_v34 = vpack.c.bf16 %v2953_v36, %v2953_v36 }
0x1af0   : > { %4031 = vmatmul.mubr.msk.bf16.vlgmr.msra.gmra.mrb[68].mxu0 %vm966_vm2, %v2954_v34 }
0x1af1   : > { %4041 = vmatpush3.bf16.msra.mxu0 %v4658_v28  ;;  %4042 = vmatprep.mubr.msk.bf16.mxu0 %vm4229_vm0, %v4228_v1 }
0x1af2   : > { %4052 = vmatprep.subr.bf16.mxu0 %v4228_v1 }
0x1b52   : > { %v3054_v38 = vpop.xlane.xlu1 %3053 }
0x1b53   : > { %4202 = vrcp.f32 %v3054_v38 }
0x1b5a   : > { %v3156_v18 = vpop.xlane.xlu0 %3155 }
0x1b5b   : > { %4204 = vrcp.f32 %v3156_v18 }
0x1b5d   : > { %v4203_v39 = vpop.eup %4202 }
0x1b5e   : > { %v3056_v40 = vmul.f32 %v4203_v39, %v4195_v3 }
0x1b60   : > { %v3057_v41 = vpack.c.bf16 %v3056_v40, %v3056_v40 }
0x1b62   : > { %4043 = vmatmul.mubr.msk.bf16.vlgmr.msra.gmra.mrb[72].mxu0 %vm966_vm2, %v3057_v41  ;;  %v3258_v42 = vpop.xlane.xlu1 %3257 }
0x1b63   : > { %4053 = vmatpush3.bf16.msra.mxu0 %v4669_v10  ;;  %4206 = vrcp.f32 %v3258_v42  ;;  %4054 = vmatprep.mubr.msk.bf16.mxu0 %vm4229_vm0, %v4228_v1 }
0x1b64   : > { %4064 = vmatprep.subr.bf16.mxu0 %v4228_v1 }
0x1b65   : > { %v4205_v28 = vpop.eup %4204 }
0x1b66   : > { %v3158_v35 = vmul.f32 %v4205_v28, %v4197_v60 }
0x1b68   : > { %v3159_v30 = vpack.c.bf16 %v3158_v35, %v3158_v35 }
0x1b6a   : > { %4055 = vmatmul.mubr.msk.bf16.vlgmr.msra.gmra.mrb[76].mxu0 %vm966_vm2, %v3159_v30 }
0x1b6b   : > { %4065 = vmatpush3.bf16.msra.mxu0 %v4674_v14  ;;  %4066 = vmatprep.mubr.msk.bf16.mxu0 %vm4229_vm0, %v4228_v1 }
0x1b6c   : > { %4078 = vmatprep.subr.bf16.mxu0 %v4228_v1 }
0x1b6d   : > { %v4207_v44 = vpop.eup %4206 }
0x1b6e   : > { %v3260_v10 = vmul.f32 %v4207_v44, %v4199_v49 }
0x1b70   : > { %v3261_v45 = vpack.c.bf16 %v3260_v10, %v3260_v10 }
0x1b72   : > { %4067 = vmatmul.mubr.msk.bf16.vlgmr.msra.gmra.mrb[80].mxu0 %vm966_vm2, %v3261_v45 }
0x1b73   : > { %4079 = vmatpush3.bf16.msra.mxu0 %v4719_v7  ;;  %4082 = vmatprep.mubr.msk.bf16.mxu0 %vm4229_vm0, %v4228_v1 }
0x1b74   : > { %4080 = vmatprep.subr.bf16.mxu0 %v4228_v1 }
0x1b77   : > { %4081 = vmatpush3.bf16.msra.mxu0 %v4725_v37 }
0x1bc3   : > { %v2992_v14 = vpop.f32.mrb[68].mxu0 }
0x1bc4   : > { %v4032_v47 = vpop.f32.mrb[69].mxu0 }
0x1bc5   : > { %v2995_v48 = vpop.f32.mrb[70].mxu0 }
0x1bc6   : > { %v4033_v50 = vpop.f32.mrb[71].mxu0 }
0x1c35   : > { %v3095_v53 = vpop.f32.mrb[72].mxu0 }
0x1c36   : > { %3306 = vrot.lane.b32.xlu0 %v3095_v53, %s5119_s25  ;;  %v4044_v54 = vpop.f32.mrb[73].mxu0 }
0x1c37   : > { %v3098_v56 = vpop.f32.mrb[74].mxu0 }
0x1c38   : > { %v4045_v57 = vpop.f32.mrb[75].mxu0 }
0x1c3d   : > { %v3197_v58 = vpop.f32.mrb[76].mxu0 }
0x1c3e   : > { %3310 = vrot.lane.b32.xlu1 %v3197_v58, %s5121_s9  ;;  %v4056_v7 = vpop.f32.mrb[77].mxu0 }
0x1c3f   : > { %v3200_v59 = vpop.f32.mrb[78].mxu0 }
0x1c40   : > { %v4057_v62 = vpop.f32.mrb[79].mxu0 }
0x1c45   : > { %v3299_v55 = vpop.f32.mrb[80].mxu0 }
0x1c46   : > { %3314 = vrot.lane.b32.xlu1 %v3299_v55, %s5122_s27  ;;  %v4068_v37 = vpop.f32.mrb[81].mxu0 }
0x1c47   : > { %v3302_v29 = vpop.f32.mrb[82].mxu0 }
0x1c48   : > { %v4069_v63 = vpop.f32.mrb[83].mxu0 }
0x1ca8   : > { %v3307_v0 = vpop.permute.xlu0 %3306 }
0x1ca9   : > { %v3317_v61 = vsel %vm966_vm2, %v2992_v14, %v3307_v0 }
0x1cb0   : > { %v3311_v2 = vpop.permute.xlu1 %3310 }
0x1cb1   : > { %v3318_v11 = vsel %vm1425_vm4, %v3317_v61, %v3311_v2  ;;  %v3684_v2 = vld [vmem:[%s5061_s23] ss:$0 sm:$0xff] }
0x1cb8   : > { %v3315_v12 = vpop.permute.xlu1 %3314 }
0x1cb9   : > { %v3319_v15 = vsel %vm1427_vm5, %v3318_v11, %v3315_v12 }
0x1cba   : > { %v3320_v20 = vpack.c.bf16 %v3319_v15, %v3319_v15 }
0x1cbc   : > { %4075 = vmatmul.mubr.msk.bf16.vlgmr.msra.gmra.mrb[84].mxu1 %vm856_vm1, %v3320_v20 }
0x1cbd   : > { %4087 = vmatpush3.bf16.msra.mxu1 %v4733_v8  ;;  %4094 = vmatprep.mubr.msk.bf16.mxu1 %vm4229_vm0, %v4228_v1 }
0x1cbe   : > { %4088 = vmatprep.subr.bf16.mxu1 %v4228_v1 }
0x1cc1   : > { %4089 = vmatpush3.bf16.msra.mxu1 %v4739_v9 }
0x1cc2   : > { %4090 = vmatprep.subr.bf16.mxu1 %v4228_v1 }
0x1cc5   : > { %4091 = vmatpush3.bf16.msra.mxu1 %v4770_v5 }
0x1cc6   : > { %4092 = vmatprep.subr.bf16.mxu1 %v4228_v1 }
0x1cc9   : > { %4093 = vmatpush3.bf16.msra.mxu1 %v4777_v31 }
0x1d8f   : > { %v3358_v4 = vpop.f32.mrb[84].mxu1 }
0x1d90   : > { %v3359_v23 = vadd.f32 %v4710_v51, %v3358_v4  ;;  %v4076_v24 = vpop.f32.mrb[85].mxu1 }
0x1d91   : > { %v3361_v8 = vpop.f32.mrb[86].mxu1 }
0x1d92   : > { %v4077_v3 = vpop.f32.mrb[87].mxu1  ;;  %v3364_v33 = vadd.f32 %v3359_v23, %v4924_v17 }
0x1d94   : > { %v3365_v25 = vsel %vm856_vm1, %v3364_v33, 0.0 }
0x1d95   : > { %3366 = vadd.xlane.f32.xlu0 %v3365_v25 }
0x1e22   : > { %v3367_v9 = vpop.xlane.xlu0 %3366 }
0x1e23   : > { %v3368_v16 = vmul.f32 0.03125, %v3367_v9 }
0x1e25   : > { %v3369_v21 = vsub.f32 %v3364_v33, %v3368_v16 }
0x1e27   : > { %v3370_v60 = vmul.f32 %v3369_v21, %v3369_v21 }
0x1e29   : > { %v3371_v5 = vsel %vm856_vm1, %v3370_v60, 0.0 }
0x1e2a   : > { %3372 = vadd.xlane.f32.xlu1 %v3371_v5 }
0x1eb7   : > { %v3373_v1 = vpop.xlane.xlu1 %3372 }
0x1eb8   : > { %v3374_v31 = vmul.f32 0.03125, %v3373_v1 }
0x1eba   : > { %v3375_v46 = vadd.f32 1e-05, %v3374_v31 }
0x1ebc   : > { %4208 = vrsqrt.f32 %v3375_v46 }
0x1ec6   : > { %v4209_v51 = vpop.eup %4208 }
0x1ec7   : > { %v3377_v49 = vmul.f32 %v4209_v51, %v3369_v21 }
0x1ec9   : > { %v3378_v52 = vmul.f32 %v4747_v19, %v3377_v49 }
0x1ecb   : > { %v3379_v17 = vadd.f32 %v4752_v22, %v3378_v52 }
0x1ecd   : > { %v3380_v26 = vpack.c.bf16 %v3379_v17, %v3379_v17 }
0x1ecf   : > { %4083 = vmatmul.mubr.msk.bf16.vlgmr.msra.gmra.mrb[84].mxu0 %vm856_vm1, %v3380_v26 }
0x1fa2   : > { %v3418_v27 = vpop.f32.mrb[84].mxu0 }
0x1fa3   : > { %v3419_v36 = vadd.f32 %v4784_v32, %v3418_v27  ;;  %v4084_v34 = vpop.f32.mrb[85].mxu0 }
0x1fa4   : > { %v3421_v38 = vpop.f32.mrb[86].mxu0 }
0x1fa5   : > { %v3424_v18 = vmax.f32 %v3419_v36, 0.0  ;;  %v4085_v39 = vpop.f32.mrb[87].mxu0 }
0x1fa7   : > { %v3425_v40 = vpack.c.bf16 %v3424_v18, %v3424_v18 }
0x1fa9   : > { %4095 = vmatmul.mubr.msk.bf16.vlgmr.msra.gmra.mrb[88].mxu1 %vm2214_vm6, %v3425_v40 }
0x207c   : > { %v3463_v41 = vpop.f32.mrb[88].mxu1 }
0x207d   : > { %v3464_v42 = vadd.f32 %v4793_v43, %v3463_v41  ;;  %v4096_v28 = vpop.f32.mrb[89].mxu1 }
0x207e   : > { %v3466_v19 = vpop.f32.mrb[90].mxu1 }
0x207f   : > { %v4097_v35 = vpop.f32.mrb[91].mxu1  ;;  %v3469_v22 = vadd.f32 %v3464_v42, %v3379_v17 }
0x2081   : > { %v3470_v30 = vsel %vm856_vm1, %v3469_v22, 0.0 }
0x2082   : > { %3471 = vadd.xlane.f32.xlu0 %v3470_v30 }
0x210f   : > { %v3472_v44 = vpop.xlane.xlu0 %3471 }
0x2110   : > { %v3473_v10 = vmul.f32 0.03125, %v3472_v44 }
0x2112   : > { %v3474_v32 = vsub.f32 %v3469_v22, %v3473_v10 }
0x2114   : > { %v3475_v45 = vmul.f32 %v3474_v32, %v3474_v32 }
0x2116   : > { %v3476_v14 = vsel %vm856_vm1, %v3475_v45, 0.0 }
0x2117   : > { %3477 = vadd.xlane.f32.xlu0 %v3476_v14 }
0x21a4   : > { %v3478_v47 = vpop.xlane.xlu0 %3477 }
0x21a5   : > { %v3479_v48 = vmul.f32 0.03125, %v3478_v47 }
0x21a7   : > { %v3480_v50 = vadd.f32 1e-05, %v3479_v48 }
0x21a9   : > { %4210 = vrsqrt.f32 %v3480_v50 }
0x21b3   : > { %v4211_v53 = vpop.eup %4210 }
0x21b4   : > { %v3482_v43 = vmul.f32 %v4211_v53, %v3474_v32 }
0x21b6   : > { %v3483_v54 = vmul.f32 %v4801_v6, %v3482_v43  ;;  %v3683_v6 = vld [vmem:[%s5060_s22] ss:$0 sm:$0xff] }
0x21b8   : > { %v3484_v56 = vadd.f32 %v4806_v13, %v3483_v54 }
0x21ba   : > { %v3485_v57 = vsel %vm856_vm1, %v3484_v56, 0.0 }
0x21bb   : > { %3486 = vadd.xlane.f32.xlu1 %v3485_v57 }
0x2248   : > { %v3487_v58 = vpop.xlane.xlu1 %3486 }
0x2249   : > { %v3488_v7 = vmul.f32 0.03125, %v3487_v58 }
0x224b   : > { %v3489_v59 = vsub.f32 %v3484_v56, %v3488_v7 }
0x224d   : > { %v3490_v62 = vmul.f32 %v3489_v59, %v3489_v59 }
0x224f   : > { %v3491_v55 = vsel %vm856_vm1, %v3490_v62, 0.0 }
0x2250   : > { %3492 = vadd.xlane.f32.xlu0 %v3491_v55 }
0x22dd   : > { %v3493_v37 = vpop.xlane.xlu0 %3492 }
0x22de   : > { %v3494_v29 = vmul.f32 0.03125, %v3493_v37 }
0x22e0   : > { %v3495_v63 = vadd.f32 1e-05, %v3494_v29 }
0x22e2   : > { %4212 = vrsqrt.f32 %v3495_v63 }
0x22ec   : > { %v4213_v0 = vpop.eup %4212 }
0x22ed   : > { %v3497_v13 = vmul.f32 %v4213_v0, %v3489_v59 }
0x22ef   : > { %v3504_v61 = vmul.f32 %v3683_v6, %v3497_v13 }
0x22f1   : > { %v3511_v11 = vadd.f32 %v3684_v2, %v3504_v61 }
0x22f3   : > { %3512 = vst.msk [vmem:[%s783_s29] sm:$0xff] %vm856_vm1, %v3511_v11 }
0x22f4 PF: > { %s34_s5 = sadd.s32 1, %s4226_s5  }
0x22f5   : > { %p31_p4 = scmp.ge.s32.totalorder %s34_s5, 4  }
0x22f7   :  { %33 = sbr.rel (!%p31_p4) target bundleno = 14 (0xe), region = 155 }

</bundles_post_ra>
